<compile_context>
chip_gen: v7x
topology: tpu7x:2x2x1
jax: 0.10.0
libtpu: 0.0.40
codegen_flags: <defaults>
</compile_context>

<pallas_src>
import jax
import jax.numpy as jnp
from jax import lax
from jax.experimental import pallas as pl
from jax.experimental.pallas import tpu as pltpu

EPS = 1e-5  # nn.InstanceNorm2d default eps


def upsample_layer_kernel(x_ref, w_ref, o_ref):
    # x_ref: (1, H, W, Cin)    original-resolution input, NHWC (compute dtype)
    # w_ref: (4, 4, Cin, CT)   per-(parity=2a+b, tap=2p+q) folded 2x2 weights
    # o_ref: (1, 4*H, W, CT)   parity-blocked output: row (2a+b)*H + i, col j
    _, H4, W, CT = o_ref.shape
    H = H4 // 4
    Cin = x_ref.shape[3]
    HW = H * W

    x = x_ref[0]                                                  # (H, W, Cin)

    # In-kernel 1-px edge halo.  Rows first (cheap, non-sublane axis), then three
    # column-shifted variants so every per-tap window below is a row-only slice.
    xr = jnp.concatenate([x[:1], x, x[H - 1:H]], axis=0)          # (H+2, W, Cin)
    cols = (
        jnp.concatenate([xr[:, :1, :], xr[:, :W - 1, :]], axis=1),   # col offset 0
        xr,                                                          # col offset 1
        jnp.concatenate([xr[:, 1:, :], xr[:, W - 1:W, :]], axis=1),  # col offset 2
    )

    s = jnp.zeros((1, CT), jnp.float32)       # per-channel sum
    sq = jnp.zeros((1, CT), jnp.float32)      # per-channel sum of squares

    # Four parity sub-convolutions; each is 4 shallow matmuls accumulated in f32.
    for a in (0, 1):
        for b in (0, 1):
            acc = jnp.zeros((HW, CT), jnp.float32)
            for p in (0, 1):
                for q in (0, 1):
                    patch = cols[b + q][a + p:a + p + H].reshape(HW, Cin)
                    acc = acc + jnp.dot(patch, w_ref[2 * a + b, 2 * p + q],
                                        preferred_element_type=jnp.float32)
            s = s + jnp.sum(acc, axis=0, keepdims=True)
            sq = sq + jnp.sum(acc * acc, axis=0, keepdims=True)
            k = 2 * a + b
            # Stage the un-normalized part directly in the output block (used as
            # scratch); normalized in place below once full-plane stats are known.
            o_ref[0, k * H:(k + 1) * H, :, :] = acc.reshape(H, W, CT).astype(o_ref.dtype)

    # InstanceNorm2d over the full (2H, 2W) plane = union of the 4 parity planes.
    # Conv bias omitted: a per-channel constant cancels under this normalization.
    npix = jnp.float32(4 * HW)
    mean = (s / npix).reshape(1, 1, CT)
    var = jnp.maximum((sq / npix).reshape(1, 1, CT) - mean * mean, 0.0)
    inv = lax.rsqrt(var + EPS)

    for k in range(4):
        v = o_ref[0, k * H:(k + 1) * H, :, :].astype(jnp.float32)
        o_ref[0, k * H:(k + 1) * H, :, :] = jnp.maximum(
            (v - mean) * inv, 0.0).astype(o_ref.dtype)


def _vmem_limit_bytes(H, W, Cin, CT, in_isz, out_isz):
    """Rough per-step footprint -> scoped VMEM request (capped below v7x's 64 MiB)."""
    x_blk = H * W * Cin * in_isz
    w_blk = 16 * Cin * CT * in_isz
    o_blk = 4 * H * W * CT * out_isz
    halo = 3 * (H + 2) * W * Cin * in_isz                 # xr + 2 shifted variants
    work = H * W * Cin * in_isz + 2 * H * W * CT * 4      # transient patch + f32 acc
    est = 2 * (x_blk + w_blk + o_blk) + halo + work       # double-buffered blocks + live set
    return int(min(max(2 * est, 32 * 1024 * 1024), 48 * 1024 * 1024))


def upsample_layer(x_nchw, w_oihw, bias=None, *, compute_dtype=jnp.bfloat16):
    """Forward pass of UpsampleLayer (norm='instance', act='relu').

    x_nchw: (N, Cin, H, W) -> (N, Cout, 2H, 2W).
    `bias` is intentionally unused: it cancels exactly under InstanceNorm2d
    (affine=False).  This wrapper is ONLY valid for that config.
    """
    N, Cin, H, W = x_nchw.shape
    Cout = w_oihw.shape[0]
    out_dtype = x_nchw.dtype

    # NHWC inside the kernel.  One transpose per call; in an NHWC end-to-end model
    # this (and the output transpose below) would disappear entirely.
    x_nhwc = jnp.transpose(x_nchw, (0, 2, 3, 1)).astype(compute_dtype)

    # Fold the 3x3 kernel into parity-specific 2x2 kernels:
    #   row weights  a=0: [w0, w1+w2]   a=1: [w0+w1, w2]   (same for columns).
    A = jnp.array([[[1., 0., 0.], [0., 1., 1.]],
                   [[1., 1., 0.], [0., 0., 1.]]], dtype=jnp.float32)     # A[a, p, kh]
    K = jnp.einsum('aph,bqk,ochk->abpqco', A, A, w_oihw.astype(jnp.float32))
    w_par = K.reshape(4, 4, Cin, Cout).astype(compute_dtype)  # [(2a+b), (2p+q), cin, cout]

    # Channel tiling: lane-dense 128-wide blocks when possible, else the full Cout
    # (block == full dim satisfies the (8,128) rule).  For Cout < 128 the store is
    # masked; zero-padding Cout to 128 is an optional trade (more bytes, unmasked).
    CT = 128 if (Cout % 128 == 0) else Cout
    num_cb = Cout // CT

    vmem_limit = _vmem_limit_bytes(H, W, Cin, CT,
                                   jnp.dtype(compute_dtype).itemsize,
                                   jnp.dtype(out_dtype).itemsize)

    out = pl.pallas_call(
        upsample_layer_kernel,
        out_shape=jax.ShapeDtypeStruct((N, 4 * H, W, Cout), out_dtype),
        grid_spec=pltpu.PrefetchScalarGridSpec(
            num_scalar_prefetch=0,
            grid=(N, num_cb),                    # channel blocks innermost: input block
            in_specs=[                           # stays resident across them (no re-DMA)
                pl.BlockSpec((1, H, W, Cin), lambda n, cb: (n, 0, 0, 0)),
                pl.BlockSpec((4, 4, Cin, CT), lambda n, cb: (0, 0, 0, cb)),
            ],
            out_specs=pl.BlockSpec((1, 4 * H, W, CT), lambda n, cb: (n, 0, 0, cb)),
        ),
        compiler_params=pltpu.CompilerParams(
            dimension_semantics=("parallel", "parallel"),
            vmem_limit_bytes=vmem_limit,
        ),
    )(x_nhwc, w_par)

    # Parity-blocked (n, (2a+b)*H+i, j, c) -> NCHW (n, c, 2i+a, 2j+b).
    # Single fused XLA transpose (required anyway for the NCHW interface); keep the
    # NHWC / parity-blocked layout instead when embedding in an NHWC model.
    out6 = out.reshape(N, 2, 2, H, W, Cout)                  # (n, a, b, i, j, c)
    out_nchw = jnp.transpose(out6, (0, 5, 3, 1, 4, 2))       # (n, c, i, a, j, b)
    return out_nchw.reshape(N, Cout, 2 * H, 2 * W)


def reference(x_nchw, w_oihw, bias):
    """Pure-JAX reference matching the PyTorch module (includes the bias)."""
    x_up = jnp.repeat(jnp.repeat(x_nchw, 2, axis=2), 2, axis=3)
    x_pad = jnp.pad(x_up, ((0, 0), (0, 0), (1, 1), (1, 1)), mode="reflect")
    y = lax.conv_general_dilated(
        x_pad, w_oihw, window_strides=(1, 1), padding="VALID",
        dimension_numbers=("NCHW", "OIHW", "NCHW"))
    y = y + bias[None, :, None, None]
    mean = jnp.mean(y, axis=(2, 3), keepdims=True)
    var = jnp.var(y, axis=(2, 3), keepdims=True)
    y = (y - mean) / jnp.sqrt(var + EPS)
    return jnp.maximum(y, 0.0)


if __name__ == "__main__":
    key = jax.random.PRNGKey(0)
    k1, k2, k3 = jax.random.split(key, 3)

    N, Cin, Cout, H, W = 2, 4, 4, 16, 16
    x = jax.random.normal(k1, (N, Cin, H, W), jnp.float32)

    # Deterministic parameter init (shapes match nn.Conv2d(Cin, Cout, 3), bias=True).
    fan_in = Cin * 3 * 3
    bound = 1.0 / (fan_in ** 0.5)
    w = jax.random.uniform(k2, (Cout, Cin, 3, 3), jnp.float32, -bound, bound)
    b = jax.random.uniform(k3, (Cout,), jnp.float32, -bound, bound)

    ref = reference(x, w, b)

    # Exact-semantics path (f32 MXU operands): tight tolerance vs the PyTorch math.
    out_f32 = jax.block_until_ready(upsample_layer(x, w, b, compute_dtype=jnp.float32))
    assert out_f32.shape == (N, Cout, 2 * H, 2 * W), out_f32.shape
    assert jnp.allclose(out_f32, ref, atol=1e-4, rtol=1e-4), \
        float(jnp.max(jnp.abs(out_f32 - ref)))

    # Fast path (bf16 MXU operands, f32 accumulation / norm): bf16-level tolerance.
    out_bf16 = jax.block_until_ready(upsample_layer(x, w, b))
    assert out_bf16.shape == (N, Cout, 2 * H, 2 * W), out_bf16.shape
    assert jnp.allclose(out_bf16, ref, atol=3e-2, rtol=3e-2), \
        float(jnp.max(jnp.abs(out_bf16 - ref)))

    print("KERNEL_OK")
</pallas_src>

<mosaic_0001>
module attributes {stable_mosaic.version = 11 : i64} {
  func.func @upsample_layer_kernel(%arg0: i32, %arg1: i32, %arg2: memref<1x16x16x4xf32, #tpu.memory_space<vmem>>, %arg3: memref<4x4x4x4xf32, #tpu.memory_space<vmem>>, %arg4: memref<1x64x16x4xf32, #tpu.memory_space<vmem>>) attributes {dimension_semantics = [#tpu.dimension_semantics<parallel>, #tpu.dimension_semantics<parallel>], iteration_bounds = array<i64: 2, 1>, scalar_prefetch = 0 : i64, scratch_operands = 0 : i64, tpu.core_type = #tpu.core_type<tc>, window_params = [{transform_indices = @transform_0, window_bounds = array<i64: 1, 16, 16, 4>}, {transform_indices = @transform_1, window_bounds = array<i64: 4, 4, 4, 4>}, {transform_indices = @transform_2, window_bounds = array<i64: 1, 64, 16, 4>}]} {
    %c0 = arith.constant 0 : index
    %c0_0 = arith.constant 0 : index
    %c0_1 = arith.constant 0 : index
    %c0_2 = arith.constant 0 : index
    %0 = vector.load %arg2[%c0, %c0_0, %c0_1, %c0_2] : memref<1x16x16x4xf32, #tpu.memory_space<vmem>>, vector<1x16x16x4xf32>
    %1 = vector.shape_cast %0 : vector<1x16x16x4xf32> to vector<16x16x4xf32>
    %2 = vector.extract_strided_slice %1 {offsets = [0, 0, 0], sizes = [1, 16, 4], strides = [1, 1, 1]} : vector<16x16x4xf32> to vector<1x16x4xf32>
    %3 = vector.extract_strided_slice %1 {offsets = [15, 0, 0], sizes = [1, 16, 4], strides = [1, 1, 1]} : vector<16x16x4xf32> to vector<1x16x4xf32>
    %4 = tpu.concatenate %2, %1, %3 in 0 : vector<1x16x4xf32>, vector<16x16x4xf32>, vector<1x16x4xf32> -> vector<18x16x4xf32>
    %5 = vector.extract_strided_slice %4 {offsets = [0, 0, 0], sizes = [18, 1, 4], strides = [1, 1, 1]} : vector<18x16x4xf32> to vector<18x1x4xf32>
    %6 = vector.extract_strided_slice %4 {offsets = [0, 0, 0], sizes = [18, 15, 4], strides = [1, 1, 1]} : vector<18x16x4xf32> to vector<18x15x4xf32>
    %7 = tpu.concatenate %5, %6 in 1 : vector<18x1x4xf32>, vector<18x15x4xf32> -> vector<18x16x4xf32>
    %8 = vector.extract_strided_slice %4 {offsets = [0, 1, 0], sizes = [18, 15, 4], strides = [1, 1, 1]} : vector<18x16x4xf32> to vector<18x15x4xf32>
    %9 = vector.extract_strided_slice %4 {offsets = [0, 15, 0], sizes = [18, 1, 4], strides = [1, 1, 1]} : vector<18x16x4xf32> to vector<18x1x4xf32>
    %10 = tpu.concatenate %8, %9 in 1 : vector<18x15x4xf32>, vector<18x1x4xf32> -> vector<18x16x4xf32>
    %cst = arith.constant 0.000000e+00 : f32
    %11 = vector.broadcast %cst : f32 to vector<1x4xf32>
    %cst_3 = arith.constant 0.000000e+00 : f32
    %12 = vector.broadcast %cst_3 : f32 to vector<1x4xf32>
    %cst_4 = arith.constant 0.000000e+00 : f32
    %13 = vector.broadcast %cst_4 : f32 to vector<256x4xf32>
    %14 = vector.extract_strided_slice %7 {offsets = [0, 0, 0], sizes = [16, 16, 4], strides = [1, 1, 1]} : vector<18x16x4xf32> to vector<16x16x4xf32>
    %15 = vector.shape_cast %14 : vector<16x16x4xf32> to vector<256x4xf32>
    %c0_5 = arith.constant 0 : index
    %c0_6 = arith.constant 0 : index
    %c0_7 = arith.constant 0 : index
    %c0_8 = arith.constant 0 : index
    %16 = vector.load %arg3[%c0_5, %c0_6, %c0_7, %c0_8] : memref<4x4x4x4xf32, #tpu.memory_space<vmem>>, vector<1x1x4x4xf32>
    %17 = vector.shape_cast %16 : vector<1x1x4x4xf32> to vector<4x4xf32>
    %cst_9 = arith.constant dense<0.000000e+00> : vector<256x4xf32>
    %18 = tpu.matmul %15, %17, %cst_9 {dimension_numbers = #tpu.dot_dimension_numbers<[1], [0], [0], [1], [0, 0, 1, 1], [], []>} : vector<256x4xf32>, vector<4x4xf32>, vector<256x4xf32> -> vector<256x4xf32>
    %19 = arith.addf %13, %18 : vector<256x4xf32>
    %20 = vector.extract_strided_slice %4 {offsets = [0, 0, 0], sizes = [16, 16, 4], strides = [1, 1, 1]} : vector<18x16x4xf32> to vector<16x16x4xf32>
    %21 = vector.shape_cast %20 : vector<16x16x4xf32> to vector<256x4xf32>
    %c0_10 = arith.constant 0 : index
    %c1 = arith.constant 1 : index
    %c0_11 = arith.constant 0 : index
    %c0_12 = arith.constant 0 : index
    %22 = vector.load %arg3[%c0_10, %c1, %c0_11, %c0_12] : memref<4x4x4x4xf32, #tpu.memory_space<vmem>>, vector<1x1x4x4xf32>
    %23 = vector.shape_cast %22 : vector<1x1x4x4xf32> to vector<4x4xf32>
    %cst_13 = arith.constant dense<0.000000e+00> : vector<256x4xf32>
    %24 = tpu.matmul %21, %23, %cst_13 {dimension_numbers = #tpu.dot_dimension_numbers<[1], [0], [0], [1], [0, 0, 1, 1], [], []>} : vector<256x4xf32>, vector<4x4xf32>, vector<256x4xf32> -> vector<256x4xf32>
    %25 = arith.addf %19, %24 : vector<256x4xf32>
    %26 = vector.extract_strided_slice %7 {offsets = [1, 0, 0], sizes = [16, 16, 4], strides = [1, 1, 1]} : vector<18x16x4xf32> to vector<16x16x4xf32>
    %27 = vector.shape_cast %26 : vector<16x16x4xf32> to vector<256x4xf32>
    %c0_14 = arith.constant 0 : index
    %c2 = arith.constant 2 : index
    %c0_15 = arith.constant 0 : index
    %c0_16 = arith.constant 0 : index
    %28 = vector.load %arg3[%c0_14, %c2, %c0_15, %c0_16] : memref<4x4x4x4xf32, #tpu.memory_space<vmem>>, vector<1x1x4x4xf32>
    %29 = vector.shape_cast %28 : vector<1x1x4x4xf32> to vector<4x4xf32>
    %cst_17 = arith.constant dense<0.000000e+00> : vector<256x4xf32>
    %30 = tpu.matmul %27, %29, %cst_17 {dimension_numbers = #tpu.dot_dimension_numbers<[1], [0], [0], [1], [0, 0, 1, 1], [], []>} : vector<256x4xf32>, vector<4x4xf32>, vector<256x4xf32> -> vector<256x4xf32>
    %31 = arith.addf %25, %30 : vector<256x4xf32>
    %32 = vector.extract_strided_slice %4 {offsets = [1, 0, 0], sizes = [16, 16, 4], strides = [1, 1, 1]} : vector<18x16x4xf32> to vector<16x16x4xf32>
    %33 = vector.shape_cast %32 : vector<16x16x4xf32> to vector<256x4xf32>
    %c0_18 = arith.constant 0 : index
    %c3 = arith.constant 3 : index
    %c0_19 = arith.constant 0 : index
    %c0_20 = arith.constant 0 : index
    %34 = vector.load %arg3[%c0_18, %c3, %c0_19, %c0_20] : memref<4x4x4x4xf32, #tpu.memory_space<vmem>>, vector<1x1x4x4xf32>
    %35 = vector.shape_cast %34 : vector<1x1x4x4xf32> to vector<4x4xf32>
    %cst_21 = arith.constant dense<0.000000e+00> : vector<256x4xf32>
    %36 = tpu.matmul %33, %35, %cst_21 {dimension_numbers = #tpu.dot_dimension_numbers<[1], [0], [0], [1], [0, 0, 1, 1], [], []>} : vector<256x4xf32>, vector<4x4xf32>, vector<256x4xf32> -> vector<256x4xf32>
    %37 = arith.addf %31, %36 : vector<256x4xf32>
    %cst_22 = arith.constant dense<0.000000e+00> : vector<4xf32>
    %38 = vector.multi_reduction <add>, %37, %cst_22 [0] : vector<256x4xf32> to vector<4xf32>
    %39 = vector.shape_cast %38 : vector<4xf32> to vector<1x4xf32>
    %40 = arith.addf %11, %39 : vector<1x4xf32>
    %41 = arith.mulf %37, %37 : vector<256x4xf32>
    %cst_23 = arith.constant dense<0.000000e+00> : vector<4xf32>
    %42 = vector.multi_reduction <add>, %41, %cst_23 [0] : vector<256x4xf32> to vector<4xf32>
    %43 = vector.shape_cast %42 : vector<4xf32> to vector<1x4xf32>
    %44 = arith.addf %12, %43 : vector<1x4xf32>
    %45 = vector.shape_cast %37 : vector<256x4xf32> to vector<16x16x4xf32>
    %c0_24 = arith.constant 0 : index
    %c0_25 = arith.constant 0 : index
    %c0_26 = arith.constant 0 : index
    %c0_27 = arith.constant 0 : index
    %46 = vector.load %arg4[%c0_24, %c0_25, %c0_26, %c0_27] : memref<1x64x16x4xf32, #tpu.memory_space<vmem>>, vector<1x16x16x4xf32>
    %47 = vector.shape_cast %46 : vector<1x16x16x4xf32> to vector<16x16x4xf32>
    %48 = vector.shape_cast %45 : vector<16x16x4xf32> to vector<1x16x16x4xf32>
    tpu.vector_store %arg4[%c0_24, %c0_25, %c0_26, %c0_27], %48 {strides = array<i32>} : memref<1x64x16x4xf32, #tpu.memory_space<vmem>>, vector<1x16x16x4xf32>,
    %cst_28 = arith.constant 0.000000e+00 : f32
    %49 = vector.broadcast %cst_28 : f32 to vector<256x4xf32>
    %50 = vector.extract_strided_slice %4 {offsets = [0, 0, 0], sizes = [16, 16, 4], strides = [1, 1, 1]} : vector<18x16x4xf32> to vector<16x16x4xf32>
    %51 = vector.shape_cast %50 : vector<16x16x4xf32> to vector<256x4xf32>
    %c1_29 = arith.constant 1 : index
    %c0_30 = arith.constant 0 : index
    %c0_31 = arith.constant 0 : index
    %c0_32 = arith.constant 0 : index
    %52 = vector.load %arg3[%c1_29, %c0_30, %c0_31, %c0_32] : memref<4x4x4x4xf32, #tpu.memory_space<vmem>>, vector<1x1x4x4xf32>
    %53 = vector.shape_cast %52 : vector<1x1x4x4xf32> to vector<4x4xf32>
    %cst_33 = arith.constant dense<0.000000e+00> : vector<256x4xf32>
    %54 = tpu.matmul %51, %53, %cst_33 {dimension_numbers = #tpu.dot_dimension_numbers<[1], [0], [0], [1], [0, 0, 1, 1], [], []>} : vector<256x4xf32>, vector<4x4xf32>, vector<256x4xf32> -> vector<256x4xf32>
    %55 = arith.addf %49, %54 : vector<256x4xf32>
    %56 = vector.extract_strided_slice %10 {offsets = [0, 0, 0], sizes = [16, 16, 4], strides = [1, 1, 1]} : vector<18x16x4xf32> to vector<16x16x4xf32>
    %57 = vector.shape_cast %56 : vector<16x16x4xf32> to vector<256x4xf32>
    %c1_34 = arith.constant 1 : index
    %c1_35 = arith.constant 1 : index
    %c0_36 = arith.constant 0 : index
    %c0_37 = arith.constant 0 : index
    %58 = vector.load %arg3[%c1_34, %c1_35, %c0_36, %c0_37] : memref<4x4x4x4xf32, #tpu.memory_space<vmem>>, vector<1x1x4x4xf32>
    %59 = vector.shape_cast %58 : vector<1x1x4x4xf32> to vector<4x4xf32>
    %cst_38 = arith.constant dense<0.000000e+00> : vector<256x4xf32>
    %60 = tpu.matmul %57, %59, %cst_38 {dimension_numbers = #tpu.dot_dimension_numbers<[1], [0], [0], [1], [0, 0, 1, 1], [], []>} : vector<256x4xf32>, vector<4x4xf32>, vector<256x4xf32> -> vector<256x4xf32>
    %61 = arith.addf %55, %60 : vector<256x4xf32>
    %62 = vector.extract_strided_slice %4 {offsets = [1, 0, 0], sizes = [16, 16, 4], strides = [1, 1, 1]} : vector<18x16x4xf32> to vector<16x16x4xf32>
    %63 = vector.shape_cast %62 : vector<16x16x4xf32> to vector<256x4xf32>
    %c1_39 = arith.constant 1 : index
    %c2_40 = arith.constant 2 : index
    %c0_41 = arith.constant 0 : index
    %c0_42 = arith.constant 0 : index
    %64 = vector.load %arg3[%c1_39, %c2_40, %c0_41, %c0_42] : memref<4x4x4x4xf32, #tpu.memory_space<vmem>>, vector<1x1x4x4xf32>
    %65 = vector.shape_cast %64 : vector<1x1x4x4xf32> to vector<4x4xf32>
    %cst_43 = arith.constant dense<0.000000e+00> : vector<256x4xf32>
    %66 = tpu.matmul %63, %65, %cst_43 {dimension_numbers = #tpu.dot_dimension_numbers<[1], [0], [0], [1], [0, 0, 1, 1], [], []>} : vector<256x4xf32>, vector<4x4xf32>, vector<256x4xf32> -> vector<256x4xf32>
    %67 = arith.addf %61, %66 : vector<256x4xf32>
    %68 = vector.extract_strided_slice %10 {offsets = [1, 0, 0], sizes = [16, 16, 4], strides = [1, 1, 1]} : vector<18x16x4xf32> to vector<16x16x4xf32>
    %69 = vector.shape_cast %68 : vector<16x16x4xf32> to vector<256x4xf32>
    %c1_44 = arith.constant 1 : index
    %c3_45 = arith.constant 3 : index
    %c0_46 = arith.constant 0 : index
    %c0_47 = arith.constant 0 : index
    %70 = vector.load %arg3[%c1_44, %c3_45, %c0_46, %c0_47] : memref<4x4x4x4xf32, #tpu.memory_space<vmem>>, vector<1x1x4x4xf32>
    %71 = vector.shape_cast %70 : vector<1x1x4x4xf32> to vector<4x4xf32>
    %cst_48 = arith.constant dense<0.000000e+00> : vector<256x4xf32>
    %72 = tpu.matmul %69, %71, %cst_48 {dimension_numbers = #tpu.dot_dimension_numbers<[1], [0], [0], [1], [0, 0, 1, 1], [], []>} : vector<256x4xf32>, vector<4x4xf32>, vector<256x4xf32> -> vector<256x4xf32>
    %73 = arith.addf %67, %72 : vector<256x4xf32>
    %cst_49 = arith.constant dense<0.000000e+00> : vector<4xf32>
    %74 = vector.multi_reduction <add>, %73, %cst_49 [0] : vector<256x4xf32> to vector<4xf32>
    %75 = vector.shape_cast %74 : vector<4xf32> to vector<1x4xf32>
    %76 = arith.addf %40, %75 : vector<1x4xf32>
    %77 = arith.mulf %73, %73 : vector<256x4xf32>
    %cst_50 = arith.constant dense<0.000000e+00> : vector<4xf32>
    %78 = vector.multi_reduction <add>, %77, %cst_50 [0] : vector<256x4xf32> to vector<4xf32>
    %79 = vector.shape_cast %78 : vector<4xf32> to vector<1x4xf32>
    %80 = arith.addf %44, %79 : vector<1x4xf32>
    %81 = vector.shape_cast %73 : vector<256x4xf32> to vector<16x16x4xf32>
    %c0_51 = arith.constant 0 : index
    %c16 = arith.constant 16 : index
    %c0_52 = arith.constant 0 : index
    %c0_53 = arith.constant 0 : index
    %82 = vector.load %arg4[%c0_51, %c16, %c0_52, %c0_53] : memref<1x64x16x4xf32, #tpu.memory_space<vmem>>, vector<1x16x16x4xf32>
    %83 = vector.shape_cast %82 : vector<1x16x16x4xf32> to vector<16x16x4xf32>
    %84 = vector.shape_cast %81 : vector<16x16x4xf32> to vector<1x16x16x4xf32>
    tpu.vector_store %arg4[%c0_51, %c16, %c0_52, %c0_53], %84 {strides = array<i32>} : memref<1x64x16x4xf32, #tpu.memory_space<vmem>>, vector<1x16x16x4xf32>,
    %cst_54 = arith.constant 0.000000e+00 : f32
    %85 = vector.broadcast %cst_54 : f32 to vector<256x4xf32>
    %86 = vector.extract_strided_slice %7 {offsets = [1, 0, 0], sizes = [16, 16, 4], strides = [1, 1, 1]} : vector<18x16x4xf32> to vector<16x16x4xf32>
    %87 = vector.shape_cast %86 : vector<16x16x4xf32> to vector<256x4xf32>
    %c2_55 = arith.constant 2 : index
    %c0_56 = arith.constant 0 : index
    %c0_57 = arith.constant 0 : index
    %c0_58 = arith.constant 0 : index
    %88 = vector.load %arg3[%c2_55, %c0_56, %c0_57, %c0_58] : memref<4x4x4x4xf32, #tpu.memory_space<vmem>>, vector<1x1x4x4xf32>
    %89 = vector.shape_cast %88 : vector<1x1x4x4xf32> to vector<4x4xf32>
    %cst_59 = arith.constant dense<0.000000e+00> : vector<256x4xf32>
    %90 = tpu.matmul %87, %89, %cst_59 {dimension_numbers = #tpu.dot_dimension_numbers<[1], [0], [0], [1], [0, 0, 1, 1], [], []>} : vector<256x4xf32>, vector<4x4xf32>, vector<256x4xf32> -> vector<256x4xf32>
    %91 = arith.addf %85, %90 : vector<256x4xf32>
    %92 = vector.extract_strided_slice %4 {offsets = [1, 0, 0], sizes = [16, 16, 4], strides = [1, 1, 1]} : vector<18x16x4xf32> to vector<16x16x4xf32>
    %93 = vector.shape_cast %92 : vector<16x16x4xf32> to vector<256x4xf32>
    %c2_60 = arith.constant 2 : index
    %c1_61 = arith.constant 1 : index
    %c0_62 = arith.constant 0 : index
    %c0_63 = arith.constant 0 : index
    %94 = vector.load %arg3[%c2_60, %c1_61, %c0_62, %c0_63] : memref<4x4x4x4xf32, #tpu.memory_space<vmem>>, vector<1x1x4x4xf32>
    %95 = vector.shape_cast %94 : vector<1x1x4x4xf32> to vector<4x4xf32>
    %cst_64 = arith.constant dense<0.000000e+00> : vector<256x4xf32>
    %96 = tpu.matmul %93, %95, %cst_64 {dimension_numbers = #tpu.dot_dimension_numbers<[1], [0], [0], [1], [0, 0, 1, 1], [], []>} : vector<256x4xf32>, vector<4x4xf32>, vector<256x4xf32> -> vector<256x4xf32>
    %97 = arith.addf %91, %96 : vector<256x4xf32>
    %98 = vector.extract_strided_slice %7 {offsets = [2, 0, 0], sizes = [16, 16, 4], strides = [1, 1, 1]} : vector<18x16x4xf32> to vector<16x16x4xf32>
    %99 = vector.shape_cast %98 : vector<16x16x4xf32> to vector<256x4xf32>
    %c2_65 = arith.constant 2 : index
    %c2_66 = arith.constant 2 : index
    %c0_67 = arith.constant 0 : index
    %c0_68 = arith.constant 0 : index
    %100 = vector.load %arg3[%c2_65, %c2_66, %c0_67, %c0_68] : memref<4x4x4x4xf32, #tpu.memory_space<vmem>>, vector<1x1x4x4xf32>
    %101 = vector.shape_cast %100 : vector<1x1x4x4xf32> to vector<4x4xf32>
    %cst_69 = arith.constant dense<0.000000e+00> : vector<256x4xf32>
    %102 = tpu.matmul %99, %101, %cst_69 {dimension_numbers = #tpu.dot_dimension_numbers<[1], [0], [0], [1], [0, 0, 1, 1], [], []>} : vector<256x4xf32>, vector<4x4xf32>, vector<256x4xf32> -> vector<256x4xf32>
    %103 = arith.addf %97, %102 : vector<256x4xf32>
    %104 = vector.extract_strided_slice %4 {offsets = [2, 0, 0], sizes = [16, 16, 4], strides = [1, 1, 1]} : vector<18x16x4xf32> to vector<16x16x4xf32>
    %105 = vector.shape_cast %104 : vector<16x16x4xf32> to vector<256x4xf32>
    %c2_70 = arith.constant 2 : index
    %c3_71 = arith.constant 3 : index
    %c0_72 = arith.constant 0 : index
    %c0_73 = arith.constant 0 : index
    %106 = vector.load %arg3[%c2_70, %c3_71, %c0_72, %c0_73] : memref<4x4x4x4xf32, #tpu.memory_space<vmem>>, vector<1x1x4x4xf32>
    %107 = vector.shape_cast %106 : vector<1x1x4x4xf32> to vector<4x4xf32>
    %cst_74 = arith.constant dense<0.000000e+00> : vector<256x4xf32>
    %108 = tpu.matmul %105, %107, %cst_74 {dimension_numbers = #tpu.dot_dimension_numbers<[1], [0], [0], [1], [0, 0, 1, 1], [], []>} : vector<256x4xf32>, vector<4x4xf32>, vector<256x4xf32> -> vector<256x4xf32>
    %109 = arith.addf %103, %108 : vector<256x4xf32>
    %cst_75 = arith.constant dense<0.000000e+00> : vector<4xf32>
    %110 = vector.multi_reduction <add>, %109, %cst_75 [0] : vector<256x4xf32> to vector<4xf32>
    %111 = vector.shape_cast %110 : vector<4xf32> to vector<1x4xf32>
    %112 = arith.addf %76, %111 : vector<1x4xf32>
    %113 = arith.mulf %109, %109 : vector<256x4xf32>
    %cst_76 = arith.constant dense<0.000000e+00> : vector<4xf32>
    %114 = vector.multi_reduction <add>, %113, %cst_76 [0] : vector<256x4xf32> to vector<4xf32>
    %115 = vector.shape_cast %114 : vector<4xf32> to vector<1x4xf32>
    %116 = arith.addf %80, %115 : vector<1x4xf32>
    %117 = vector.shape_cast %109 : vector<256x4xf32> to vector<16x16x4xf32>
    %c0_77 = arith.constant 0 : index
    %c32 = arith.constant 32 : index
    %c0_78 = arith.constant 0 : index
    %c0_79 = arith.constant 0 : index
    %118 = vector.load %arg4[%c0_77, %c32, %c0_78, %c0_79] : memref<1x64x16x4xf32, #tpu.memory_space<vmem>>, vector<1x16x16x4xf32>
    %119 = vector.shape_cast %118 : vector<1x16x16x4xf32> to vector<16x16x4xf32>
    %120 = vector.shape_cast %117 : vector<16x16x4xf32> to vector<1x16x16x4xf32>
    tpu.vector_store %arg4[%c0_77, %c32, %c0_78, %c0_79], %120 {strides = array<i32>} : memref<1x64x16x4xf32, #tpu.memory_space<vmem>>, vector<1x16x16x4xf32>,
    %cst_80 = arith.constant 0.000000e+00 : f32
    %121 = vector.broadcast %cst_80 : f32 to vector<256x4xf32>
    %122 = vector.extract_strided_slice %4 {offsets = [1, 0, 0], sizes = [16, 16, 4], strides = [1, 1, 1]} : vector<18x16x4xf32> to vector<16x16x4xf32>
    %123 = vector.shape_cast %122 : vector<16x16x4xf32> to vector<256x4xf32>
    %c3_81 = arith.constant 3 : index
    %c0_82 = arith.constant 0 : index
    %c0_83 = arith.constant 0 : index
    %c0_84 = arith.constant 0 : index
    %124 = vector.load %arg3[%c3_81, %c0_82, %c0_83, %c0_84] : memref<4x4x4x4xf32, #tpu.memory_space<vmem>>, vector<1x1x4x4xf32>
    %125 = vector.shape_cast %124 : vector<1x1x4x4xf32> to vector<4x4xf32>
    %cst_85 = arith.constant dense<0.000000e+00> : vector<256x4xf32>
    %126 = tpu.matmul %123, %125, %cst_85 {dimension_numbers = #tpu.dot_dimension_numbers<[1], [0], [0], [1], [0, 0, 1, 1], [], []>} : vector<256x4xf32>, vector<4x4xf32>, vector<256x4xf32> -> vector<256x4xf32>
    %127 = arith.addf %121, %126 : vector<256x4xf32>
    %128 = vector.extract_strided_slice %10 {offsets = [1, 0, 0], sizes = [16, 16, 4], strides = [1, 1, 1]} : vector<18x16x4xf32> to vector<16x16x4xf32>
    %129 = vector.shape_cast %128 : vector<16x16x4xf32> to vector<256x4xf32>
    %c3_86 = arith.constant 3 : index
    %c1_87 = arith.constant 1 : index
    %c0_88 = arith.constant 0 : index
    %c0_89 = arith.constant 0 : index
    %130 = vector.load %arg3[%c3_86, %c1_87, %c0_88, %c0_89] : memref<4x4x4x4xf32, #tpu.memory_space<vmem>>, vector<1x1x4x4xf32>
    %131 = vector.shape_cast %130 : vector<1x1x4x4xf32> to vector<4x4xf32>
    %cst_90 = arith.constant dense<0.000000e+00> : vector<256x4xf32>
    %132 = tpu.matmul %129, %131, %cst_90 {dimension_numbers = #tpu.dot_dimension_numbers<[1], [0], [0], [1], [0, 0, 1, 1], [], []>} : vector<256x4xf32>, vector<4x4xf32>, vector<256x4xf32> -> vector<256x4xf32>
    %133 = arith.addf %127, %132 : vector<256x4xf32>
    %134 = vector.extract_strided_slice %4 {offsets = [2, 0, 0], sizes = [16, 16, 4], strides = [1, 1, 1]} : vector<18x16x4xf32> to vector<16x16x4xf32>
    %135 = vector.shape_cast %134 : vector<16x16x4xf32> to vector<256x4xf32>
    %c3_91 = arith.constant 3 : index
    %c2_92 = arith.constant 2 : index
    %c0_93 = arith.constant 0 : index
    %c0_94 = arith.constant 0 : index
    %136 = vector.load %arg3[%c3_91, %c2_92, %c0_93, %c0_94] : memref<4x4x4x4xf32, #tpu.memory_space<vmem>>, vector<1x1x4x4xf32>
    %137 = vector.shape_cast %136 : vector<1x1x4x4xf32> to vector<4x4xf32>
    %cst_95 = arith.constant dense<0.000000e+00> : vector<256x4xf32>
    %138 = tpu.matmul %135, %137, %cst_95 {dimension_numbers = #tpu.dot_dimension_numbers<[1], [0], [0], [1], [0, 0, 1, 1], [], []>} : vector<256x4xf32>, vector<4x4xf32>, vector<256x4xf32> -> vector<256x4xf32>
    %139 = arith.addf %133, %138 : vector<256x4xf32>
    %140 = vector.extract_strided_slice %10 {offsets = [2, 0, 0], sizes = [16, 16, 4], strides = [1, 1, 1]} : vector<18x16x4xf32> to vector<16x16x4xf32>
    %141 = vector.shape_cast %140 : vector<16x16x4xf32> to vector<256x4xf32>
    %c3_96 = arith.constant 3 : index
    %c3_97 = arith.constant 3 : index
    %c0_98 = arith.constant 0 : index
    %c0_99 = arith.constant 0 : index
    %142 = vector.load %arg3[%c3_96, %c3_97, %c0_98, %c0_99] : memref<4x4x4x4xf32, #tpu.memory_space<vmem>>, vector<1x1x4x4xf32>
    %143 = vector.shape_cast %142 : vector<1x1x4x4xf32> to vector<4x4xf32>
    %cst_100 = arith.constant dense<0.000000e+00> : vector<256x4xf32>
    %144 = tpu.matmul %141, %143, %cst_100 {dimension_numbers = #tpu.dot_dimension_numbers<[1], [0], [0], [1], [0, 0, 1, 1], [], []>} : vector<256x4xf32>, vector<4x4xf32>, vector<256x4xf32> -> vector<256x4xf32>
    %145 = arith.addf %139, %144 : vector<256x4xf32>
    %cst_101 = arith.constant dense<0.000000e+00> : vector<4xf32>
    %146 = vector.multi_reduction <add>, %145, %cst_101 [0] : vector<256x4xf32> to vector<4xf32>
    %147 = vector.shape_cast %146 : vector<4xf32> to vector<1x4xf32>
    %148 = arith.addf %112, %147 : vector<1x4xf32>
    %149 = arith.mulf %145, %145 : vector<256x4xf32>
    %cst_102 = arith.constant dense<0.000000e+00> : vector<4xf32>
    %150 = vector.multi_reduction <add>, %149, %cst_102 [0] : vector<256x4xf32> to vector<4xf32>
    %151 = vector.shape_cast %150 : vector<4xf32> to vector<1x4xf32>
    %152 = arith.addf %116, %151 : vector<1x4xf32>
    %153 = vector.shape_cast %145 : vector<256x4xf32> to vector<16x16x4xf32>
    %c0_103 = arith.constant 0 : index
    %c48 = arith.constant 48 : index
    %c0_104 = arith.constant 0 : index
    %c0_105 = arith.constant 0 : index
    %154 = vector.load %arg4[%c0_103, %c48, %c0_104, %c0_105] : memref<1x64x16x4xf32, #tpu.memory_space<vmem>>, vector<1x16x16x4xf32>
    %155 = vector.shape_cast %154 : vector<1x16x16x4xf32> to vector<16x16x4xf32>
    %156 = vector.shape_cast %153 : vector<16x16x4xf32> to vector<1x16x16x4xf32>
    tpu.vector_store %arg4[%c0_103, %c48, %c0_104, %c0_105], %156 {strides = array<i32>} : memref<1x64x16x4xf32, #tpu.memory_space<vmem>>, vector<1x16x16x4xf32>,
    %cst_106 = arith.constant 1.024000e+03 : f32
    %157 = vector.broadcast %cst_106 : f32 to vector<1x4xf32>
    %158 = arith.divf %148, %157 : vector<1x4xf32>
    %159 = vector.shape_cast %158 : vector<1x4xf32> to vector<1x1x4xf32>
    %cst_107 = arith.constant 1.024000e+03 : f32
    %160 = vector.broadcast %cst_107 : f32 to vector<1x4xf32>
    %161 = arith.divf %152, %160 : vector<1x4xf32>
    %162 = vector.shape_cast %161 : vector<1x4xf32> to vector<1x1x4xf32>
    %163 = arith.mulf %159, %159 : vector<1x1x4xf32>
    %164 = arith.subf %162, %163 : vector<1x1x4xf32>
    %cst_108 = arith.constant 0.000000e+00 : f32
    %165 = vector.broadcast %cst_108 : f32 to vector<1x1x4xf32>
    %166 = arith.maximumf %164, %165 : vector<1x1x4xf32>
    %cst_109 = arith.constant 9.99999974E-6 : f32
    %167 = vector.broadcast %cst_109 : f32 to vector<1x1x4xf32>
    %168 = arith.addf %166, %167 : vector<1x1x4xf32>
    %169 = math.rsqrt %168 : vector<1x1x4xf32>
    %c0_110 = arith.constant 0 : index
    %c0_111 = arith.constant 0 : index
    %c0_112 = arith.constant 0 : index
    %c0_113 = arith.constant 0 : index
    %170 = vector.load %arg4[%c0_110, %c0_111, %c0_112, %c0_113] : memref<1x64x16x4xf32, #tpu.memory_space<vmem>>, vector<1x16x16x4xf32>
    %171 = vector.shape_cast %170 : vector<1x16x16x4xf32> to vector<16x16x4xf32>
    %172 = vector.broadcast %159 : vector<1x1x4xf32> to vector<16x16x4xf32>
    %173 = arith.subf %171, %172 : vector<16x16x4xf32>
    %174 = vector.broadcast %169 : vector<1x1x4xf32> to vector<16x16x4xf32>
    %175 = arith.mulf %173, %174 : vector<16x16x4xf32>
    %cst_114 = arith.constant 0.000000e+00 : f32
    %176 = vector.broadcast %cst_114 : f32 to vector<16x16x4xf32>
    %177 = arith.maximumf %175, %176 : vector<16x16x4xf32>
    %c0_115 = arith.constant 0 : index
    %c0_116 = arith.constant 0 : index
    %c0_117 = arith.constant 0 : index
    %c0_118 = arith.constant 0 : index
    %178 = vector.load %arg4[%c0_115, %c0_116, %c0_117, %c0_118] : memref<1x64x16x4xf32, #tpu.memory_space<vmem>>, vector<1x16x16x4xf32>
    %179 = vector.shape_cast %178 : vector<1x16x16x4xf32> to vector<16x16x4xf32>
    %180 = vector.shape_cast %177 : vector<16x16x4xf32> to vector<1x16x16x4xf32>
    tpu.vector_store %arg4[%c0_115, %c0_116, %c0_117, %c0_118], %180 {strides = array<i32>} : memref<1x64x16x4xf32, #tpu.memory_space<vmem>>, vector<1x16x16x4xf32>,
    %c0_119 = arith.constant 0 : index
    %c16_120 = arith.constant 16 : index
    %c0_121 = arith.constant 0 : index
    %c0_122 = arith.constant 0 : index
    %181 = vector.load %arg4[%c0_119, %c16_120, %c0_121, %c0_122] : memref<1x64x16x4xf32, #tpu.memory_space<vmem>>, vector<1x16x16x4xf32>
    %182 = vector.shape_cast %181 : vector<1x16x16x4xf32> to vector<16x16x4xf32>
    %183 = vector.broadcast %159 : vector<1x1x4xf32> to vector<16x16x4xf32>
    %184 = arith.subf %182, %183 : vector<16x16x4xf32>
    %185 = vector.broadcast %169 : vector<1x1x4xf32> to vector<16x16x4xf32>
    %186 = arith.mulf %184, %185 : vector<16x16x4xf32>
    %cst_123 = arith.constant 0.000000e+00 : f32
    %187 = vector.broadcast %cst_123 : f32 to vector<16x16x4xf32>
    %188 = arith.maximumf %186, %187 : vector<16x16x4xf32>
    %c0_124 = arith.constant 0 : index
    %c16_125 = arith.constant 16 : index
    %c0_126 = arith.constant 0 : index
    %c0_127 = arith.constant 0 : index
    %189 = vector.load %arg4[%c0_124, %c16_125, %c0_126, %c0_127] : memref<1x64x16x4xf32, #tpu.memory_space<vmem>>, vector<1x16x16x4xf32>
    %190 = vector.shape_cast %189 : vector<1x16x16x4xf32> to vector<16x16x4xf32>
    %191 = vector.shape_cast %188 : vector<16x16x4xf32> to vector<1x16x16x4xf32>
    tpu.vector_store %arg4[%c0_124, %c16_125, %c0_126, %c0_127], %191 {strides = array<i32>} : memref<1x64x16x4xf32, #tpu.memory_space<vmem>>, vector<1x16x16x4xf32>,
    %c0_128 = arith.constant 0 : index
    %c32_129 = arith.constant 32 : index
    %c0_130 = arith.constant 0 : index
    %c0_131 = arith.constant 0 : index
    %192 = vector.load %arg4[%c0_128, %c32_129, %c0_130, %c0_131] : memref<1x64x16x4xf32, #tpu.memory_space<vmem>>, vector<1x16x16x4xf32>
    %193 = vector.shape_cast %192 : vector<1x16x16x4xf32> to vector<16x16x4xf32>
    %194 = vector.broadcast %159 : vector<1x1x4xf32> to vector<16x16x4xf32>
    %195 = arith.subf %193, %194 : vector<16x16x4xf32>
    %196 = vector.broadcast %169 : vector<1x1x4xf32> to vector<16x16x4xf32>
    %197 = arith.mulf %195, %196 : vector<16x16x4xf32>
    %cst_132 = arith.constant 0.000000e+00 : f32
    %198 = vector.broadcast %cst_132 : f32 to vector<16x16x4xf32>
    %199 = arith.maximumf %197, %198 : vector<16x16x4xf32>
    %c0_133 = arith.constant 0 : index
    %c32_134 = arith.constant 32 : index
    %c0_135 = arith.constant 0 : index
    %c0_136 = arith.constant 0 : index
    %200 = vector.load %arg4[%c0_133, %c32_134, %c0_135, %c0_136] : memref<1x64x16x4xf32, #tpu.memory_space<vmem>>, vector<1x16x16x4xf32>
    %201 = vector.shape_cast %200 : vector<1x16x16x4xf32> to vector<16x16x4xf32>
    %202 = vector.shape_cast %199 : vector<16x16x4xf32> to vector<1x16x16x4xf32>
    tpu.vector_store %arg4[%c0_133, %c32_134, %c0_135, %c0_136], %202 {strides = array<i32>} : memref<1x64x16x4xf32, #tpu.memory_space<vmem>>, vector<1x16x16x4xf32>,
    %c0_137 = arith.constant 0 : index
    %c48_138 = arith.constant 48 : index
    %c0_139 = arith.constant 0 : index
    %c0_140 = arith.constant 0 : index
    %203 = vector.load %arg4[%c0_137, %c48_138, %c0_139, %c0_140] : memref<1x64x16x4xf32, #tpu.memory_space<vmem>>, vector<1x16x16x4xf32>
    %204 = vector.shape_cast %203 : vector<1x16x16x4xf32> to vector<16x16x4xf32>
    %205 = vector.broadcast %159 : vector<1x1x4xf32> to vector<16x16x4xf32>
    %206 = arith.subf %204, %205 : vector<16x16x4xf32>
    %207 = vector.broadcast %169 : vector<1x1x4xf32> to vector<16x16x4xf32>
    %208 = arith.mulf %206, %207 : vector<16x16x4xf32>
    %cst_141 = arith.constant 0.000000e+00 : f32
    %209 = vector.broadcast %cst_141 : f32 to vector<16x16x4xf32>
    %210 = arith.maximumf %208, %209 : vector<16x16x4xf32>
    %c0_142 = arith.constant 0 : index
    %c48_143 = arith.constant 48 : index
    %c0_144 = arith.constant 0 : index
    %c0_145 = arith.constant 0 : index
    %211 = vector.load %arg4[%c0_142, %c48_143, %c0_144, %c0_145] : memref<1x64x16x4xf32, #tpu.memory_space<vmem>>, vector<1x16x16x4xf32>
    %212 = vector.shape_cast %211 : vector<1x16x16x4xf32> to vector<16x16x4xf32>
    %213 = vector.shape_cast %210 : vector<16x16x4xf32> to vector<1x16x16x4xf32>
    tpu.vector_store %arg4[%c0_142, %c48_143, %c0_144, %c0_145], %213 {strides = array<i32>} : memref<1x64x16x4xf32, #tpu.memory_space<vmem>>, vector<1x16x16x4xf32>,
    return
  }
  func.func @transform_0(%arg0: i32, %arg1: i32) -> (i32, i32, i32, i32) {
    %c0_i32 = arith.constant 0 : i32
    %c0_i32_0 = arith.constant 0 : i32
    %c0_i32_1 = arith.constant 0 : i32
    %c0_i32_2 = arith.constant 0 : i32
    return %arg0, %c0_i32, %c0_i32_0, %c0_i32_1 : i32, i32, i32, i32
  }
  func.func @transform_1(%arg0: i32, %arg1: i32) -> (i32, i32, i32, i32) {
    %c0_i32 = arith.constant 0 : i32
    %c0_i32_0 = arith.constant 0 : i32
    %c0_i32_1 = arith.constant 0 : i32
    %c0_i32_2 = arith.constant 0 : i32
    return %c0_i32, %c0_i32_0, %c0_i32_1, %arg1 : i32, i32, i32, i32
  }
  func.func @transform_2(%arg0: i32, %arg1: i32) -> (i32, i32, i32, i32) {
    %c0_i32 = arith.constant 0 : i32
    %c0_i32_0 = arith.constant 0 : i32
    %c0_i32_1 = arith.constant 0 : i32
    return %arg0, %c0_i32, %c0_i32_0, %arg1 : i32, i32, i32, i32
  }
}

</mosaic_0001>

<bundles_post_ra>
// kernel: tpu_custom_call.1
= control target key start
LH: loop header
LB: loop body
LE: loop exit
PB: predicated region body
PF: predicated region fallthrough
CT: control target
= control target key end

     0   :  { %s8782_s9 = smov 0   ;;  %s8784_s10 = smov 0   ;;  %s12690_s0 = inlined_call_operand.vmem [shape: f32[2,16,16,4], index: 0, kind: input, shape index: {}]   ;;  %s12691_s1 = inlined_call_operand.vmem [shape: f32[4,4,4,4], index: 1, kind: input, shape index: {}]   ;;  %s12692_s2 = inlined_call_operand.vmem [shape: f32[2,64,16,4], index: 2, kind: output, shape index: {}]  }
   0x1   :  { %s8786_s11 = smov 0  }
   0x2 LB: > { %s24_s12 = sadd.s32 1, %s8761_s10  ;;  %p6133_p0 = scmp.ge.s32.totalorder %s8765_s11, 1  ;;  %s8765_s11 = sphi %s8786_s11, %s12_s11   ;;  %s8761_s10 = sphi %s8784_s10, %s13156_s10   ;;  %s8757_s9 = sphi %s8782_s9, %s13155_s9  }
   0x3   : > { %p26_p1 = scmp.ge.s32.totalorder %s24_s12, 2  ;;  %p135_p2 = scmp.lt.s32.totalorder %s8765_s11, 3 }
   0x5   : > { %s13158_s12 = smov (%p26_p1, %s24_s12), 0  ;;  %p136_p3 = pnand %p6133_p0, %p135_p2 }
   0x7   : > { %139 = sbr.rel (%p136_p3) target bundleno = 905 (0x389), region = 28 }
   0xe   : > { %v6138_v0 = vld [vmem:[%s12691_s1 + $0x4] sm:$0xf]  ;;  %vm471_vm0 = vcmask 1043456   ;;  %p164_p4 = scmp.lt.s32.totalorder %s8757_s9, 1  ;;  %v407_v1 = vld [vmem:[%s12691_s1] sm:$0xf] }
   0xf   : > { %7501 = vmatprep.subr.msk.mxu0 %vm471_vm0, %v6138_v0  ;;  %v6274_v2 = vld [vmem:[%s12691_s1 + $0x14] sm:$0xf]  ;;  %v6273_v3 = vld [vmem:[%s12691_s1 + $0x10] sm:$0xf]  ;;  %vm410_vm1 = vcmask 31744   ;;  %vm326_vm2 = vcmask 1046528  }
  0x10   : > { %7502 = vmatpush3.msk.msra.mxu0 %vm471_vm0, %v6138_v0  ;;  %s13160_s9 = smov (!%p164_p4, %s8757_s9), 1  ;;  %7701 = vmatprep.subr.msk.mxu1 %vm471_vm0, %v6274_v2  ;;  %v8847_v10 = vld [vmem:[%s12691_s1 + $0x8] sm:$0xf]  ;;  %v8876_v17 = vld [vmem:[%s12691_s1 + $0x18] sm:$0xf]  ;;  %vm245_vm3 = vcmask 1040384  }
  0x11   : > { %7551 = vmatprep.subr.msk.mxu0 %vm471_vm0, %v407_v1  ;;  %7702 = vmatpush3.msk.msra.mxu1 %vm471_vm0, %v6274_v2  ;;  %s6971_s21 = sshll.u32 %s13160_s9, 8  ;;  %s6972_s26 = sshll.u32 %s13160_s9, 10 }
  0x12   : > { %7751 = vmatprep.subr.msk.mxu1 %vm471_vm0, %v6273_v3  ;;  %s8824_s24 = scalar_lea.vmem %s12690_s0, %s6971_s21  ;;  %s10157_s29 = scalar_lea.vmem %s12692_s2, %s6972_s26 }
  0x13   : > { %v8827_v4 = vld [vmem:[%s8824_s24] sm:$0xff]  ;;  %v8830_v5 = vld [vmem:[%s8824_s24 + $0x8] sm:$0xff]  ;;  %v8833_v6 = vld [vmem:[%s8824_s24 + $0x10] sm:$0xff] }
  0x14   : > { %7503 = vmatprep.mubr.msk.f32.mxu0 %vm410_vm1, %v8827_v4  ;;  %v327_v7 = vrot.slane %v8827_v4, 1  ;;  %v328_v8 = vrot.slane %v8830_v5, 1  ;;  %v8840_v9 = vld [vmem:[%s8824_s24 + $0x18] sm:$0xff]  ;;  %v330_v13 = vrot.slane %v8833_v6, 1  ;;  %v8864_v15 = vld [vmem:[%s8824_s24 + $0x20] sm:$0xff]  ;;  %v8867_v16 = vld [vmem:[%s8824_s24 + $0x28] sm:$0xff] }
  0x15   : > { %7504 = vmatmul.mubr.msk.f32.vlgmr.msra.gmra.mrb[0].mxu0 %vm410_vm1, %v8830_v5  ;;  %v331_v14 = vrot.slane %v8840_v9, 1  ;;  %v333_v19 = vrot.slane %v8864_v15, 1  ;;  %v334_v20 = vrot.slane %v8867_v16, 1  ;;  %v8891_v21 = vld [vmem:[%s8824_s24 + $0x30] sm:$0xff]  ;;  %v8894_v22 = vld [vmem:[%s8824_s24 + $0x38] sm:$0xff]  ;;  %v8916_v27 = vld [vmem:[%s8824_s24 + $0x40] sm:$0xff] }
  0x16   : > { %7552 = vmatpush3.msk.msra.mxu0 %vm471_vm0, %v407_v1  ;;  %v8851_v11 = vsel %vm326_vm2, %v327_v7, %v328_v8  ;;  %7506 = vmatprep.mubr.msk.f32.mxu0 %vm410_vm1, %v8827_v4  ;;  %v8857_v12 = vsel %vm326_vm2, %v328_v8, %v8830_v5  ;;  %v336_v25 = vrot.slane %v8891_v21, 1  ;;  %v337_v26 = vrot.slane %v8894_v22, 1  ;;  %v8919_v28 = vld [vmem:[%s8824_s24 + $0x48] sm:$0xff]  ;;  %v8939_v33 = vld [vmem:[%s8824_s24 + $0x50] sm:$0xff]  ;;  %v8942_v34 = vld [vmem:[%s8824_s24 + $0x58] sm:$0xff] }
  0x17   : > { %12868 = vst [vmem:[#allocation2_spill] sm:$0xff] %v8851_v11  ;;  %12869 = vst [vmem:[#allocation3_spill] sm:$0xff] %v8857_v12  ;;  %7703 = vmatprep.mubr.msk.f32.mxu1 %vm410_vm1, %v8851_v11  ;;  %7601 = vmatprep.subr.msk.mxu0 %vm471_vm0, %v8847_v10  ;;  %v8886_v18 = vsel %vm326_vm2, %v330_v13, %v331_v14  ;;  %v8906_v23 = vsel %vm326_vm2, %v331_v14, %v8840_v9  ;;  %v339_v31 = vrot.slane %v8916_v27, 1  ;;  %v8962_v39 = vld [vmem:[%s8824_s24 + $0x60] sm:$0xff]  ;;  %v8965_v40 = vld [vmem:[%s8824_s24 + $0x68] sm:$0xff] }
  0x18   : > { %7704 = vmatmul.mubr.msk.f32.vlgmr.msra.gmra.mrb[0].mxu1 %vm410_vm1, %v8857_v12  ;;  %12870 = vst [vmem:[#allocation4_spill] sm:$0xff] %v8886_v18  ;;  %12871 = vst [vmem:[#allocation5_spill] sm:$0xff] %v8906_v23  ;;  %v8911_v24 = vsel %vm326_vm2, %v333_v19, %v334_v20  ;;  %v8929_v29 = vsel %vm326_vm2, %v334_v20, %v8867_v16  ;;  %v8934_v30 = vsel %vm326_vm2, %v336_v25, %v337_v26  ;;  %v8985_v45 = vld [vmem:[%s8824_s24 + $0x70] sm:$0xff]  ;;  %v8988_v46 = vld [vmem:[%s8824_s24 + $0x78] sm:$0xff] }
  0x19   : > { %7752 = vmatpush3.msk.msra.mxu1 %vm471_vm0, %v6273_v3  ;;  %7507 = vmatmul.mubr.msk.f32.gmra.mrb[2].mxu0 %vm410_vm1, %v8830_v5  ;;  %12872 = vst [vmem:[#allocation6_spill] sm:$0xff] %v8911_v24  ;;  %12873 = vst [vmem:[#allocation7_spill] sm:$0xff] %v8929_v29  ;;  %v340_v32 = vrot.slane %v8919_v28, 1  ;;  %v8952_v35 = vsel %vm326_vm2, %v337_v26, %v8894_v22  ;;  %v342_v37 = vrot.slane %v8939_v33, 1  ;;  %v343_v38 = vrot.slane %v8942_v34, 1  ;;  %v9008_v51 = vld [vmem:[%s8824_s24 + $0x80] sm:$0xff] }
  0x1a   : > { %7706 = vmatprep.mubr.msk.f32.mxu1 %vm410_vm1, %v8851_v11  ;;  %7509 = vmatprep.mubr.msk.f32.mxu0 %vm410_vm1, %v8833_v6  ;;  %12874 = vst [vmem:[#allocation8_spill] sm:$0xff] %v8934_v30  ;;  %12875 = vst [vmem:[#allocation9_spill] sm:$0xff] %v8952_v35  ;;  %v345_v43 = vrot.slane %v8962_v39, 1  ;;  %v346_v44 = vrot.slane %v8965_v40, 1  ;;  %v348_v49 = vrot.slane %v8985_v45, 1  ;;  %v349_v50 = vrot.slane %v8988_v46, 1 }
  0x1b   : > { %7801 = vmatprep.subr.msk.mxu1 %vm471_vm0, %v8876_v17  ;;  %v8957_v36 = vsel %vm326_vm2, %v339_v31, %v340_v32  ;;  %v8975_v41 = vsel %vm326_vm2, %v340_v32, %v8919_v28  ;;  %v8980_v42 = vsel %vm326_vm2, %v342_v37, %v343_v38  ;;  %v8998_v47 = vsel %vm326_vm2, %v343_v38, %v8942_v34  ;;  %v9011_v52 = vld [vmem:[%s8824_s24 + $0x88] sm:$0xff]  ;;  %v9031_v57 = vld [vmem:[%s8824_s24 + $0x90] sm:$0xff]  ;;  %v9034_v58 = vld [vmem:[%s8824_s24 + $0x98] sm:$0xff] }
  0x1c   : > { %7707 = vmatmul.mubr.msk.f32.gmra.mrb[2].mxu1 %vm410_vm1, %v8857_v12  ;;  %12876 = vst [vmem:[#allocation10_spill] sm:$0xff] %v8957_v36  ;;  %12877 = vst [vmem:[#allocation11_spill] sm:$0xff] %v8975_v41  ;;  %v9003_v48 = vsel %vm326_vm2, %v345_v43, %v346_v44  ;;  %v9021_v53 = vsel %vm326_vm2, %v346_v44, %v8965_v40  ;;  %v9026_v54 = vsel %vm326_vm2, %v348_v49, %v349_v50  ;;  %v9054_v63 = vld [vmem:[%s8824_s24 + $0xa0] sm:$0xff]  ;;  %v9057_v0 = vld [vmem:[%s8824_s24 + $0xa8] sm:$0xff] }
  0x1d   : > { %7510 = vmatmul.mubr.msk.f32.gmra.mrb[4].mxu0 %vm410_vm1, %v8840_v9  ;;  %7709 = vmatprep.mubr.msk.f32.mxu1 %vm410_vm1, %v8886_v18  ;;  %12878 = vst [vmem:[#allocation12_spill] sm:$0xff] %v8980_v42  ;;  %12879 = vst [vmem:[#allocation13_spill] sm:$0xff] %v8998_v47  ;;  %v351_v55 = vrot.slane %v9008_v51, 1  ;;  %v352_v56 = vrot.slane %v9011_v52, 1  ;;  %v9044_v59 = vsel %vm326_vm2, %v349_v50, %v8988_v46  ;;  %v354_v61 = vrot.slane %v9031_v57, 1  ;;  %v9077_v8 = vld [vmem:[%s8824_s24 + $0xb0] sm:$0xff] }
  0x1e   : > { %7512 = vmatprep.mubr.msk.f32.mxu0 %vm410_vm1, %v8864_v15  ;;  %12880 = vst [vmem:[#allocation14_spill] sm:$0xff] %v9003_v48  ;;  %12881 = vst [vmem:[#allocation15_spill] sm:$0xff] %v9021_v53  ;;  %v355_v62 = vrot.slane %v9034_v58, 1  ;;  %v357_v3 = vrot.slane %v9054_v63, 1  ;;  %v358_v7 = vrot.slane %v9057_v0, 1  ;;  %v9080_v13 = vld [vmem:[%s8824_s24 + $0xb8] sm:$0xff] }
  0x1f   : > { %12882 = vst [vmem:[#allocation16_spill] sm:$0xff] %v9026_v54  ;;  %12883 = vst [vmem:[#allocation17_spill] sm:$0xff] %v9044_v59  ;;  %v9049_v60 = vsel %vm326_vm2, %v351_v55, %v352_v56  ;;  %v9067_v1 = vsel %vm326_vm2, %v352_v56, %v9011_v52  ;;  %v360_v20 = vrot.slane %v9077_v8, 1  ;;  %v361_v25 = vrot.slane %v9080_v13, 1  ;;  %v9100_v26 = vld [vmem:[%s8824_s24 + $0xc0] sm:$0xff]  ;;  %v9103_v31 = vld [vmem:[%s8824_s24 + $0xc8] sm:$0xff] }
  0x20   : > { %7710 = vmatmul.mubr.msk.f32.gmra.mrb[4].mxu1 %vm410_vm1, %v8906_v23  ;;  %12884 = vst [vmem:[#allocation18_spill] sm:$0xff] %v9049_v60  ;;  %12885 = vst [vmem:[#allocation19_spill] sm:$0xff] %v9067_v1  ;;  %v9072_v2 = vsel %vm326_vm2, %v354_v61, %v355_v62  ;;  %v9090_v14 = vsel %vm326_vm2, %v355_v62, %v9034_v58  ;;  %v9095_v19 = vsel %vm326_vm2, %v357_v3, %v358_v7  ;;  %v9123_v44 = vld [vmem:[%s8824_s24 + $0xd0] sm:$0xff]  ;;  %v9126_v49 = vld [vmem:[%s8824_s24 + $0xd8] sm:$0xff] }
  0x21   : > { %7513 = vmatmul.mubr.msk.f32.gmra.mrb[6].mxu0 %vm410_vm1, %v8867_v16  ;;  %7712 = vmatprep.mubr.msk.f32.mxu1 %vm410_vm1, %v8911_v24  ;;  %12886 = vst [vmem:[#allocation20_spill] sm:$0xff] %v9072_v2  ;;  %12887 = vst [vmem:[#allocation21_spill] sm:$0xff] %v9090_v14  ;;  %v9113_v32 = vsel %vm326_vm2, %v358_v7, %v9057_v0  ;;  %v9118_v37 = vsel %vm326_vm2, %v360_v20, %v361_v25  ;;  %v363_v38 = vrot.slane %v9100_v26, 1  ;;  %v9146_v62 = vld [vmem:[%s8824_s24 + $0xe0] sm:$0xff]  ;;  %v9149_v3 = vld [vmem:[%s8824_s24 + $0xe8] sm:$0xff] }
  0x22   : > { %7515 = vmatprep.mubr.msk.f32.mxu0 %vm410_vm1, %v8891_v21  ;;  %12888 = vst [vmem:[#allocation22_spill] sm:$0xff] %v9095_v19  ;;  %12889 = vst [vmem:[#allocation23_spill] sm:$0xff] %v9113_v32  ;;  %v364_v43 = vrot.slane %v9103_v31, 1  ;;  %v9136_v50 = vsel %vm326_vm2, %v361_v25, %v9080_v13  ;;  %v366_v56 = vrot.slane %v9123_v44, 1  ;;  %v367_v61 = vrot.slane %v9126_v49, 1 }
  0x23   : > { %12890 = vst [vmem:[#allocation24_spill] sm:$0xff] %v9118_v37  ;;  %12891 = vst [vmem:[#allocation25_spill] sm:$0xff] %v9136_v50  ;;  %v369_v25 = vrot.slane %v9146_v62, 1  ;;  %v282_v24 = vrot.slane %v9100_v26, 7  ;;  %v285_v18 = vrot.slane %v9123_v44, 7  ;;  %v288_v11 = vrot.slane %v9146_v62, 7 }
  0x24   : > { %7713 = vmatmul.mubr.msk.f32.gmra.mrb[6].mxu1 %vm410_vm1, %v8929_v29  ;;  %v9141_v55 = vsel %vm326_vm2, %v363_v38, %v364_v43  ;;  %12893 = vst [vmem:[#allocation27_spill] sm:$0xff] %v9146_v62  ;;  %12894 = vst [vmem:[#allocation28_spill] sm:$0xff] %v9149_v3  ;;  %v9159_v7 = vsel %vm326_vm2, %v364_v43, %v9103_v31  ;;  %v9164_v20 = vsel %vm326_vm2, %v366_v56, %v367_v61 }
  0x25   : > { %7516 = vmatmul.mubr.msk.f32.gmra.mrb[8].mxu0 %vm410_vm1, %v8894_v22  ;;  %7715 = vmatprep.mubr.msk.f32.mxu1 %vm410_vm1, %v8934_v30  ;;  %12892 = vst [vmem:[#allocation26_spill] sm:$0xff] %v9141_v55  ;;  %12895 = vst [vmem:[#allocation29_spill] sm:$0xff] %v9159_v7  ;;  %v370_v38 = vrot.slane %v9149_v3, 1  ;;  %v9177_v43 = vsel %vm326_vm2, %v367_v61, %v9126_v49  ;;  %v279_v30 = vrot.slane %v9077_v8, 7 }
  0x26   : > { %7518 = vmatprep.mubr.msk.f32.mxu0 %vm410_vm1, %v8916_v27  ;;  %12896 = vst [vmem:[#allocation30_spill] sm:$0xff] %v9164_v20  ;;  %12897 = vst [vmem:[#allocation31_spill] sm:$0xff] %v9177_v43  ;;  %v9421_v23 = vsel %vm245_vm3, %v9100_v26, %v282_v24  ;;  %v9438_v12 = vsel %vm245_vm3, %v9123_v44, %v285_v18 }
  0x27   : > { %v9182_v56 = vsel %vm326_vm2, %v369_v25, %v370_v38  ;;  %v9197_v61 = vsel %vm326_vm2, %v370_v38, %v9149_v3  ;;  %v252_v38 = vrot.slane %v8864_v15, 7  ;;  %v9404_v29 = vsel %vm245_vm3, %v9077_v8, %v279_v30  ;;  %12924 = vst [vmem:[#allocation58_spill] sm:$0xff] %v9421_v23  ;;  %12926 = vst [vmem:[#allocation60_spill] sm:$0xff] %v9438_v12 }
  0x28   : > { %7716 = vmatmul.mubr.msk.f32.gmra.mrb[8].mxu1 %vm410_vm1, %v8952_v35  ;;  %12898 = vst [vmem:[#allocation32_spill] sm:$0xff] %v9182_v56  ;;  %12900 = vst [vmem:[#allocation34_spill] sm:$0xff] %v9197_v61 }
  0x29   : > { %7519 = vmatmul.mubr.msk.f32.gmra.mrb[10].mxu0 %vm410_vm1, %v8919_v28  ;;  %7718 = vmatprep.mubr.msk.f32.mxu1 %vm410_vm1, %v8957_v36  ;;  %v276_v36 = vrot.slane %v9054_v63, 7  ;;  %12922 = vst [vmem:[#allocation56_spill] sm:$0xff] %v9404_v29 }
  0x2a   : > { %7521 = vmatprep.mubr.msk.f32.mxu0 %vm410_vm1, %v8939_v33 }
  0x2b   : > { %v9387_v35 = vsel %vm245_vm3, %v9054_v63, %v276_v36 }
  0x2c   : > { %7719 = vmatmul.mubr.msk.f32.gmra.mrb[10].mxu1 %vm410_vm1, %v8975_v41  ;;  %12920 = vst [vmem:[#allocation54_spill] sm:$0xff] %v9387_v35 }
  0x2d   : > { %7522 = vmatmul.mubr.msk.f32.gmra.mrb[12].mxu0 %vm410_vm1, %v8942_v34  ;;  %7721 = vmatprep.mubr.msk.f32.mxu1 %vm410_vm1, %v8980_v42  ;;  %v273_v42 = vrot.slane %v9031_v57, 7 }
  0x2e   : > { %7524 = vmatprep.mubr.msk.f32.mxu0 %vm410_vm1, %v8962_v39 }
  0x2f   : > { %v9370_v41 = vsel %vm245_vm3, %v9031_v57, %v273_v42 }
  0x30   : > { %7722 = vmatmul.mubr.msk.f32.gmra.mrb[12].mxu1 %vm410_vm1, %v8998_v47  ;;  %12918 = vst [vmem:[#allocation52_spill] sm:$0xff] %v9370_v41 }
  0x31   : > { %7525 = vmatmul.mubr.msk.f32.gmra.mrb[14].mxu0 %vm410_vm1, %v8965_v40  ;;  %7724 = vmatprep.mubr.msk.f32.mxu1 %vm410_vm1, %v9003_v48  ;;  %v270_v48 = vrot.slane %v9008_v51, 7 }
  0x32   : > { %7527 = vmatprep.mubr.msk.f32.mxu0 %vm410_vm1, %v8985_v45 }
  0x33   : > { %v9353_v47 = vsel %vm245_vm3, %v9008_v51, %v270_v48 }
  0x34   : > { %7725 = vmatmul.mubr.msk.f32.gmra.mrb[14].mxu1 %vm410_vm1, %v9021_v53  ;;  %12916 = vst [vmem:[#allocation50_spill] sm:$0xff] %v9353_v47 }
  0x35   : > { %7528 = vmatmul.mubr.msk.f32.gmra.mrb[16].mxu0 %vm410_vm1, %v8988_v46  ;;  %7727 = vmatprep.mubr.msk.f32.mxu1 %vm410_vm1, %v9026_v54  ;;  %v267_v54 = vrot.slane %v8985_v45, 7 }
  0x36   : > { %7530 = vmatprep.mubr.msk.f32.mxu0 %vm410_vm1, %v9008_v51 }
  0x37   : > { %v9336_v53 = vsel %vm245_vm3, %v8985_v45, %v267_v54 }
  0x38   : > { %7728 = vmatmul.mubr.msk.f32.gmra.mrb[16].mxu1 %vm410_vm1, %v9044_v59  ;;  %12914 = vst [vmem:[#allocation48_spill] sm:$0xff] %v9336_v53 }
  0x39   : > { %7531 = vmatmul.mubr.msk.f32.gmra.mrb[18].mxu0 %vm410_vm1, %v9011_v52  ;;  %7730 = vmatprep.mubr.msk.f32.mxu1 %vm410_vm1, %v9049_v60  ;;  %v264_v60 = vrot.slane %v8962_v39, 7 }
  0x3a   : > { %7533 = vmatprep.mubr.msk.f32.mxu0 %vm410_vm1, %v9031_v57 }
  0x3b   : > { %v9319_v59 = vsel %vm245_vm3, %v8962_v39, %v264_v60 }
  0x3c   : > { %7731 = vmatmul.mubr.msk.f32.gmra.mrb[18].mxu1 %vm410_vm1, %v9067_v1  ;;  %12912 = vst [vmem:[#allocation46_spill] sm:$0xff] %v9319_v59 }
  0x3d   : > { %7534 = vmatmul.mubr.msk.f32.gmra.mrb[20].mxu0 %vm410_vm1, %v9034_v58  ;;  %7733 = vmatprep.mubr.msk.f32.mxu1 %vm410_vm1, %v9072_v2  ;;  %v261_v2 = vrot.slane %v8939_v33, 7 }
  0x3e   : > { %7536 = vmatprep.mubr.msk.f32.mxu0 %vm410_vm1, %v9054_v63 }
  0x3f   : > { %v9302_v1 = vsel %vm245_vm3, %v8939_v33, %v261_v2 }
  0x40   : > { %7734 = vmatmul.mubr.msk.f32.gmra.mrb[20].mxu1 %vm410_vm1, %v9090_v14  ;;  %12910 = vst [vmem:[#allocation44_spill] sm:$0xff] %v9302_v1 }
  0x41   : > { %7537 = vmatmul.mubr.msk.f32.gmra.mrb[22].mxu0 %vm410_vm1, %v9057_v0  ;;  %7736 = vmatprep.mubr.msk.f32.mxu1 %vm410_vm1, %v9095_v19  ;;  %v258_v19 = vrot.slane %v8916_v27, 7 }
  0x42   : > { %7539 = vmatprep.mubr.msk.f32.mxu0 %vm410_vm1, %v9077_v8 }
  0x43   : > { %v9285_v14 = vsel %vm245_vm3, %v8916_v27, %v258_v19 }
  0x44   : > { %7737 = vmatmul.mubr.msk.f32.gmra.mrb[22].mxu1 %vm410_vm1, %v9113_v32  ;;  %12908 = vst [vmem:[#allocation42_spill] sm:$0xff] %v9285_v14 }
  0x45   : > { %7540 = vmatmul.mubr.msk.f32.gmra.mrb[24].mxu0 %vm410_vm1, %v9080_v13  ;;  %7739 = vmatprep.mubr.msk.f32.mxu1 %vm410_vm1, %v9118_v37  ;;  %v9249_v37 = vsel %vm245_vm3, %v8864_v15, %v252_v38 }
  0x46   : > { %7542 = vmatprep.mubr.msk.f32.mxu0 %vm410_vm1, %v9100_v26  ;;  %12904 = vst [vmem:[#allocation38_spill] sm:$0xff] %v9249_v37 }
  0x48   : > { %7740 = vmatmul.mubr.msk.f32.gmra.mrb[24].mxu1 %vm410_vm1, %v9136_v50  ;;  %v246_v50 = vrot.slane %v8827_v4, 7 }
  0x49   : > { %7543 = vmatmul.mubr.msk.f32.gmra.mrb[26].mxu0 %vm410_vm1, %v9103_v31  ;;  %7742 = vmatprep.mubr.msk.f32.mxu1 %vm410_vm1, %v9141_v55  ;;  %v247_v55 = vrot.slane %v8830_v5, 7 }
  0x4a   : > { %7545 = vmatprep.mubr.msk.f32.mxu0 %vm410_vm1, %v9123_v44 }
  0x4b   : > { %v9202_v25 = vsel %vm245_vm3, %v246_v50, %v247_v55 }
  0x4c   : > { %7743 = vmatmul.mubr.msk.f32.gmra.mrb[26].mxu1 %vm410_vm1, %v9159_v7  ;;  %v9187_v7 = vsel %vm245_vm3, %v8827_v4, %v246_v50  ;;  %12901 = vst [vmem:[#allocation35_spill] sm:$0xff] %v9202_v25  ;;  %v250_v50 = vrot.slane %v8840_v9, 7 }
  0x4d   : > { %7546 = vmatmul.mubr.msk.f32.gmra.mrb[28].mxu0 %vm410_vm1, %v9126_v49  ;;  %7745 = vmatprep.mubr.msk.f32.mxu1 %vm410_vm1, %v9164_v20  ;;  %12899 = vst [vmem:[#allocation33_spill] sm:$0xff] %v9187_v7  ;;  %v249_v20 = vrot.slane %v8833_v6, 7 }
  0x4e   : > { %7548 = vmatprep.mubr.msk.f32.mxu0 %vm410_vm1, %v9146_v62 }
  0x4f   : > { %v9223_v55 = vsel %vm245_vm3, %v8833_v6, %v249_v20 }
  0x50   : > { %7746 = vmatmul.mubr.msk.f32.gmra.mrb[28].mxu1 %vm410_vm1, %v9177_v43  ;;  %v9210_v43 = vld [vmem:[%s12691_s1 + $0xc] sm:$0xf]  ;;  %12902 = vst [vmem:[#allocation36_spill] sm:$0xff] %v9223_v55 }
  0x51   : > { %7549 = vmatmul.mubr.msk.f32.gmra.mrb[30].mxu0 %vm410_vm1, %v9149_v3  ;;  %7748 = vmatprep.mubr.msk.f32.mxu1 %vm410_vm1, %v9182_v56  ;;  %v253_v56 = vrot.slane %v8867_v16, 7 }
  0x52   : > { %7553 = vmatprep.mubr.msk.f32.mxu0 %vm410_vm1, %v9187_v7 }
  0x54   : > { %7749 = vmatmul.mubr.msk.f32.gmra.mrb[30].mxu1 %vm410_vm1, %v9197_v61  ;;  %v9244_v61 = vsel %vm245_vm3, %v249_v20, %v250_v50  ;;  %v9263_v20 = vsel %vm245_vm3, %v252_v38, %v253_v56  ;;  %v256_v50 = vrot.slane %v8894_v22, 7  ;;  %v259_v38 = vrot.slane %v8919_v28, 7 }
  0x55   : > { %7554 = vmatmul.mubr.msk.f32.vlgmr.msra.gmra.mrb[0].mxu0 %vm410_vm1, %v9202_v25  ;;  %7753 = vmatprep.mubr.msk.f32.mxu1 %vm410_vm1, %v8827_v4  ;;  %12903 = vst [vmem:[#allocation37_spill] sm:$0xff] %v9244_v61  ;;  %12905 = vst [vmem:[#allocation39_spill] sm:$0xff] %v9263_v20 }
  0x56   : > { %7602 = vmatpush3.msk.msra.mxu0 %vm471_vm0, %v8847_v10  ;;  %7556 = vmatprep.mubr.msk.f32.mxu0 %vm410_vm1, %v9187_v7  ;;  %v9233_v10 = vld [vmem:[%s12691_s1 + $0x1c] sm:$0xf] }
  0x57   : > { %7651 = vmatprep.subr.msk.mxu0 %vm471_vm0, %v9210_v43 }
  0x58   : > { %7754 = vmatmul.mubr.msk.f32.vlgmr.msra.gmra.mrb[0].mxu1 %vm410_vm1, %v8830_v5 }
  0x59   : > { %7802 = vmatpush3.msk.msra.mxu1 %vm471_vm0, %v8876_v17  ;;  %7557 = vmatmul.mubr.msk.f32.gmra.mrb[2].mxu0 %vm410_vm1, %v9202_v25  ;;  %v255_v17 = vrot.slane %v8891_v21, 7 }
  0x5a   : > { %7756 = vmatprep.mubr.msk.f32.mxu1 %vm410_vm1, %v8827_v4  ;;  %7559 = vmatprep.mubr.msk.f32.mxu0 %vm410_vm1, %v9223_v55 }
  0x5b   : > { %7851 = vmatprep.subr.msk.mxu1 %vm471_vm0, %v9233_v10  ;;  %v9268_v32 = vsel %vm245_vm3, %v8891_v21, %v255_v17  ;;  %v9280_v56 = vsel %vm245_vm3, %v255_v17, %v256_v50  ;;  %v9297_v17 = vsel %vm245_vm3, %v258_v19, %v259_v38  ;;  %v262_v50 = vrot.slane %v8942_v34, 7 }
  0x5c   : > { %7757 = vmatmul.mubr.msk.f32.gmra.mrb[2].mxu1 %vm410_vm1, %v8830_v5  ;;  %12906 = vst [vmem:[#allocation40_spill] sm:$0xff] %v9268_v32  ;;  %12907 = vst [vmem:[#allocation41_spill] sm:$0xff] %v9280_v56  ;;  %v265_v38 = vrot.slane %v8965_v40, 7 }
  0x5d   : > { %7560 = vmatmul.mubr.msk.f32.gmra.mrb[4].mxu0 %vm410_vm1, %v9244_v61  ;;  %7759 = vmatprep.mubr.msk.f32.mxu1 %vm410_vm1, %v8833_v6  ;;  %12909 = vst [vmem:[#allocation43_spill] sm:$0xff] %v9297_v17  ;;  %v9314_v19 = vsel %vm245_vm3, %v261_v2, %v262_v50  ;;  %v268_v50 = vrot.slane %v8988_v46, 7 }
  0x5e   : > { %7562 = vmatprep.mubr.msk.f32.mxu0 %vm410_vm1, %v9249_v37  ;;  %12911 = vst [vmem:[#allocation45_spill] sm:$0xff] %v9314_v19  ;;  %v9331_v2 = vsel %vm245_vm3, %v264_v60, %v265_v38  ;;  %v271_v38 = vrot.slane %v9011_v52, 7 }
  0x5f   : > { %12913 = vst [vmem:[#allocation47_spill] sm:$0xff] %v9331_v2  ;;  %v9348_v60 = vsel %vm245_vm3, %v267_v54, %v268_v50  ;;  %v274_v50 = vrot.slane %v9034_v58, 7 }
  0x60   : > { %7760 = vmatmul.mubr.msk.f32.gmra.mrb[4].mxu1 %vm410_vm1, %v8840_v9  ;;  %12915 = vst [vmem:[#allocation49_spill] sm:$0xff] %v9348_v60  ;;  %v9365_v54 = vsel %vm245_vm3, %v270_v48, %v271_v38  ;;  %v277_v38 = vrot.slane %v9057_v0, 7 }
  0x61   : > { %7563 = vmatmul.mubr.msk.f32.gmra.mrb[6].mxu0 %vm410_vm1, %v9263_v20  ;;  %7762 = vmatprep.mubr.msk.f32.mxu1 %vm410_vm1, %v8864_v15  ;;  %12917 = vst [vmem:[#allocation51_spill] sm:$0xff] %v9365_v54  ;;  %v9382_v48 = vsel %vm245_vm3, %v273_v42, %v274_v50  ;;  %v280_v50 = vrot.slane %v9080_v13, 7 }
  0x62   : > { %7565 = vmatprep.mubr.msk.f32.mxu0 %vm410_vm1, %v9268_v32  ;;  %12919 = vst [vmem:[#allocation53_spill] sm:$0xff] %v9382_v48  ;;  %v9399_v42 = vsel %vm245_vm3, %v276_v36, %v277_v38  ;;  %v283_v38 = vrot.slane %v9103_v31, 7 }
  0x63   : > { %12921 = vst [vmem:[#allocation55_spill] sm:$0xff] %v9399_v42  ;;  %v9416_v36 = vsel %vm245_vm3, %v279_v30, %v280_v50  ;;  %v286_v50 = vrot.slane %v9126_v49, 7 }
  0x64   : > { %7763 = vmatmul.mubr.msk.f32.gmra.mrb[6].mxu1 %vm410_vm1, %v8867_v16  ;;  %12923 = vst [vmem:[#allocation57_spill] sm:$0xff] %v9416_v36  ;;  %v9433_v30 = vsel %vm245_vm3, %v282_v24, %v283_v38  ;;  %v289_v38 = vrot.slane %v9149_v3, 7 }
  0x65   : > { %7566 = vmatmul.mubr.msk.f32.gmra.mrb[8].mxu0 %vm410_vm1, %v9280_v56  ;;  %7765 = vmatprep.mubr.msk.f32.mxu1 %vm410_vm1, %v8891_v21  ;;  %12925 = vst [vmem:[#allocation59_spill] sm:$0xff] %v9433_v30  ;;  %v9450_v24 = vsel %vm245_vm3, %v285_v18, %v286_v50  ;;  %v9498_v50 = vld [vmem:[%s12691_s1 + $0x34] sm:$0xf] }
  0x66   : > { %7568 = vmatprep.mubr.msk.f32.mxu0 %vm410_vm1, %v9285_v14  ;;  %12927 = vst [vmem:[#allocation61_spill] sm:$0xff] %v9450_v24  ;;  %v9466_v18 = vsel %vm245_vm3, %v288_v11, %v289_v38 }
  0x67   : > { %12929 = vst [vmem:[#allocation63_spill] sm:$0xff] %v9466_v18 }
  0x68   : > { %7766 = vmatmul.mubr.msk.f32.gmra.mrb[8].mxu1 %vm410_vm1, %v8894_v22 }
  0x69   : > { %7569 = vmatmul.mubr.msk.f32.gmra.mrb[10].mxu0 %vm410_vm1, %v9297_v17  ;;  %7768 = vmatprep.mubr.msk.f32.mxu1 %vm410_vm1, %v8916_v27 }
  0x6a   : > { %7571 = vmatprep.mubr.msk.f32.mxu0 %vm410_vm1, %v9302_v1 }
  0x6c   : > { %7769 = vmatmul.mubr.msk.f32.gmra.mrb[10].mxu1 %vm410_vm1, %v8919_v28 }
  0x6d   : > { %7572 = vmatmul.mubr.msk.f32.gmra.mrb[12].mxu0 %vm410_vm1, %v9314_v19  ;;  %7771 = vmatprep.mubr.msk.f32.mxu1 %vm410_vm1, %v8939_v33 }
  0x6e   : > { %7574 = vmatprep.mubr.msk.f32.mxu0 %vm410_vm1, %v9319_v59 }
  0x70   : > { %7772 = vmatmul.mubr.msk.f32.gmra.mrb[12].mxu1 %vm410_vm1, %v8942_v34 }
  0x71   : > { %7575 = vmatmul.mubr.msk.f32.gmra.mrb[14].mxu0 %vm410_vm1, %v9331_v2  ;;  %7774 = vmatprep.mubr.msk.f32.mxu1 %vm410_vm1, %v8962_v39 }
  0x72   : > { %7577 = vmatprep.mubr.msk.f32.mxu0 %vm410_vm1, %v9336_v53 }
  0x74   : > { %7775 = vmatmul.mubr.msk.f32.gmra.mrb[14].mxu1 %vm410_vm1, %v8965_v40 }
  0x75   : > { %7578 = vmatmul.mubr.msk.f32.gmra.mrb[16].mxu0 %vm410_vm1, %v9348_v60  ;;  %7777 = vmatprep.mubr.msk.f32.mxu1 %vm410_vm1, %v8985_v45 }
  0x76   : > { %7580 = vmatprep.mubr.msk.f32.mxu0 %vm410_vm1, %v9353_v47 }
  0x78   : > { %7778 = vmatmul.mubr.msk.f32.gmra.mrb[16].mxu1 %vm410_vm1, %v8988_v46 }
  0x79   : > { %7581 = vmatmul.mubr.msk.f32.gmra.mrb[18].mxu0 %vm410_vm1, %v9365_v54  ;;  %7780 = vmatprep.mubr.msk.f32.mxu1 %vm410_vm1, %v9008_v51 }
  0x7a   : > { %7583 = vmatprep.mubr.msk.f32.mxu0 %vm410_vm1, %v9370_v41 }
  0x7c   : > { %7781 = vmatmul.mubr.msk.f32.gmra.mrb[18].mxu1 %vm410_vm1, %v9011_v52 }
  0x7d   : > { %7584 = vmatmul.mubr.msk.f32.gmra.mrb[20].mxu0 %vm410_vm1, %v9382_v48  ;;  %7783 = vmatprep.mubr.msk.f32.mxu1 %vm410_vm1, %v9031_v57 }
  0x7e   : > { %7586 = vmatprep.mubr.msk.f32.mxu0 %vm410_vm1, %v9387_v35 }
  0x80   : > { %7784 = vmatmul.mubr.msk.f32.gmra.mrb[20].mxu1 %vm410_vm1, %v9034_v58 }
  0x81   : > { %7587 = vmatmul.mubr.msk.f32.gmra.mrb[22].mxu0 %vm410_vm1, %v9399_v42  ;;  %7786 = vmatprep.mubr.msk.f32.mxu1 %vm410_vm1, %v9054_v63 }
  0x82   : > { %7589 = vmatprep.mubr.msk.f32.mxu0 %vm410_vm1, %v9404_v29 }
  0x84   : > { %7787 = vmatmul.mubr.msk.f32.gmra.mrb[22].mxu1 %vm410_vm1, %v9057_v0 }
  0x85   : > { %7590 = vmatmul.mubr.msk.f32.gmra.mrb[24].mxu0 %vm410_vm1, %v9416_v36  ;;  %7789 = vmatprep.mubr.msk.f32.mxu1 %vm410_vm1, %v9077_v8 }
  0x86   : > { %7592 = vmatprep.mubr.msk.f32.mxu0 %vm410_vm1, %v9421_v23  ;;  %v9455_v23 = vsel %vm245_vm3, %v9146_v62, %v288_v11  ;;  %v9481_v11 = vld [vmem:[%s12691_s1 + $0x24] sm:$0xf] }
  0x87   : > { %12928 = vst [vmem:[#allocation62_spill] sm:$0xff] %v9455_v23 }
  0x88   : > { %7790 = vmatmul.mubr.msk.f32.gmra.mrb[24].mxu1 %vm410_vm1, %v9080_v13 }
  0x89   : > { %7593 = vmatmul.mubr.msk.f32.gmra.mrb[26].mxu0 %vm410_vm1, %v9433_v30  ;;  %7792 = vmatprep.mubr.msk.f32.mxu1 %vm410_vm1, %v9100_v26 }
  0x8a   : > { %7595 = vmatprep.mubr.msk.f32.mxu0 %vm410_vm1, %v9438_v12 }
  0x8c   : > { %7793 = vmatmul.mubr.msk.f32.gmra.mrb[26].mxu1 %vm410_vm1, %v9103_v31 }
  0x8d   : > { %7596 = vmatmul.mubr.msk.f32.gmra.mrb[28].mxu0 %vm410_vm1, %v9450_v24  ;;  %7795 = vmatprep.mubr.msk.f32.mxu1 %vm410_vm1, %v9123_v44 }
  0x8e   : > { %7598 = vmatprep.mubr.msk.f32.mxu0 %vm410_vm1, %v9455_v23 }
  0x90   : > { %7796 = vmatmul.mubr.msk.f32.gmra.mrb[28].mxu1 %vm410_vm1, %v9126_v49 }
  0x91   : > { %7599 = vmatmul.mubr.msk.f32.gmra.mrb[30].mxu0 %vm410_vm1, %v9466_v18  ;;  %7798 = vmatprep.mubr.msk.f32.mxu1 %vm410_vm1, %v9146_v62 }
  0x92   : > { %7603 = vmatprep.mubr.msk.f32.mxu0 %vm410_vm1, %v9187_v7  ;;  %v12960_v7 = vld [vmem:[#allocation31_spill] sm:$0xff] }
  0x94   : > { %7799 = vmatmul.mubr.msk.f32.gmra.mrb[30].mxu1 %vm410_vm1, %v9149_v3 }
  0x95   : > { %7604 = vmatmul.mubr.msk.f32.vlgmr.msra.gmra.mrb[0].mxu0 %vm410_vm1, %v9202_v25  ;;  %7803 = vmatprep.mubr.msk.f32.mxu1 %vm410_vm1, %v8827_v4 }
  0x96   : > { %7652 = vmatpush3.msk.msra.mxu0 %vm471_vm0, %v9210_v43  ;;  %7606 = vmatprep.mubr.msk.f32.mxu0 %vm410_vm1, %v9223_v55  ;;  %v12930_v43 = vld [vmem:[#allocation58_spill] sm:$0xff] }
  0x97   : > { %7901 = vmatprep.subr.msk.mxu0 %vm471_vm0, %v9481_v11 }
  0x98   : > { %7804 = vmatmul.mubr.msk.f32.vlgmr.msra.gmra.mrb[0].mxu1 %vm410_vm1, %v8830_v5 }
  0x99   : > { %7852 = vmatpush3.msk.msra.mxu1 %vm471_vm0, %v9233_v10  ;;  %7607 = vmatmul.mubr.msk.f32.gmra.mrb[2].mxu0 %vm410_vm1, %v9244_v61  ;;  %v9593_v10 = vld [vmem:[%s8824_s24 + $0xf0] sm:$0xff]  ;;  %v12959_v61 = vld [vmem:[#allocation30_spill] sm:$0xff] }
  0x9a   : > { %7806 = vmatprep.mubr.msk.f32.mxu1 %vm410_vm1, %v8833_v6  ;;  %7609 = vmatprep.mubr.msk.f32.mxu0 %vm410_vm1, %v9249_v37  ;;  %v291_v38 = vrot.slane %v9593_v10, 7  ;;  %v12958_v37 = vld [vmem:[#allocation29_spill] sm:$0xff]  ;;  %v372_v55 = vrot.slane %v9593_v10, 1 }
  0x9b   : > { %8101 = vmatprep.subr.msk.mxu1 %vm471_vm0, %v9498_v50 }
  0x9c   : > { %7807 = vmatmul.mubr.msk.f32.gmra.mrb[2].mxu1 %vm410_vm1, %v8840_v9 }
  0x9d   : > { %7610 = vmatmul.mubr.msk.f32.gmra.mrb[4].mxu0 %vm410_vm1, %v9263_v20  ;;  %7809 = vmatprep.mubr.msk.f32.mxu1 %vm410_vm1, %v8864_v15  ;;  %v12957_v20 = vld [vmem:[#allocation26_spill] sm:$0xff] }
  0x9e   : > { %7612 = vmatprep.mubr.msk.f32.mxu0 %vm410_vm1, %v9268_v32  ;;  %v12956_v32 = vld [vmem:[#allocation25_spill] sm:$0xff] }
  0xa0   : > { %7810 = vmatmul.mubr.msk.f32.gmra.mrb[4].mxu1 %vm410_vm1, %v8867_v16 }
  0xa1   : > { %7613 = vmatmul.mubr.msk.f32.gmra.mrb[6].mxu0 %vm410_vm1, %v9280_v56  ;;  %7812 = vmatprep.mubr.msk.f32.mxu1 %vm410_vm1, %v8891_v21  ;;  %v12955_v56 = vld [vmem:[#allocation24_spill] sm:$0xff] }
  0xa2   : > { %7615 = vmatprep.mubr.msk.f32.mxu0 %vm410_vm1, %v9285_v14  ;;  %v12954_v14 = vld [vmem:[#allocation23_spill] sm:$0xff] }
  0xa4   : > { %7813 = vmatmul.mubr.msk.f32.gmra.mrb[6].mxu1 %vm410_vm1, %v8894_v22 }
  0xa5   : > { %7616 = vmatmul.mubr.msk.f32.gmra.mrb[8].mxu0 %vm410_vm1, %v9297_v17  ;;  %7815 = vmatprep.mubr.msk.f32.mxu1 %vm410_vm1, %v8916_v27  ;;  %v12953_v17 = vld [vmem:[#allocation22_spill] sm:$0xff] }
  0xa6   : > { %7618 = vmatprep.mubr.msk.f32.mxu0 %vm410_vm1, %v9302_v1  ;;  %v12952_v1 = vld [vmem:[#allocation21_spill] sm:$0xff] }
  0xa8   : > { %7816 = vmatmul.mubr.msk.f32.gmra.mrb[8].mxu1 %vm410_vm1, %v8919_v28 }
  0xa9   : > { %7619 = vmatmul.mubr.msk.f32.gmra.mrb[10].mxu0 %vm410_vm1, %v9314_v19  ;;  %7818 = vmatprep.mubr.msk.f32.mxu1 %vm410_vm1, %v8939_v33  ;;  %v12951_v19 = vld [vmem:[#allocation20_spill] sm:$0xff] }
  0xaa   : > { %7621 = vmatprep.mubr.msk.f32.mxu0 %vm410_vm1, %v9319_v59  ;;  %v12950_v59 = vld [vmem:[#allocation19_spill] sm:$0xff] }
  0xac   : > { %7819 = vmatmul.mubr.msk.f32.gmra.mrb[10].mxu1 %vm410_vm1, %v8942_v34 }
  0xad   : > { %7622 = vmatmul.mubr.msk.f32.gmra.mrb[12].mxu0 %vm410_vm1, %v9331_v2  ;;  %7821 = vmatprep.mubr.msk.f32.mxu1 %vm410_vm1, %v8962_v39  ;;  %v12949_v2 = vld [vmem:[#allocation18_spill] sm:$0xff] }
  0xae   : > { %7624 = vmatprep.mubr.msk.f32.mxu0 %vm410_vm1, %v9336_v53  ;;  %v12948_v53 = vld [vmem:[#allocation17_spill] sm:$0xff] }
  0xb0   : > { %7822 = vmatmul.mubr.msk.f32.gmra.mrb[12].mxu1 %vm410_vm1, %v8965_v40 }
  0xb1   : > { %7625 = vmatmul.mubr.msk.f32.gmra.mrb[14].mxu0 %vm410_vm1, %v9348_v60  ;;  %7824 = vmatprep.mubr.msk.f32.mxu1 %vm410_vm1, %v8985_v45  ;;  %v12947_v60 = vld [vmem:[#allocation16_spill] sm:$0xff] }
  0xb2   : > { %7627 = vmatprep.mubr.msk.f32.mxu0 %vm410_vm1, %v9353_v47  ;;  %v12946_v47 = vld [vmem:[#allocation15_spill] sm:$0xff] }
  0xb4   : > { %7825 = vmatmul.mubr.msk.f32.gmra.mrb[14].mxu1 %vm410_vm1, %v8988_v46 }
  0xb5   : > { %7628 = vmatmul.mubr.msk.f32.gmra.mrb[16].mxu0 %vm410_vm1, %v9365_v54  ;;  %7827 = vmatprep.mubr.msk.f32.mxu1 %vm410_vm1, %v9008_v51  ;;  %v12945_v54 = vld [vmem:[#allocation14_spill] sm:$0xff] }
  0xb6   : > { %7630 = vmatprep.mubr.msk.f32.mxu0 %vm410_vm1, %v9370_v41  ;;  %v12944_v41 = vld [vmem:[#allocation13_spill] sm:$0xff] }
  0xb8   : > { %7828 = vmatmul.mubr.msk.f32.gmra.mrb[16].mxu1 %vm410_vm1, %v9011_v52 }
  0xb9   : > { %7631 = vmatmul.mubr.msk.f32.gmra.mrb[18].mxu0 %vm410_vm1, %v9382_v48  ;;  %7830 = vmatprep.mubr.msk.f32.mxu1 %vm410_vm1, %v9031_v57  ;;  %v12943_v48 = vld [vmem:[#allocation12_spill] sm:$0xff] }
  0xba   : > { %7633 = vmatprep.mubr.msk.f32.mxu0 %vm410_vm1, %v9387_v35  ;;  %v12942_v35 = vld [vmem:[#allocation11_spill] sm:$0xff] }
  0xbc   : > { %7831 = vmatmul.mubr.msk.f32.gmra.mrb[18].mxu1 %vm410_vm1, %v9034_v58 }
  0xbd   : > { %7634 = vmatmul.mubr.msk.f32.gmra.mrb[20].mxu0 %vm410_vm1, %v9399_v42  ;;  %7833 = vmatprep.mubr.msk.f32.mxu1 %vm410_vm1, %v9054_v63  ;;  %v12941_v42 = vld [vmem:[#allocation10_spill] sm:$0xff] }
  0xbe   : > { %7636 = vmatprep.mubr.msk.f32.mxu0 %vm410_vm1, %v9404_v29  ;;  %v12940_v29 = vld [vmem:[#allocation9_spill] sm:$0xff] }
  0xc0   : > { %7834 = vmatmul.mubr.msk.f32.gmra.mrb[20].mxu1 %vm410_vm1, %v9057_v0 }
  0xc1   : > { %7637 = vmatmul.mubr.msk.f32.gmra.mrb[22].mxu0 %vm410_vm1, %v9416_v36  ;;  %7836 = vmatprep.mubr.msk.f32.mxu1 %vm410_vm1, %v9077_v8  ;;  %v9603_v36 = vld [vmem:[%s8824_s24 + $0xf8] sm:$0xff] }
  0xc2   : > { %7639 = vmatprep.mubr.msk.f32.mxu0 %vm410_vm1, %v12930_v43  ;;  %v12939_v43 = vld [vmem:[#allocation8_spill] sm:$0xff]  ;;  %v373_v25 = vrot.slane %v9603_v36, 1 }
  0xc4   : > { %7837 = vmatmul.mubr.msk.f32.gmra.mrb[22].mxu1 %vm410_vm1, %v9080_v13 }
  0xc5   : > { %7640 = vmatmul.mubr.msk.f32.gmra.mrb[24].mxu0 %vm410_vm1, %v9433_v30  ;;  %7839 = vmatprep.mubr.msk.f32.mxu1 %vm410_vm1, %v9100_v26  ;;  %v292_v30 = vrot.slane %v9603_v36, 7 }
  0xc6   : > { %7642 = vmatprep.mubr.msk.f32.mxu0 %vm410_vm1, %v9438_v12  ;;  %v9616_v12 = vsel %vm245_vm3, %v9593_v10, %v291_v38 }
  0xc7   : > { %12931 = vst [vmem:[#allocation64_spill] sm:$0xff] %v9616_v12 }
  0xc8   : > { %7840 = vmatmul.mubr.msk.f32.gmra.mrb[24].mxu1 %vm410_vm1, %v9103_v31 }
  0xc9   : > { %7643 = vmatmul.mubr.msk.f32.gmra.mrb[26].mxu0 %vm410_vm1, %v9450_v24  ;;  %7842 = vmatprep.mubr.msk.f32.mxu1 %vm410_vm1, %v9123_v44  ;;  %v12937_v24 = vld [vmem:[#allocation6_spill] sm:$0xff] }
  0xca   : > { %7645 = vmatprep.mubr.msk.f32.mxu0 %vm410_vm1, %v9455_v23  ;;  %v9627_v23 = vsel %vm245_vm3, %v291_v38, %v292_v30  ;;  %v9642_v30 = vld [vmem:[%s12691_s1 + $0x20] sm:$0xf] }
  0xcb   : > { %12932 = vst [vmem:[#allocation65_spill] sm:$0xff] %v9627_v23  ;;  %v12933_v38 = vld [vmem:[#allocation2_spill] sm:$0xff] }
  0xcc   : > { %7843 = vmatmul.mubr.msk.f32.gmra.mrb[26].mxu1 %vm410_vm1, %v9126_v49 }
  0xcd   : > { %7646 = vmatmul.mubr.msk.f32.gmra.mrb[28].mxu0 %vm410_vm1, %v9466_v18  ;;  %7845 = vmatprep.mubr.msk.f32.mxu1 %vm410_vm1, %v9146_v62  ;;  %v12936_v18 = vld [vmem:[#allocation5_spill] sm:$0xff] }
  0xce   : > { %7648 = vmatprep.mubr.msk.f32.mxu0 %vm410_vm1, %v9616_v12  ;;  %v9659_v12 = vld [vmem:[%s12691_s1 + $0x30] sm:$0xf] }
  0xd0   : > { %7846 = vmatmul.mubr.msk.f32.gmra.mrb[28].mxu1 %vm410_vm1, %v9149_v3 }
  0xd1   : > { %7649 = vmatmul.mubr.msk.f32.gmra.mrb[30].mxu0 %vm410_vm1, %v9627_v23  ;;  %7848 = vmatprep.mubr.msk.f32.mxu1 %vm410_vm1, %v9593_v10  ;;  %v12934_v23 = vld [vmem:[#allocation3_spill] sm:$0xff] }
  0xd2   : > { %7653 = vmatprep.mubr.msk.f32.mxu0 %vm410_vm1, %v8827_v4 }
  0xd4   : > { %7849 = vmatmul.mubr.msk.f32.gmra.mrb[30].mxu1 %vm410_vm1, %v9603_v36 }
  0xd5   : > { %7654 = vmatmul.mubr.msk.f32.vlgmr.msra.gmra.mrb[0].mxu0 %vm410_vm1, %v8830_v5  ;;  %7853 = vmatprep.mubr.msk.f32.mxu1 %vm410_vm1, %v12933_v38 }
  0xd6   : > { %7902 = vmatpush3.msk.msra.mxu0 %vm471_vm0, %v9481_v11  ;;  %7656 = vmatprep.mubr.msk.f32.mxu0 %vm410_vm1, %v8833_v6  ;;  %v12935_v11 = vld [vmem:[#allocation4_spill] sm:$0xff] }
  0xd7   : > { %7951 = vmatprep.subr.msk.mxu0 %vm471_vm0, %v9642_v30 }
  0xd8   : > { %7854 = vmatmul.mubr.msk.f32.vlgmr.msra.gmra.mrb[0].mxu1 %vm410_vm1, %v12934_v23 }
  0xd9   : > { %8102 = vmatpush3.msk.msra.mxu1 %vm471_vm0, %v9498_v50  ;;  %7657 = vmatmul.mubr.msk.f32.gmra.mrb[2].mxu0 %vm410_vm1, %v8840_v9  ;;  %v12938_v50 = vld [vmem:[#allocation7_spill] sm:$0xff] }
  0xda   : > { %7856 = vmatprep.mubr.msk.f32.mxu1 %vm410_vm1, %v12935_v11  ;;  %7659 = vmatprep.mubr.msk.f32.mxu0 %vm410_vm1, %v8864_v15 }
  0xdb   : > { %8151 = vmatprep.subr.msk.mxu1 %vm471_vm0, %v9659_v12 }
  0xdc   : > { %7857 = vmatmul.mubr.msk.f32.gmra.mrb[2].mxu1 %vm410_vm1, %v12936_v18 }
  0xdd   : > { %7660 = vmatmul.mubr.msk.f32.gmra.mrb[4].mxu0 %vm410_vm1, %v8867_v16  ;;  %7859 = vmatprep.mubr.msk.f32.mxu1 %vm410_vm1, %v12937_v24 }
  0xde   : > { %7662 = vmatprep.mubr.msk.f32.mxu0 %vm410_vm1, %v8891_v21 }
  0xe0   : > { %7860 = vmatmul.mubr.msk.f32.gmra.mrb[4].mxu1 %vm410_vm1, %v12938_v50 }
  0xe1   : > { %7663 = vmatmul.mubr.msk.f32.gmra.mrb[6].mxu0 %vm410_vm1, %v8894_v22  ;;  %7862 = vmatprep.mubr.msk.f32.mxu1 %vm410_vm1, %v12939_v43 }
  0xe2   : > { %7665 = vmatprep.mubr.msk.f32.mxu0 %vm410_vm1, %v8916_v27 }
  0xe4   : > { %7863 = vmatmul.mubr.msk.f32.gmra.mrb[6].mxu1 %vm410_vm1, %v12940_v29 }
  0xe5   : > { %7666 = vmatmul.mubr.msk.f32.gmra.mrb[8].mxu0 %vm410_vm1, %v8919_v28  ;;  %7865 = vmatprep.mubr.msk.f32.mxu1 %vm410_vm1, %v12941_v42 }
  0xe6   : > { %7668 = vmatprep.mubr.msk.f32.mxu0 %vm410_vm1, %v8939_v33 }
  0xe8   : > { %7866 = vmatmul.mubr.msk.f32.gmra.mrb[8].mxu1 %vm410_vm1, %v12942_v35 }
  0xe9   : > { %7669 = vmatmul.mubr.msk.f32.gmra.mrb[10].mxu0 %vm410_vm1, %v8942_v34  ;;  %7868 = vmatprep.mubr.msk.f32.mxu1 %vm410_vm1, %v12943_v48 }
  0xea   : > { %7671 = vmatprep.mubr.msk.f32.mxu0 %vm410_vm1, %v8962_v39 }
  0xec   : > { %7869 = vmatmul.mubr.msk.f32.gmra.mrb[10].mxu1 %vm410_vm1, %v12944_v41 }
  0xed   : > { %7672 = vmatmul.mubr.msk.f32.gmra.mrb[12].mxu0 %vm410_vm1, %v8965_v40  ;;  %7871 = vmatprep.mubr.msk.f32.mxu1 %vm410_vm1, %v12945_v54 }
  0xee   : > { %7674 = vmatprep.mubr.msk.f32.mxu0 %vm410_vm1, %v8985_v45 }
  0xf0   : > { %7872 = vmatmul.mubr.msk.f32.gmra.mrb[12].mxu1 %vm410_vm1, %v12946_v47 }
  0xf1   : > { %7675 = vmatmul.mubr.msk.f32.gmra.mrb[14].mxu0 %vm410_vm1, %v8988_v46  ;;  %7874 = vmatprep.mubr.msk.f32.mxu1 %vm410_vm1, %v12947_v60 }
  0xf2   : > { %7677 = vmatprep.mubr.msk.f32.mxu0 %vm410_vm1, %v9008_v51 }
  0xf4   : > { %7875 = vmatmul.mubr.msk.f32.gmra.mrb[14].mxu1 %vm410_vm1, %v12948_v53 }
  0xf5   : > { %7678 = vmatmul.mubr.msk.f32.gmra.mrb[16].mxu0 %vm410_vm1, %v9011_v52  ;;  %7877 = vmatprep.mubr.msk.f32.mxu1 %vm410_vm1, %v12949_v2 }
  0xf6   : > { %7680 = vmatprep.mubr.msk.f32.mxu0 %vm410_vm1, %v9031_v57 }
  0xf8   : > { %7878 = vmatmul.mubr.msk.f32.gmra.mrb[16].mxu1 %vm410_vm1, %v12950_v59 }
  0xf9   : > { %7681 = vmatmul.mubr.msk.f32.gmra.mrb[18].mxu0 %vm410_vm1, %v9034_v58  ;;  %7880 = vmatprep.mubr.msk.f32.mxu1 %vm410_vm1, %v12951_v19 }
  0xfa   : > { %7683 = vmatprep.mubr.msk.f32.mxu0 %vm410_vm1, %v9054_v63 }
  0xfc   : > { %7881 = vmatmul.mubr.msk.f32.gmra.mrb[18].mxu1 %vm410_vm1, %v12952_v1 }
  0xfd   : > { %7684 = vmatmul.mubr.msk.f32.gmra.mrb[20].mxu0 %vm410_vm1, %v9057_v0  ;;  %7883 = vmatprep.mubr.msk.f32.mxu1 %vm410_vm1, %v12953_v17 }
  0xfe   : > { %7686 = vmatprep.mubr.msk.f32.mxu0 %vm410_vm1, %v9077_v8 }
 0x100   : > { %7884 = vmatmul.mubr.msk.f32.gmra.mrb[20].mxu1 %vm410_vm1, %v12954_v14 }
 0x101   : > { %7687 = vmatmul.mubr.msk.f32.gmra.mrb[22].mxu0 %vm410_vm1, %v9080_v13  ;;  %7886 = vmatprep.mubr.msk.f32.mxu1 %vm410_vm1, %v12955_v56 }
 0x102   : > { %7689 = vmatprep.mubr.msk.f32.mxu0 %vm410_vm1, %v9100_v26 }
 0x104   : > { %7887 = vmatmul.mubr.msk.f32.gmra.mrb[22].mxu1 %vm410_vm1, %v12956_v32 }
 0x105   : > { %7690 = vmatmul.mubr.msk.f32.gmra.mrb[24].mxu0 %vm410_vm1, %v9103_v31  ;;  %7889 = vmatprep.mubr.msk.f32.mxu1 %vm410_vm1, %v12957_v20 }
 0x106   : > { %7692 = vmatprep.mubr.msk.f32.mxu0 %vm410_vm1, %v9123_v44 }
 0x108   : > { %7890 = vmatmul.mubr.msk.f32.gmra.mrb[24].mxu1 %vm410_vm1, %v12958_v37  ;;  %v12961_v37 = vld [vmem:[#allocation32_spill] sm:$0xff] }
 0x109   : > { %7693 = vmatmul.mubr.msk.f32.gmra.mrb[26].mxu0 %vm410_vm1, %v9126_v49  ;;  %7892 = vmatprep.mubr.msk.f32.mxu1 %vm410_vm1, %v12959_v61  ;;  %v9778_v61 = vsel %vm326_vm2, %v372_v55, %v373_v25  ;;  %v9797_v55 = vld [vmem:[%s12691_s1 + $0x28] sm:$0xf] }
 0x10a   : > { %7695 = vmatprep.mubr.msk.f32.mxu0 %vm410_vm1, %v9146_v62  ;;  %12962 = vst [vmem:[#allocation2_spill] sm:$0xff] %v9778_v61  ;;  %v12963_v62 = vld [vmem:[#allocation34_spill] sm:$0xff] }
 0x10c   : > { %7893 = vmatmul.mubr.msk.f32.gmra.mrb[26].mxu1 %vm410_vm1, %v12960_v7 }
 0x10d   : > { %7696 = vmatmul.mubr.msk.f32.gmra.mrb[28].mxu0 %vm410_vm1, %v9149_v3  ;;  %7895 = vmatprep.mubr.msk.f32.mxu1 %vm410_vm1, %v12961_v37  ;;  %v9788_v3 = vsel %vm326_vm2, %v373_v25, %v9603_v36  ;;  %v12970_v25 = vld [vmem:[#allocation35_spill] sm:$0xff] }
 0x10e   : > { %7698 = vmatprep.mubr.msk.f32.mxu0 %vm410_vm1, %v9593_v10  ;;  %12964 = vst [vmem:[#allocation3_spill] sm:$0xff] %v9788_v3 }
 0x110   : > { %7896 = vmatmul.mubr.msk.f32.gmra.mrb[28].mxu1 %vm410_vm1, %v12963_v62 }
 0x111   : > { %7699 = vmatmul.mubr.msk.f32.gmra.mrb[30].mxu0 %vm410_vm1, %v9603_v36  ;;  %7898 = vmatprep.mubr.msk.f32.mxu1 %vm410_vm1, %v9778_v61 }
 0x112   : > { %7903 = vmatprep.mubr.msk.f32.mxu0 %vm410_vm1, %v8827_v4  ;;  %v9814_v4 = vld [vmem:[%s12691_s1 + $0x38] sm:$0xf] }
 0x114   : > { %7899 = vmatmul.mubr.msk.f32.gmra.mrb[30].mxu1 %vm410_vm1, %v9788_v3 }
 0x115   : > { %7904 = vmatmul.mubr.msk.f32.vlgmr.msra.gmra.mrb[32].mxu0 %vm410_vm1, %v8830_v5  ;;  %8103 = vmatprep.mubr.msk.f32.mxu1 %vm410_vm1, %v12933_v38  ;;  %v12965_v5 = vld [vmem:[#allocation29_spill] sm:$0xff]  ;;  %v12971_v38 = vld [vmem:[#allocation36_spill] sm:$0xff] }
 0x116   : > { %7952 = vmatpush3.msk.msra.mxu0 %vm471_vm0, %v9642_v30  ;;  %7906 = vmatprep.mubr.msk.f32.mxu0 %vm410_vm1, %v8833_v6  ;;  %v12966_v6 = vld [vmem:[#allocation30_spill] sm:$0xff] }
 0x117   : > { %8001 = vmatprep.subr.msk.mxu0 %vm471_vm0, %v9797_v55  ;;  %v8711_v30 = vld [vmem:[%s8824_s24] sm:$0xff] }
 0x118   : > { %8104 = vmatmul.mubr.msk.f32.vlgmr.msra.gmra.mrb[32].mxu1 %vm410_vm1, %v12934_v23  ;;  %v9943_v23 = vld [vmem:[%s12691_s1 + $0x2c] sm:$0xf] }
 0x119   : > { %8152 = vmatpush3.msk.msra.mxu1 %vm471_vm0, %v9659_v12  ;;  %7907 = vmatmul.mubr.msk.f32.gmra.mrb[34].mxu0 %vm410_vm1, %v8840_v9  ;;  %v12967_v9 = vld [vmem:[#allocation27_spill] sm:$0xff]  ;;  %v12968_v12 = vld [vmem:[#allocation28_spill] sm:$0xff] }
 0x11a   : > { %8106 = vmatprep.mubr.msk.f32.mxu1 %vm410_vm1, %v12935_v11  ;;  %7909 = vmatprep.mubr.msk.f32.mxu0 %vm410_vm1, %v8864_v15 }
 0x11b   : > { %8201 = vmatprep.subr.msk.mxu1 %vm471_vm0, %v9814_v4 }
 0x11c   : > { %8107 = vmatmul.mubr.msk.f32.gmra.mrb[34].mxu1 %vm410_vm1, %v12936_v18 }
 0x11d   : > { %7910 = vmatmul.mubr.msk.f32.gmra.mrb[36].mxu0 %vm410_vm1, %v8867_v16  ;;  %8109 = vmatprep.mubr.msk.f32.mxu1 %vm410_vm1, %v12937_v24  ;;  %v12969_v16 = vld [vmem:[#allocation33_spill] sm:$0xff] }
 0x11e   : > { %7912 = vmatprep.mubr.msk.f32.mxu0 %vm410_vm1, %v8891_v21 }
 0x120   : > { %8110 = vmatmul.mubr.msk.f32.gmra.mrb[36].mxu1 %vm410_vm1, %v12938_v50 }
 0x121   : > { %7913 = vmatmul.mubr.msk.f32.gmra.mrb[38].mxu0 %vm410_vm1, %v8894_v22  ;;  %8112 = vmatprep.mubr.msk.f32.mxu1 %vm410_vm1, %v12939_v43 }
 0x122   : > { %7915 = vmatprep.mubr.msk.f32.mxu0 %vm410_vm1, %v8916_v27 }
 0x124   : > { %8113 = vmatmul.mubr.msk.f32.gmra.mrb[38].mxu1 %vm410_vm1, %v12940_v29 }
 0x125   : > { %7916 = vmatmul.mubr.msk.f32.gmra.mrb[40].mxu0 %vm410_vm1, %v8919_v28  ;;  %8115 = vmatprep.mubr.msk.f32.mxu1 %vm410_vm1, %v12941_v42 }
 0x126   : > { %7918 = vmatprep.mubr.msk.f32.mxu0 %vm410_vm1, %v8939_v33 }
 0x128   : > { %8116 = vmatmul.mubr.msk.f32.gmra.mrb[40].mxu1 %vm410_vm1, %v12942_v35 }
 0x129   : > { %7919 = vmatmul.mubr.msk.f32.gmra.mrb[42].mxu0 %vm410_vm1, %v8942_v34  ;;  %8118 = vmatprep.mubr.msk.f32.mxu1 %vm410_vm1, %v12943_v48 }
 0x12a   : > { %7921 = vmatprep.mubr.msk.f32.mxu0 %vm410_vm1, %v8962_v39 }
 0x12c   : > { %8119 = vmatmul.mubr.msk.f32.gmra.mrb[42].mxu1 %vm410_vm1, %v12944_v41 }
 0x12d   : > { %7922 = vmatmul.mubr.msk.f32.gmra.mrb[44].mxu0 %vm410_vm1, %v8965_v40  ;;  %8121 = vmatprep.mubr.msk.f32.mxu1 %vm410_vm1, %v12945_v54 }
 0x12e   : > { %7924 = vmatprep.mubr.msk.f32.mxu0 %vm410_vm1, %v8985_v45 }
 0x130   : > { %8122 = vmatmul.mubr.msk.f32.gmra.mrb[44].mxu1 %vm410_vm1, %v12946_v47 }
 0x131   : > { %7925 = vmatmul.mubr.msk.f32.gmra.mrb[46].mxu0 %vm410_vm1, %v8988_v46  ;;  %8124 = vmatprep.mubr.msk.f32.mxu1 %vm410_vm1, %v12947_v60 }
 0x132   : > { %7927 = vmatprep.mubr.msk.f32.mxu0 %vm410_vm1, %v9008_v51 }
 0x134   : > { %8125 = vmatmul.mubr.msk.f32.gmra.mrb[46].mxu1 %vm410_vm1, %v12948_v53 }
 0x135   : > { %7928 = vmatmul.mubr.msk.f32.gmra.mrb[48].mxu0 %vm410_vm1, %v9011_v52  ;;  %8127 = vmatprep.mubr.msk.f32.mxu1 %vm410_vm1, %v12949_v2 }
 0x136   : > { %7930 = vmatprep.mubr.msk.f32.mxu0 %vm410_vm1, %v9031_v57 }
 0x138   : > { %8128 = vmatmul.mubr.msk.f32.gmra.mrb[48].mxu1 %vm410_vm1, %v12950_v59 }
 0x139   : > { %7931 = vmatmul.mubr.msk.f32.gmra.mrb[50].mxu0 %vm410_vm1, %v9034_v58  ;;  %8130 = vmatprep.mubr.msk.f32.mxu1 %vm410_vm1, %v12951_v19 }
 0x13a   : > { %7933 = vmatprep.mubr.msk.f32.mxu0 %vm410_vm1, %v9054_v63 }
 0x13c   : > { %8131 = vmatmul.mubr.msk.f32.gmra.mrb[50].mxu1 %vm410_vm1, %v12952_v1 }
 0x13d   : > { %7934 = vmatmul.mubr.msk.f32.gmra.mrb[52].mxu0 %vm410_vm1, %v9057_v0  ;;  %8133 = vmatprep.mubr.msk.f32.mxu1 %vm410_vm1, %v12953_v17 }
 0x13e   : > { %7936 = vmatprep.mubr.msk.f32.mxu0 %vm410_vm1, %v9077_v8 }
 0x140   : > { %8134 = vmatmul.mubr.msk.f32.gmra.mrb[52].mxu1 %vm410_vm1, %v12954_v14 }
 0x141   : > { %7937 = vmatmul.mubr.msk.f32.gmra.mrb[54].mxu0 %vm410_vm1, %v9080_v13  ;;  %8136 = vmatprep.mubr.msk.f32.mxu1 %vm410_vm1, %v12955_v56 }
 0x142   : > { %7939 = vmatprep.mubr.msk.f32.mxu0 %vm410_vm1, %v9100_v26 }
 0x144   : > { %8137 = vmatmul.mubr.msk.f32.gmra.mrb[54].mxu1 %vm410_vm1, %v12956_v32 }
 0x145   : > { %7940 = vmatmul.mubr.msk.f32.gmra.mrb[56].mxu0 %vm410_vm1, %v9103_v31  ;;  %8139 = vmatprep.mubr.msk.f32.mxu1 %vm410_vm1, %v12957_v20 }
 0x146   : > { %7942 = vmatprep.mubr.msk.f32.mxu0 %vm410_vm1, %v9123_v44 }
 0x148   : > { %8140 = vmatmul.mubr.msk.f32.gmra.mrb[56].mxu1 %vm410_vm1, %v12965_v5  ;;  %v12980_v5 = vld [vmem:[#allocation45_spill] sm:$0xff] }
 0x149   : > { %7943 = vmatmul.mubr.msk.f32.gmra.mrb[58].mxu0 %vm410_vm1, %v9126_v49  ;;  %8142 = vmatprep.mubr.msk.f32.mxu1 %vm410_vm1, %v12966_v6  ;;  %v12979_v6 = vld [vmem:[#allocation44_spill] sm:$0xff] }
 0x14a   : > { %7945 = vmatprep.mubr.msk.f32.mxu0 %vm410_vm1, %v12967_v9 }
 0x14c   : > { %8143 = vmatmul.mubr.msk.f32.gmra.mrb[58].mxu1 %vm410_vm1, %v12960_v7  ;;  %v12977_v7 = vld [vmem:[#allocation42_spill] sm:$0xff] }
 0x14d   : > { %7946 = vmatmul.mubr.msk.f32.gmra.mrb[60].mxu0 %vm410_vm1, %v12968_v12  ;;  %8145 = vmatprep.mubr.msk.f32.mxu1 %vm410_vm1, %v12961_v37  ;;  %v12976_v37 = vld [vmem:[#allocation41_spill] sm:$0xff] }
 0x14e   : > { %7948 = vmatprep.mubr.msk.f32.mxu0 %vm410_vm1, %v9593_v10 }
 0x150   : > { %8146 = vmatmul.mubr.msk.f32.gmra.mrb[60].mxu1 %vm410_vm1, %v12963_v62  ;;  %v9987_v62 = vld [vmem:[%s8824_s24 + $0x28] sm:$0xff] }
 0x151   : > { %7949 = vmatmul.mubr.msk.f32.gmra.mrb[62].mxu0 %vm410_vm1, %v9603_v36  ;;  %8148 = vmatprep.mubr.msk.f32.mxu1 %vm410_vm1, %v9778_v61  ;;  %v12975_v61 = vld [vmem:[#allocation40_spill] sm:$0xff] }
 0x152   : > { %7953 = vmatprep.mubr.msk.f32.mxu0 %vm410_vm1, %v12969_v16  ;;  %v8712_v16 = vld [vmem:[%s8824_s24 + $0x8] sm:$0xff] }
 0x154   : > { %8149 = vmatmul.mubr.msk.f32.gmra.mrb[62].mxu1 %vm410_vm1, %v9788_v3  ;;  %v12973_v3 = vld [vmem:[#allocation38_spill] sm:$0xff] }
 0x155   : > { %7954 = vmatmul.mubr.msk.f32.vlgmr.msra.gmra.mrb[32].mxu0 %vm410_vm1, %v12970_v25  ;;  %8153 = vmatprep.mubr.msk.f32.mxu1 %vm410_vm1, %v8711_v30  ;;  %v9960_v25 = vld [vmem:[%s12691_s1 + $0x3c] sm:$0xf] }
 0x156   : > { %8002 = vmatpush3.msk.msra.mxu0 %vm471_vm0, %v9797_v55  ;;  %7956 = vmatprep.mubr.msk.f32.mxu0 %vm410_vm1, %v12971_v38  ;;  %v12972_v30 = vld [vmem:[#allocation37_spill] sm:$0xff]  ;;  %v9967_v55 = vld [vmem:[%s8824_s24 + $0x10] sm:$0xff] }
 0x157   : > { %8051 = vmatprep.subr.msk.mxu0 %vm471_vm0, %v9943_v23 }
 0x158   : > { %8154 = vmatmul.mubr.msk.f32.vlgmr.msra.gmra.mrb[32].mxu1 %vm410_vm1, %v8712_v16  ;;  %v9976_v16 = vld [vmem:[%s8824_s24 + $0x18] sm:$0xff] }
 0x159   : > { %8202 = vmatpush3.msk.msra.mxu1 %vm471_vm0, %v9814_v4  ;;  %7957 = vmatmul.mubr.msk.f32.gmra.mrb[34].mxu0 %vm410_vm1, %v12972_v30  ;;  %v12974_v4 = vld [vmem:[#allocation39_spill] sm:$0xff] }
 0x15a   : > { %8156 = vmatprep.mubr.msk.f32.mxu1 %vm410_vm1, %v9967_v55  ;;  %7959 = vmatprep.mubr.msk.f32.mxu0 %vm410_vm1, %v12973_v3 }
 0x15b   : > { %8251 = vmatprep.subr.msk.mxu1 %vm471_vm0, %v9960_v25 }
 0x15c   : > { %8157 = vmatmul.mubr.msk.f32.gmra.mrb[34].mxu1 %vm410_vm1, %v9976_v16 }
 0x15d   : > { %7960 = vmatmul.mubr.msk.f32.gmra.mrb[36].mxu0 %vm410_vm1, %v12974_v4  ;;  %8159 = vmatprep.mubr.msk.f32.mxu1 %vm410_vm1, %v8864_v15  ;;  %v12978_v15 = vld [vmem:[#allocation43_spill] sm:$0xff] }
 0x15e   : > { %7962 = vmatprep.mubr.msk.f32.mxu0 %vm410_vm1, %v12975_v61 }
 0x160   : > { %8160 = vmatmul.mubr.msk.f32.gmra.mrb[36].mxu1 %vm410_vm1, %v9987_v62 }
 0x161   : > { %7963 = vmatmul.mubr.msk.f32.gmra.mrb[38].mxu0 %vm410_vm1, %v12976_v37  ;;  %8162 = vmatprep.mubr.msk.f32.mxu1 %vm410_vm1, %v8891_v21  ;;  %v12981_v21 = vld [vmem:[#allocation46_spill] sm:$0xff] }
 0x162   : > { %7965 = vmatprep.mubr.msk.f32.mxu0 %vm410_vm1, %v12977_v7 }
 0x164   : > { %8163 = vmatmul.mubr.msk.f32.gmra.mrb[38].mxu1 %vm410_vm1, %v8894_v22  ;;  %v12982_v22 = vld [vmem:[#allocation47_spill] sm:$0xff] }
 0x165   : > { %7966 = vmatmul.mubr.msk.f32.gmra.mrb[40].mxu0 %vm410_vm1, %v12978_v15  ;;  %8165 = vmatprep.mubr.msk.f32.mxu1 %vm410_vm1, %v8916_v27  ;;  %v12983_v27 = vld [vmem:[#allocation48_spill] sm:$0xff] }
 0x166   : > { %7968 = vmatprep.mubr.msk.f32.mxu0 %vm410_vm1, %v12979_v6 }
 0x168   : > { %8166 = vmatmul.mubr.msk.f32.gmra.mrb[40].mxu1 %vm410_vm1, %v8919_v28  ;;  %v12984_v28 = vld [vmem:[#allocation49_spill] sm:$0xff] }
 0x169   : > { %7969 = vmatmul.mubr.msk.f32.gmra.mrb[42].mxu0 %vm410_vm1, %v12980_v5  ;;  %8168 = vmatprep.mubr.msk.f32.mxu1 %vm410_vm1, %v8939_v33  ;;  %v12985_v33 = vld [vmem:[#allocation50_spill] sm:$0xff] }
 0x16a   : > { %7971 = vmatprep.mubr.msk.f32.mxu0 %vm410_vm1, %v12981_v21 }
 0x16c   : > { %8169 = vmatmul.mubr.msk.f32.gmra.mrb[42].mxu1 %vm410_vm1, %v8942_v34  ;;  %v12986_v34 = vld [vmem:[#allocation51_spill] sm:$0xff] }
 0x16d   : > { %7972 = vmatmul.mubr.msk.f32.gmra.mrb[44].mxu0 %vm410_vm1, %v12982_v22  ;;  %8171 = vmatprep.mubr.msk.f32.mxu1 %vm410_vm1, %v8962_v39  ;;  %v12987_v39 = vld [vmem:[#allocation52_spill] sm:$0xff] }
 0x16e   : > { %7974 = vmatprep.mubr.msk.f32.mxu0 %vm410_vm1, %v12983_v27 }
 0x170   : > { %8172 = vmatmul.mubr.msk.f32.gmra.mrb[44].mxu1 %vm410_vm1, %v8965_v40  ;;  %v12988_v40 = vld [vmem:[#allocation53_spill] sm:$0xff] }
 0x171   : > { %7975 = vmatmul.mubr.msk.f32.gmra.mrb[46].mxu0 %vm410_vm1, %v12984_v28  ;;  %8174 = vmatprep.mubr.msk.f32.mxu1 %vm410_vm1, %v8985_v45  ;;  %v12989_v45 = vld [vmem:[#allocation54_spill] sm:$0xff] }
 0x172   : > { %7977 = vmatprep.mubr.msk.f32.mxu0 %vm410_vm1, %v12985_v33 }
 0x174   : > { %8175 = vmatmul.mubr.msk.f32.gmra.mrb[46].mxu1 %vm410_vm1, %v8988_v46  ;;  %v12990_v46 = vld [vmem:[#allocation55_spill] sm:$0xff] }
 0x175   : > { %7978 = vmatmul.mubr.msk.f32.gmra.mrb[48].mxu0 %vm410_vm1, %v12986_v34  ;;  %8177 = vmatprep.mubr.msk.f32.mxu1 %vm410_vm1, %v9008_v51  ;;  %v12991_v51 = vld [vmem:[#allocation56_spill] sm:$0xff] }
 0x176   : > { %7980 = vmatprep.mubr.msk.f32.mxu0 %vm410_vm1, %v12987_v39 }
 0x178   : > { %8178 = vmatmul.mubr.msk.f32.gmra.mrb[48].mxu1 %vm410_vm1, %v9011_v52  ;;  %v12992_v52 = vld [vmem:[#allocation57_spill] sm:$0xff] }
 0x179   : > { %7981 = vmatmul.mubr.msk.f32.gmra.mrb[50].mxu0 %vm410_vm1, %v12988_v40  ;;  %8180 = vmatprep.mubr.msk.f32.mxu1 %vm410_vm1, %v9031_v57  ;;  %v12993_v57 = vld [vmem:[#allocation58_spill] sm:$0xff] }
 0x17a   : > { %7983 = vmatprep.mubr.msk.f32.mxu0 %vm410_vm1, %v12989_v45 }
 0x17c   : > { %8181 = vmatmul.mubr.msk.f32.gmra.mrb[50].mxu1 %vm410_vm1, %v9034_v58  ;;  %v12994_v58 = vld [vmem:[#allocation59_spill] sm:$0xff] }
 0x17d   : > { %7984 = vmatmul.mubr.msk.f32.gmra.mrb[52].mxu0 %vm410_vm1, %v12990_v46  ;;  %8183 = vmatprep.mubr.msk.f32.mxu1 %vm410_vm1, %v9054_v63  ;;  %v12995_v63 = vld [vmem:[#allocation60_spill] sm:$0xff] }
 0x17e   : > { %7986 = vmatprep.mubr.msk.f32.mxu0 %vm410_vm1, %v12991_v51 }
 0x180   : > { %8184 = vmatmul.mubr.msk.f32.gmra.mrb[52].mxu1 %vm410_vm1, %v9057_v0  ;;  %v12996_v0 = vld [vmem:[#allocation61_spill] sm:$0xff] }
 0x181   : > { %7987 = vmatmul.mubr.msk.f32.gmra.mrb[54].mxu0 %vm410_vm1, %v12992_v52  ;;  %8186 = vmatprep.mubr.msk.f32.mxu1 %vm410_vm1, %v9077_v8  ;;  %v12997_v8 = vld [vmem:[#allocation62_spill] sm:$0xff] }
 0x182   : > { %7989 = vmatprep.mubr.msk.f32.mxu0 %vm410_vm1, %v12993_v57 }
 0x184   : > { %8187 = vmatmul.mubr.msk.f32.gmra.mrb[54].mxu1 %vm410_vm1, %v9080_v13  ;;  %v12998_v13 = vld [vmem:[#allocation63_spill] sm:$0xff] }
 0x185   : > { %7990 = vmatmul.mubr.msk.f32.gmra.mrb[56].mxu0 %vm410_vm1, %v12994_v58  ;;  %8189 = vmatprep.mubr.msk.f32.mxu1 %vm410_vm1, %v9100_v26  ;;  %v12999_v26 = vld [vmem:[#allocation64_spill] sm:$0xff] }
 0x186   : > { %7992 = vmatprep.mubr.msk.f32.mxu0 %vm410_vm1, %v12995_v63 }
 0x188   : > { %8190 = vmatmul.mubr.msk.f32.gmra.mrb[56].mxu1 %vm410_vm1, %v9103_v31  ;;  %v13000_v31 = vld [vmem:[#allocation65_spill] sm:$0xff] }
 0x189   : > { %7993 = vmatmul.mubr.msk.f32.gmra.mrb[58].mxu0 %vm410_vm1, %v12996_v0  ;;  %8192 = vmatprep.mubr.msk.f32.mxu1 %vm410_vm1, %v9123_v44  ;;  %v10110_v44 = vld [vmem:[%s8824_s24 + $0x20] sm:$0xff] }
 0x18a   : > { %7995 = vmatprep.mubr.msk.f32.mxu0 %vm410_vm1, %v12997_v8 }
 0x18c   : > { %8193 = vmatmul.mubr.msk.f32.gmra.mrb[58].mxu1 %vm410_vm1, %v9126_v49  ;;  %v10121_v49 = vld [vmem:[%s8824_s24 + $0x30] sm:$0xff] }
 0x18d   : > { %7996 = vmatmul.mubr.msk.f32.gmra.mrb[60].mxu0 %vm410_vm1, %v12998_v13  ;;  %8195 = vmatprep.mubr.msk.f32.mxu1 %vm410_vm1, %v12967_v9 }
 0x18e   : > { %7998 = vmatprep.mubr.msk.f32.mxu0 %vm410_vm1, %v12999_v26 }
 0x190   : > { %8196 = vmatmul.mubr.msk.f32.gmra.mrb[60].mxu1 %vm410_vm1, %v12968_v12 }
 0x191   : > { %7999 = vmatmul.mubr.msk.f32.gmra.mrb[62].mxu0 %vm410_vm1, %v13000_v31  ;;  %8198 = vmatprep.mubr.msk.f32.mxu1 %vm410_vm1, %v9593_v10 }
 0x192   : > { %8003 = vmatprep.mubr.msk.f32.mxu0 %vm410_vm1, %v12971_v38 }
 0x194   : > { %8199 = vmatmul.mubr.msk.f32.gmra.mrb[62].mxu1 %vm410_vm1, %v9603_v36 }
 0x195   : > { %8004 = vmatmul.mubr.msk.f32.vlgmr.msra.gmra.mrb[32].mxu0 %vm410_vm1, %v12972_v30  ;;  %8203 = vmatprep.mubr.msk.f32.mxu1 %vm410_vm1, %v9967_v55 }
 0x196   : > { %8052 = vmatpush3.msk.msra.mxu0 %vm471_vm0, %v9943_v23  ;;  %8006 = vmatprep.mubr.msk.f32.mxu0 %vm410_vm1, %v12973_v3  ;;  %v10128_v3 = vld [vmem:[%s8824_s24 + $0x38] sm:$0xff]  ;;  %v10172_v23 = vld [vmem:[%s8824_s24 + $0x60] sm:$0xff] }
 0x198   : > { %8204 = vmatmul.mubr.msk.f32.vlgmr.msra.gmra.mrb[32].mxu1 %vm410_vm1, %v9976_v16 }
 0x199   : > { %8252 = vmatpush3.msk.msra.mxu1 %vm471_vm0, %v9960_v25  ;;  %8007 = vmatmul.mubr.msk.f32.gmra.mrb[34].mxu0 %vm410_vm1, %v12974_v4 }
 0x19a   : > { %8206 = vmatprep.mubr.msk.f32.mxu1 %vm410_vm1, %v10110_v44  ;;  %8009 = vmatprep.mubr.msk.f32.mxu0 %vm410_vm1, %v12975_v61  ;;  %v10135_v61 = vld [vmem:[%s8824_s24 + $0x40] sm:$0xff] }
 0x19c   : > { %8207 = vmatmul.mubr.msk.f32.gmra.mrb[34].mxu1 %vm410_vm1, %v9987_v62 }
 0x19d   : > { %8010 = vmatmul.mubr.msk.f32.gmra.mrb[36].mxu0 %vm410_vm1, %v12976_v37  ;;  %8209 = vmatprep.mubr.msk.f32.mxu1 %vm410_vm1, %v10121_v49  ;;  %v10143_v37 = vld [vmem:[%s8824_s24 + $0x48] sm:$0xff] }
 0x19e   : > { %8012 = vmatprep.mubr.msk.f32.mxu0 %vm410_vm1, %v12977_v7  ;;  %v10150_v7 = vld [vmem:[%s8824_s24 + $0x50] sm:$0xff] }
 0x1a0   : > { %8210 = vmatmul.mubr.msk.f32.gmra.mrb[36].mxu1 %vm410_vm1, %v10128_v3 }
 0x1a1   : > { %8013 = vmatmul.mubr.msk.f32.gmra.mrb[38].mxu0 %vm410_vm1, %v12978_v15  ;;  %8212 = vmatprep.mubr.msk.f32.mxu1 %vm410_vm1, %v10135_v61 }
 0x1a2   : > { %8015 = vmatprep.mubr.msk.f32.mxu0 %vm410_vm1, %v12979_v6  ;;  %v10162_v6 = vld [vmem:[%s8824_s24 + $0x58] sm:$0xff] }
 0x1a4   : > { %8213 = vmatmul.mubr.msk.f32.gmra.mrb[38].mxu1 %vm410_vm1, %v10143_v37 }
 0x1a5   : > { %8016 = vmatmul.mubr.msk.f32.gmra.mrb[40].mxu0 %vm410_vm1, %v12980_v5  ;;  %8215 = vmatprep.mubr.msk.f32.mxu1 %vm410_vm1, %v10150_v7 }
 0x1a6   : > { %8018 = vmatprep.mubr.msk.f32.mxu0 %vm410_vm1, %v12981_v21 }
 0x1a8   : > { %v7655_v36 = vpop.f32.mrb[0].mxu0  ;;  %8216 = vmatmul.mubr.msk.f32.gmra.mrb[40].mxu1 %vm410_vm1, %v10162_v6 }
 0x1a9   : > { %v1537_v5 = vsel %vm410_vm1, %v7655_v36, 0.0  ;;  %v1607_v9 = vmul.f32 %v7655_v36, %v7655_v36  ;;  %1709 = vst.msk [vmem:[%s10157_s29 + $0x8] sm:$0xff] %vm410_vm1, %v7655_v36  ;;  %v1345_v12 = vpop.f32.mrb[1].mxu0  ;;  %8019 = vmatmul.mubr.msk.f32.gmra.mrb[42].mxu0 %vm410_vm1, %v12982_v22  ;;  %8218 = vmatprep.mubr.msk.f32.mxu1 %vm410_vm1, %v10172_v23 }
 0x1aa   : > { %v1536_v38 = vsel %vm410_vm1, %v1345_v12, 0.0  ;;  %v1606_v25 = vmul.f32 %v1345_v12, %v1345_v12  ;;  %1708 = vst.msk [vmem:[%s10157_s29] sm:$0xff] %vm410_vm1, %v1345_v12  ;;  %8021 = vmatprep.mubr.msk.f32.mxu0 %vm410_vm1, %v12983_v27  ;;  %v10187_v12 = vld [vmem:[%s8824_s24 + $0x68] sm:$0xff] }
 0x1ab   : > { %v1639_v30 = vsel %vm410_vm1, %v1607_v9, 0.0  ;;  %v1538_v4 = vadd.f32 %v1537_v5, %v1536_v38  ;;  %v7855_v15 = vpop.f32.mrb[0].mxu1 }
 0x1ac   : > { %v1638_v21 = vsel %vm410_vm1, %v1606_v25, 0.0  ;;  %v2805_v22 = vsel %vm410_vm1, %v7855_v15, 0.0  ;;  %v2875_v36 = vmul.f32 %v7855_v15, %v7855_v15  ;;  %6410 = vst.msk [vmem:[%s10157_s29 + $0x108] sm:$0xff] %vm410_vm1, %v7855_v15  ;;  %v7658_v20 = vpop.f32.mrb[2].mxu0  ;;  %v2613_v32 = vpop.f32.mrb[1].mxu1  ;;  %8219 = vmatmul.mubr.msk.f32.gmra.mrb[42].mxu1 %vm410_vm1, %v10187_v12  ;;  %v10199_v25 = vld [vmem:[%s8824_s24 + $0x70] sm:$0xff] }
 0x1ad   : > { %v1640_v27 = vadd.f32 %v1639_v30, %v1638_v21  ;;  %v1609_v9 = vmul.f32 %v7658_v20, %v7658_v20  ;;  %1711 = vst.msk [vmem:[%s10157_s29 + $0x18] sm:$0xff] %vm410_vm1, %v7658_v20  ;;  %v2804_v5 = vsel %vm410_vm1, %v2613_v32, 0.0  ;;  %6409 = vst.msk [vmem:[%s10157_s29 + $0x100] sm:$0xff] %vm410_vm1, %v2613_v32  ;;  %v1355_v38 = vpop.f32.mrb[3].mxu0  ;;  %8022 = vmatmul.mubr.msk.f32.gmra.mrb[44].mxu0 %vm410_vm1, %v12984_v28  ;;  %8221 = vmatprep.mubr.msk.f32.mxu1 %vm410_vm1, %v10199_v25 }
 0x1ae   : > { %v2907_v30 = vsel %vm410_vm1, %v2875_v36, 0.0  ;;  %v2806_v15 = vadd.f32 %v2805_v22, %v2804_v5  ;;  %v2874_v21 = vmul.f32 %v2613_v32, %v2613_v32  ;;  %v1539_v56 = vsel %vm410_vm1, %v1355_v38, 0.0  ;;  %1710 = vst.msk [vmem:[%s10157_s29 + $0x10] sm:$0xff] %vm410_vm1, %v1355_v38  ;;  %8024 = vmatprep.mubr.msk.f32.mxu0 %vm410_vm1, %v12985_v33  ;;  %v10213_v32 = vld [vmem:[%s8824_s24 + $0x78] sm:$0xff] }
 0x1af   : > { %v1540_v28 = vadd.f32 %v1539_v56, %v1538_v4  ;;  %v1608_v14 = vmul.f32 %v1355_v38, %v1355_v38  ;;  %v7858_v17 = vpop.f32.mrb[2].mxu1  ;;  %13001 = vst [vmem:[#allocation4_spill] sm:$0xff] %v10213_v32  ;;  %v1541_v5 = vsel %vm410_vm1, %v7658_v20, 0.0  ;;  %v10226_v38 = vld [vmem:[%s8824_s24 + $0x80] sm:$0xff]  ;;  %v1643_v20 = vsel %vm410_vm1, %v1609_v9, 0.0 }
 0x1b0   : > { %v2906_v1 = vsel %vm410_vm1, %v2874_v21, 0.0  ;;  %6412 = vst.msk [vmem:[%s10157_s29 + $0x118] sm:$0xff] %vm410_vm1, %v7858_v17  ;;  %v7661_v36 = vpop.f32.mrb[4].mxu0  ;;  %v2623_v22 = vpop.f32.mrb[3].mxu1  ;;  %8222 = vmatmul.mubr.msk.f32.gmra.mrb[44].mxu1 %vm410_vm1, %v10213_v32  ;;  %v2877_v33 = vmul.f32 %v7858_v17, %v7858_v17  ;;  %13002 = vst [vmem:[#allocation5_spill] sm:$0xff] %v10226_v38  ;;  %v2809_v9 = vsel %vm410_vm1, %v7858_v17, 0.0 }
 0x1b1   : > { %v2908_v19 = vadd.f32 %v2907_v30, %v2906_v1  ;;  %v1641_v56 = vsel %vm410_vm1, %v1608_v14, 0.0  ;;  %1713 = vst.msk [vmem:[%s10157_s29 + $0x28] sm:$0xff] %vm410_vm1, %v7661_v36  ;;  %6411 = vst.msk [vmem:[%s10157_s29 + $0x110] sm:$0xff] %vm410_vm1, %v2623_v22  ;;  %v1365_v4 = vpop.f32.mrb[5].mxu0  ;;  %8025 = vmatmul.mubr.msk.f32.gmra.mrb[46].mxu0 %vm410_vm1, %v12986_v34  ;;  %8224 = vmatprep.mubr.msk.f32.mxu1 %vm410_vm1, %v10226_v38  ;;  %v2807_v14 = vsel %vm410_vm1, %v2623_v22, 0.0  ;;  %v10270_v32 = vld [vmem:[%s8824_s24 + $0x98] sm:$0xff] }
 0x1b2   : > { %v1642_v1 = vadd.f32 %v1641_v56, %v1640_v27  ;;  %v2876_v30 = vmul.f32 %v2623_v22, %v2623_v22  ;;  %1712 = vst.msk [vmem:[%s10157_s29 + $0x20] sm:$0xff] %vm410_vm1, %v1365_v4  ;;  %8027 = vmatprep.mubr.msk.f32.mxu0 %vm410_vm1, %v12987_v39  ;;  %v1611_v21 = vmul.f32 %v7661_v36, %v7661_v36  ;;  %v1543_v2 = vsel %vm410_vm1, %v1365_v4, 0.0  ;;  %v10242_v39 = vld [vmem:[%s8824_s24 + $0x88] sm:$0xff] }
 0x1b3   : > { %v2808_v34 = vadd.f32 %v2807_v14, %v2806_v15  ;;  %v1542_v59 = vadd.f32 %v1541_v5, %v1540_v28  ;;  %v7861_v53 = vpop.f32.mrb[4].mxu1  ;;  %v1610_v56 = vmul.f32 %v1365_v4, %v1365_v4  ;;  %13003 = vst [vmem:[#allocation6_spill] sm:$0xff] %v10242_v39  ;;  %v2911_v15 = vsel %vm410_vm1, %v2877_v33, 0.0 }
 0x1b4   : > { %v2909_v27 = vsel %vm410_vm1, %v2876_v30, 0.0  ;;  %v1644_v22 = vadd.f32 %v1643_v20, %v1642_v1  ;;  %6414 = vst.msk [vmem:[%s10157_s29 + $0x128] sm:$0xff] %vm410_vm1, %v7861_v53  ;;  %v7664_v38 = vpop.f32.mrb[6].mxu0  ;;  %v2633_v60 = vpop.f32.mrb[5].mxu1  ;;  %8225 = vmatmul.mubr.msk.f32.gmra.mrb[46].mxu1 %vm410_vm1, %v10242_v39  ;;  %v1545_v28 = vsel %vm410_vm1, %v7661_v36, 0.0  ;;  %v10255_v20 = vld [vmem:[%s8824_s24 + $0x90] sm:$0xff]  ;;  %v2879_v1 = vmul.f32 %v7861_v53, %v7861_v53 }
 0x1b5   : > { %v2910_v17 = vadd.f32 %v2909_v27, %v2908_v19  ;;  %v1544_v5 = vadd.f32 %v1543_v2, %v1542_v59  ;;  %1715 = vst.msk [vmem:[%s10157_s29 + $0x38] sm:$0xff] %vm410_vm1, %v7664_v38  ;;  %6413 = vst.msk [vmem:[%s10157_s29 + $0x120] sm:$0xff] %vm410_vm1, %v2633_v60  ;;  %v1375_v4 = vpop.f32.mrb[7].mxu0  ;;  %8028 = vmatmul.mubr.msk.f32.gmra.mrb[48].mxu0 %vm410_vm1, %v12988_v40  ;;  %8227 = vmatprep.mubr.msk.f32.mxu1 %vm410_vm1, %v10255_v20  ;;  %v1645_v33 = vsel %vm410_vm1, %v1610_v56, 0.0 }
 0x1b6   : > { %13004 = vst [vmem:[#allocation7_spill] sm:$0xff] %v10255_v20  ;;  %v2810_v36 = vadd.f32 %v2809_v9, %v2808_v34  ;;  %v2811_v59 = vsel %vm410_vm1, %v2633_v60, 0.0  ;;  %1714 = vst.msk [vmem:[%s10157_s29 + $0x30] sm:$0xff] %vm410_vm1, %v1375_v4  ;;  %8030 = vmatprep.mubr.msk.f32.mxu0 %vm410_vm1, %v12989_v45  ;;  %v1647_v19 = vsel %vm410_vm1, %v1611_v21, 0.0  ;;  %v1646_v2 = vadd.f32 %v1645_v33, %v1644_v22 }
 0x1b7   : > { %v2878_v40 = vmul.f32 %v2633_v60, %v2633_v60  ;;  %v2912_v14 = vadd.f32 %v2911_v15, %v2910_v17  ;;  %v7864_v30 = vpop.f32.mrb[6].mxu1  ;;  %v1613_v27 = vmul.f32 %v7664_v38, %v7664_v38  ;;  %v1546_v34 = vadd.f32 %v1545_v28, %v1544_v5  ;;  %v10283_v28 = vld [vmem:[%s8824_s24 + $0xa0] sm:$0xff] }
 0x1b8   : > { %v2812_v56 = vadd.f32 %v2811_v59, %v2810_v36  ;;  %v1547_v9 = vsel %vm410_vm1, %v1375_v4, 0.0  ;;  %6416 = vst.msk [vmem:[%s10157_s29 + $0x138] sm:$0xff] %vm410_vm1, %v7864_v30  ;;  %v7667_v20 = vpop.f32.mrb[8].mxu0  ;;  %v2643_v39 = vpop.f32.mrb[7].mxu1  ;;  %8228 = vmatmul.mubr.msk.f32.gmra.mrb[48].mxu1 %vm410_vm1, %v10270_v32  ;;  %v2813_v60 = vsel %vm410_vm1, %v7861_v53, 0.0  ;;  %v1612_v21 = vmul.f32 %v1375_v4, %v1375_v4 }
 0x1b9   : > { %v2913_v45 = vsel %vm410_vm1, %v2878_v40, 0.0  ;;  %v1648_v22 = vadd.f32 %v1647_v19, %v1646_v2  ;;  %1717 = vst.msk [vmem:[%s10157_s29 + $0x48] sm:$0xff] %vm410_vm1, %v7667_v20  ;;  %6415 = vst.msk [vmem:[%s10157_s29 + $0x130] sm:$0xff] %vm410_vm1, %v2643_v39  ;;  %v1385_v15 = vpop.f32.mrb[9].mxu0  ;;  %8031 = vmatmul.mubr.msk.f32.gmra.mrb[50].mxu0 %vm410_vm1, %v12990_v46  ;;  %8230 = vmatprep.mubr.msk.f32.mxu1 %vm410_vm1, %v10283_v28  ;;  %v2915_v53 = vsel %vm410_vm1, %v2879_v1, 0.0  ;;  %v1549_v17 = vsel %vm410_vm1, %v7664_v38, 0.0 }
 0x1ba   : > { %v2914_v5 = vadd.f32 %v2913_v45, %v2912_v14  ;;  %v1548_v4 = vadd.f32 %v1547_v9, %v1546_v34  ;;  %1716 = vst.msk [vmem:[%s10157_s29 + $0x40] sm:$0xff] %vm410_vm1, %v1385_v15  ;;  %8033 = vmatprep.mubr.msk.f32.mxu0 %vm410_vm1, %v12991_v51  ;;  %v1649_v46 = vsel %vm410_vm1, %v1612_v21, 0.0  ;;  %v2881_v33 = vmul.f32 %v7864_v30, %v7864_v30  ;;  %v10299_v51 = vld [vmem:[%s8824_s24 + $0xa8] sm:$0xff] }
 0x1bb   : > { %v2814_v36 = vadd.f32 %v2813_v60, %v2812_v56  ;;  %v2815_v59 = vsel %vm410_vm1, %v2643_v39, 0.0  ;;  %v7867_v19 = vpop.f32.mrb[8].mxu1  ;;  %v1651_v1 = vsel %vm410_vm1, %v1613_v27, 0.0  ;;  %v1650_v38 = vadd.f32 %v1649_v46, %v1648_v22  ;;  %v10311_v27 = vld [vmem:[%s8824_s24 + $0xb0] sm:$0xff] }
 0x1bc   : > { %v2880_v2 = vmul.f32 %v2643_v39, %v2643_v39  ;;  %v2916_v40 = vadd.f32 %v2915_v53, %v2914_v5  ;;  %6418 = vst.msk [vmem:[%s10157_s29 + $0x148] sm:$0xff] %vm410_vm1, %v7867_v19  ;;  %v7670_v14 = vpop.f32.mrb[10].mxu0  ;;  %v2653_v34 = vpop.f32.mrb[9].mxu1  ;;  %8231 = vmatmul.mubr.msk.f32.gmra.mrb[50].mxu1 %vm410_vm1, %v10299_v51  ;;  %v1615_v56 = vmul.f32 %v7667_v20, %v7667_v20  ;;  %v1551_v45 = vsel %vm410_vm1, %v1385_v15, 0.0 }
 0x1bd   : > { %v2816_v9 = vadd.f32 %v2815_v59, %v2814_v36  ;;  %v1550_v60 = vadd.f32 %v1549_v17, %v1548_v4  ;;  %1719 = vst.msk [vmem:[%s10157_s29 + $0x58] sm:$0xff] %vm410_vm1, %v7670_v14  ;;  %6417 = vst.msk [vmem:[%s10157_s29 + $0x140] sm:$0xff] %vm410_vm1, %v2653_v34  ;;  %v1395_v39 = vpop.f32.mrb[11].mxu0  ;;  %8034 = vmatmul.mubr.msk.f32.gmra.mrb[52].mxu0 %vm410_vm1, %v12992_v52  ;;  %8233 = vmatprep.mubr.msk.f32.mxu1 %vm410_vm1, %v10311_v27  ;;  %v2817_v21 = vsel %vm410_vm1, %v7864_v30, 0.0 }
 0x1be   : > { %v2917_v22 = vsel %vm410_vm1, %v2880_v2, 0.0  ;;  %v1614_v53 = vmul.f32 %v1385_v15, %v1385_v15  ;;  %v1652_v17 = vadd.f32 %v1651_v1, %v1650_v38  ;;  %1718 = vst.msk [vmem:[%s10157_s29 + $0x50] sm:$0xff] %vm410_vm1, %v1395_v39  ;;  %8036 = vmatprep.mubr.msk.f32.mxu0 %vm410_vm1, %v12993_v57  ;;  %v2919_v52 = vsel %vm410_vm1, %v2881_v33, 0.0  ;;  %v10330_v33 = vld [vmem:[%s8824_s24 + $0xb8] sm:$0xff] }
 0x1bf   : > { %v1553_v5 = vsel %vm410_vm1, %v7667_v20, 0.0  ;;  %v2918_v4 = vadd.f32 %v2917_v22, %v2916_v40  ;;  %v1552_v46 = vadd.f32 %v1551_v45, %v1550_v60  ;;  %v7870_v36 = vpop.f32.mrb[10].mxu1  ;;  %v2883_v59 = vmul.f32 %v7867_v19, %v7867_v19  ;;  %v10343_v45 = vld [vmem:[%s8824_s24 + $0xc0] sm:$0xff] }
 0x1c0   : > { %v1653_v30 = vsel %vm410_vm1, %v1614_v53, 0.0  ;;  %v2818_v15 = vadd.f32 %v2817_v21, %v2816_v9  ;;  %v2819_v1 = vsel %vm410_vm1, %v2653_v34, 0.0  ;;  %6420 = vst.msk [vmem:[%s10157_s29 + $0x158] sm:$0xff] %vm410_vm1, %v7870_v36  ;;  %v10327_v38 = vpop.f32.mrb[12].mxu0  ;;  %v2663_v57 = vpop.f32.mrb[11].mxu1  ;;  %8234 = vmatmul.mubr.msk.f32.gmra.mrb[52].mxu1 %vm410_vm1, %v10330_v33  ;;  %v1655_v20 = vsel %vm410_vm1, %v1615_v56, 0.0 }
 0x1c1   : > { %v1654_v2 = vadd.f32 %v1653_v30, %v1652_v17  ;;  %v2882_v40 = vmul.f32 %v2653_v34, %v2653_v34  ;;  %v2920_v60 = vadd.f32 %v2919_v52, %v2918_v4  ;;  %1721 = vst.msk [vmem:[%s10157_s29 + $0x68] sm:$0xff] %vm410_vm1, %v10327_v38  ;;  %6419 = vst.msk [vmem:[%s10157_s29 + $0x150] sm:$0xff] %vm410_vm1, %v2663_v57  ;;  %v1405_v9 = vpop.f32.mrb[13].mxu0  ;;  %8037 = vmatmul.mubr.msk.f32.gmra.mrb[54].mxu0 %vm410_vm1, %v12994_v58 }
 0x1c2   : > { %8236 = vmatprep.mubr.msk.f32.mxu1 %vm410_vm1, %v10343_v45  ;;  %v1617_v21 = vmul.f32 %v7670_v14, %v7670_v14  ;;  %v2820_v56 = vadd.f32 %v2819_v1, %v2818_v15  ;;  %v1554_v22 = vadd.f32 %v1553_v5, %v1552_v46  ;;  %v1555_v34 = vsel %vm410_vm1, %v1395_v39, 0.0  ;;  %1720 = vst.msk [vmem:[%s10157_s29 + $0x60] sm:$0xff] %vm410_vm1, %v1405_v9  ;;  %v10364_v1 = vld [vmem:[%s8824_s24 + $0xc8] sm:$0xff] }
 0x1c3   : > { %8039 = vmatprep.mubr.msk.f32.mxu0 %vm410_vm1, %v12995_v63  ;;  %v2821_v53 = vsel %vm410_vm1, %v7867_v19, 0.0  ;;  %v2921_v58 = vsel %vm410_vm1, %v2882_v40, 0.0  ;;  %v1616_v17 = vmul.f32 %v1395_v39, %v1395_v39  ;;  %v1656_v52 = vadd.f32 %v1655_v20, %v1654_v2  ;;  %v10354_v4 = vpop.f32.mrb[12].mxu1  ;;  %v10378_v40 = vld [vmem:[%s8824_s24 + $0xd0] sm:$0xff] }
 0x1c4   : > { %v2923_v5 = vsel %vm410_vm1, %v2883_v59, 0.0  ;;  %v1557_v46 = vsel %vm410_vm1, %v7670_v14, 0.0  ;;  %v2922_v30 = vadd.f32 %v2921_v58, %v2920_v60  ;;  %v1556_v15 = vadd.f32 %v1555_v34, %v1554_v22  ;;  %6422 = vst.msk [vmem:[%s10157_s29 + $0x168] sm:$0xff] %vm410_vm1, %v10354_v4  ;;  %v10361_v63 = vpop.f32.mrb[14].mxu0  ;;  %v2673_v19 = vpop.f32.mrb[13].mxu1  ;;  %8237 = vmatmul.mubr.msk.f32.gmra.mrb[54].mxu1 %vm410_vm1, %v10364_v1  ;;  %13005 = vst [vmem:[#allocation8_spill] sm:$0xff] %v10378_v40 }
 0x1c5   : > { %v1657_v39 = vsel %vm410_vm1, %v1616_v17, 0.0  ;;  %v2885_v59 = vmul.f32 %v7870_v36, %v7870_v36  ;;  %v2822_v20 = vadd.f32 %v2821_v53, %v2820_v56  ;;  %v2823_v14 = vsel %vm410_vm1, %v2663_v57, 0.0  ;;  %1723 = vst.msk [vmem:[%s10157_s29 + $0x78] sm:$0xff] %vm410_vm1, %v10361_v63  ;;  %6421 = vst.msk [vmem:[%s10157_s29 + $0x160] sm:$0xff] %vm410_vm1, %v2673_v19  ;;  %v1415_v2 = vpop.f32.mrb[15].mxu0  ;;  %8040 = vmatmul.mubr.msk.f32.gmra.mrb[56].mxu0 %vm410_vm1, %v12996_v0 }
 0x1c6   : > { %8239 = vmatprep.mubr.msk.f32.mxu1 %vm410_vm1, %v10378_v40  ;;  %v1659_v60 = vsel %vm410_vm1, %v1617_v21, 0.0  ;;  %v1658_v56 = vadd.f32 %v1657_v39, %v1656_v52  ;;  %v2884_v22 = vmul.f32 %v2663_v57, %v2663_v57  ;;  %v2924_v34 = vadd.f32 %v2923_v5, %v2922_v30  ;;  %1722 = vst.msk [vmem:[%s10157_s29 + $0x70] sm:$0xff] %vm410_vm1, %v1415_v2 }
 0x1c7   : > { %8042 = vmatprep.mubr.msk.f32.mxu0 %vm410_vm1, %v12997_v8  ;;  %v1619_v0 = vmul.f32 %v10327_v38, %v10327_v38  ;;  %v2824_v53 = vadd.f32 %v2823_v14, %v2822_v20  ;;  %v1558_v58 = vadd.f32 %v1557_v46, %v1556_v15  ;;  %v1559_v17 = vsel %vm410_vm1, %v1405_v9, 0.0  ;;  %v10390_v40 = vpop.f32.mrb[14].mxu1  ;;  %v10400_v46 = vld [vmem:[%s8824_s24 + $0xd8] sm:$0xff]  ;;  %v10417_v14 = vld [vmem:[%s8824_s24 + $0xe0] sm:$0xff] }
 0x1c8   : > { %v2825_v57 = vsel %vm410_vm1, %v7870_v36, 0.0  ;;  %v2925_v21 = vsel %vm410_vm1, %v2884_v22, 0.0  ;;  %v1618_v52 = vmul.f32 %v1405_v9, %v1405_v9  ;;  %v1660_v5 = vadd.f32 %v1659_v60, %v1658_v56  ;;  %6424 = vst.msk [vmem:[%s10157_s29 + $0x178] sm:$0xff] %vm410_vm1, %v10390_v40  ;;  %v10397_v8 = vpop.f32.mrb[16].mxu0  ;;  %v2683_v30 = vpop.f32.mrb[15].mxu1  ;;  %8240 = vmatmul.mubr.msk.f32.gmra.mrb[56].mxu1 %vm410_vm1, %v10400_v46  ;;  %13006 = vst [vmem:[#allocation9_spill] sm:$0xff] %v10417_v14 }
 0x1c9   : > { %v2927_v15 = vsel %vm410_vm1, %v2885_v59, 0.0  ;;  %v1561_v36 = vsel %vm410_vm1, %v10327_v38, 0.0  ;;  %v2926_v39 = vadd.f32 %v2925_v21, %v2924_v34  ;;  %v1560_v9 = vadd.f32 %v1559_v17, %v1558_v58  ;;  %1725 = vst.msk [vmem:[%s10157_s29 + $0x88] sm:$0xff] %vm410_vm1, %v10397_v8  ;;  %6423 = vst.msk [vmem:[%s10157_s29 + $0x170] sm:$0xff] %vm410_vm1, %v2683_v30  ;;  %v10412_v20 = vpop.f32.mrb[17].mxu0  ;;  %8043 = vmatmul.mubr.msk.f32.gmra.mrb[58].mxu0 %vm410_vm1, %v12998_v13 }
 0x1ca   : > { %8242 = vmatprep.mubr.msk.f32.mxu1 %vm410_vm1, %v10417_v14  ;;  %v1661_v38 = vsel %vm410_vm1, %v1618_v52, 0.0  ;;  %v2887_v59 = vmul.f32 %v10354_v4, %v10354_v4  ;;  %v2826_v60 = vadd.f32 %v2825_v57, %v2824_v53  ;;  %v2827_v56 = vsel %vm410_vm1, %v2673_v19, 0.0  ;;  %1724 = vst.msk [vmem:[%s10157_s29 + $0x80] sm:$0xff] %vm410_vm1, %v10412_v20  ;;  %8045 = vmatprep.mubr.msk.f32.mxu0 %vm410_vm1, %v12999_v26 }
 0x1cb   : > { %v1663_v13 = vsel %vm410_vm1, %v1619_v0, 0.0  ;;  %v1662_v22 = vadd.f32 %v1661_v38, %v1660_v5  ;;  %v2886_v34 = vmul.f32 %v2673_v19, %v2673_v19  ;;  %v2928_v58 = vadd.f32 %v2927_v15, %v2926_v39  ;;  %v10431_v17 = vpop.f32.mrb[16].mxu1  ;;  %v10444_v19 = vld [vmem:[%s8824_s24 + $0xe8] sm:$0xff] }
 0x1cc   : > { %v1621_v53 = vmul.f32 %v10361_v63, %v10361_v63  ;;  %v2828_v57 = vadd.f32 %v2827_v56, %v2826_v60  ;;  %v1562_v21 = vadd.f32 %v1561_v36, %v1560_v9  ;;  %v1563_v52 = vsel %vm410_vm1, %v1415_v2, 0.0  ;;  %6426 = vst.msk [vmem:[%s10157_s29 + $0x188] sm:$0xff] %vm410_vm1, %v10431_v17  ;;  %v10439_v14 = vpop.f32.mrb[18].mxu0  ;;  %v10441_v0 = vpop.f32.mrb[17].mxu1  ;;  %8243 = vmatmul.mubr.msk.f32.gmra.mrb[58].mxu1 %vm410_vm1, %v10444_v19 }
 0x1cd   : > { %v2829_v5 = vsel %vm410_vm1, %v10354_v4, 0.0  ;;  %v2929_v15 = vsel %vm410_vm1, %v2886_v34, 0.0  ;;  %v1620_v36 = vmul.f32 %v1415_v2, %v1415_v2  ;;  %v1664_v39 = vadd.f32 %v1663_v13, %v1662_v22  ;;  %1727 = vst.msk [vmem:[%s10157_s29 + $0x98] sm:$0xff] %vm410_vm1, %v10439_v14  ;;  %6425 = vst.msk [vmem:[%s10157_s29 + $0x180] sm:$0xff] %vm410_vm1, %v10441_v0  ;;  %v10457_v9 = vpop.f32.mrb[19].mxu0  ;;  %8046 = vmatmul.mubr.msk.f32.gmra.mrb[60].mxu0 %vm410_vm1, %v13000_v31 }
 0x1ce   : > { %8245 = vmatprep.mubr.msk.f32.mxu1 %vm410_vm1, %v9593_v10  ;;  %v2931_v4 = vsel %vm410_vm1, %v2887_v59, 0.0  ;;  %v1565_v2 = vsel %vm410_vm1, %v10361_v63, 0.0  ;;  %v2930_v38 = vadd.f32 %v2929_v15, %v2928_v58  ;;  %v1564_v60 = vadd.f32 %v1563_v52, %v1562_v21  ;;  %1726 = vst.msk [vmem:[%s10157_s29 + $0x90] sm:$0xff] %vm410_vm1, %v10457_v9  ;;  %8048 = vmatprep.mubr.msk.f32.mxu0 %vm410_vm1, %v12999_v26 }
 0x1cf   : > { %v1665_v56 = vsel %vm410_vm1, %v1620_v36, 0.0  ;;  %v2889_v10 = vmul.f32 %v10390_v40, %v10390_v40  ;;  %v2830_v13 = vadd.f32 %v2829_v5, %v2828_v57  ;;  %v2831_v59 = vsel %vm410_vm1, %v2683_v30, 0.0  ;;  %v10475_v63 = vpop.f32.mrb[18].mxu1  ;;  %v10486_v57 = vld [vmem:[%s8824_s24 + $0xf8] sm:$0xff] }
 0x1d0   : > { %v1667_v22 = vsel %vm410_vm1, %v1621_v53, 0.0  ;;  %v1666_v34 = vadd.f32 %v1665_v56, %v1664_v39  ;;  %v2888_v58 = vmul.f32 %v2683_v30, %v2683_v30  ;;  %v2932_v21 = vadd.f32 %v2931_v4, %v2930_v38  ;;  %6428 = vst.msk [vmem:[%s10157_s29 + $0x198] sm:$0xff] %vm410_vm1, %v10475_v63  ;;  %v10481_v26 = vpop.f32.mrb[20].mxu0  ;;  %v10483_v52 = vpop.f32.mrb[19].mxu1  ;;  %8246 = vmatmul.mubr.msk.f32.gmra.mrb[60].mxu1 %vm410_vm1, %v10486_v57  ;;  %v10505_v39 = vld [vmem:[%s8824_s24 + $0xf0] sm:$0xff] }
 0x1d1   : > { %v1623_v53 = vmul.f32 %v10397_v8, %v10397_v8  ;;  %v2832_v5 = vadd.f32 %v2831_v59, %v2830_v13  ;;  %v1566_v15 = vadd.f32 %v1565_v2, %v1564_v60  ;;  %v1567_v30 = vsel %vm410_vm1, %v10412_v20, 0.0  ;;  %1729 = vst.msk [vmem:[%s10157_s29 + $0xa8] sm:$0xff] %vm410_vm1, %v10481_v26  ;;  %6427 = vst.msk [vmem:[%s10157_s29 + $0x190] sm:$0xff] %vm410_vm1, %v10483_v52  ;;  %v10500_v36 = vpop.f32.mrb[21].mxu0 }
 0x1d2   : > { %8049 = vmatmul.mubr.msk.f32.gmra.mrb[62].mxu0 %vm410_vm1, %v13000_v31  ;;  %8248 = vmatprep.mubr.msk.f32.mxu1 %vm410_vm1, %v10505_v39  ;;  %v2833_v4 = vsel %vm410_vm1, %v10390_v40, 0.0  ;;  %v2933_v2 = vsel %vm410_vm1, %v2888_v58, 0.0  ;;  %v1622_v38 = vmul.f32 %v10412_v20, %v10412_v20  ;;  %v1668_v60 = vadd.f32 %v1667_v22, %v1666_v34  ;;  %1728 = vst.msk [vmem:[%s10157_s29 + $0xa0] sm:$0xff] %vm410_vm1, %v10500_v36 }
 0x1d3   : > { %8053 = vmatprep.mubr.msk.f32.mxu0 %vm410_vm1, %v9967_v55  ;;  %v2935_v31 = vsel %vm410_vm1, %v2889_v10, 0.0  ;;  %v1569_v56 = vsel %vm410_vm1, %v10397_v8, 0.0  ;;  %v2934_v13 = vadd.f32 %v2933_v2, %v2932_v21  ;;  %v1568_v40 = vadd.f32 %v1567_v30, %v1566_v15  ;;  %v10522_v59 = vpop.f32.mrb[20].mxu1 }
 0x1d4   : > { %v1669_v20 = vsel %vm410_vm1, %v1622_v38, 0.0  ;;  %v2891_v22 = vmul.f32 %v10431_v17, %v10431_v17  ;;  %v2834_v34 = vadd.f32 %v2833_v4, %v2832_v5  ;;  %v2835_v55 = vsel %vm410_vm1, %v10441_v0, 0.0  ;;  %6430 = vst.msk [vmem:[%s10157_s29 + $0x1a8] sm:$0xff] %vm410_vm1, %v10522_v59  ;;  %v10532_v10 = vpop.f32.mrb[22].mxu0  ;;  %v10534_v8 = vpop.f32.mrb[21].mxu1  ;;  %8249 = vmatmul.mubr.msk.f32.gmra.mrb[62].mxu1 %vm410_vm1, %v10486_v57 }
 0x1d5   : > { %v1671_v58 = vsel %vm410_vm1, %v1623_v53, 0.0  ;;  %v1670_v21 = vadd.f32 %v1669_v20, %v1668_v60  ;;  %v2890_v5 = vmul.f32 %v10441_v0, %v10441_v0  ;;  %v2936_v15 = vadd.f32 %v2935_v31, %v2934_v13  ;;  %1731 = vst.msk [vmem:[%s10157_s29 + $0xb8] sm:$0xff] %vm410_vm1, %v10532_v10  ;;  %6429 = vst.msk [vmem:[%s10157_s29 + $0x1a0] sm:$0xff] %vm410_vm1, %v10534_v8  ;;  %v10547_v30 = vpop.f32.mrb[23].mxu0 }
 0x1d6   : > { %8054 = vmatmul.mubr.msk.f32.vlgmr.msra.gmra.mrb[32].mxu0 %vm410_vm1, %v9976_v16  ;;  %8253 = vmatprep.mubr.msk.f32.mxu1 %vm410_vm1, %v12935_v11  ;;  %v1625_v53 = vmul.f32 %v10439_v14, %v10439_v14  ;;  %v2836_v0 = vadd.f32 %v2835_v55, %v2834_v34  ;;  %v1570_v4 = vadd.f32 %v1569_v56, %v1568_v40  ;;  %v1571_v2 = vsel %vm410_vm1, %v10457_v9, 0.0 }
 0x1d7   : > { %1730 = vst.msk [vmem:[%s10157_s29 + $0xb0] sm:$0xff] %vm410_vm1, %v10547_v30  ;;  %8056 = vmatprep.mubr.msk.f32.mxu0 %vm410_vm1, %v10110_v44  ;;  %v2837_v16 = vsel %vm410_vm1, %v10431_v17, 0.0  ;;  %v2937_v11 = vsel %vm410_vm1, %v2890_v5, 0.0  ;;  %v1624_v38 = vmul.f32 %v10457_v9, %v10457_v9  ;;  %v1672_v60 = vadd.f32 %v1671_v58, %v1670_v21  ;;  %v10567_v31 = vpop.f32.mrb[22].mxu1 }
 0x1d8   : > { %v2939_v56 = vsel %vm410_vm1, %v2891_v22, 0.0  ;;  %v1573_v13 = vsel %vm410_vm1, %v10439_v14, 0.0  ;;  %v2938_v40 = vadd.f32 %v2937_v11, %v2936_v15  ;;  %v1572_v44 = vadd.f32 %v1571_v2, %v1570_v4  ;;  %6432 = vst.msk [vmem:[%s10157_s29 + $0x1b8] sm:$0xff] %vm410_vm1, %v10567_v31  ;;  %v10575_v17 = vpop.f32.mrb[24].mxu0  ;;  %v10577_v20 = vpop.f32.mrb[23].mxu1  ;;  %8254 = vmatmul.mubr.msk.f32.vlgmr.msra.gmra.mrb[32].mxu1 %vm410_vm1, %v12936_v18 }
 0x1d9   : > { %v1673_v9 = vsel %vm410_vm1, %v1624_v38, 0.0  ;;  %v2893_v22 = vmul.f32 %v10475_v63, %v10475_v63  ;;  %v2838_v34 = vadd.f32 %v2837_v16, %v2836_v0  ;;  %v2839_v14 = vsel %vm410_vm1, %v10483_v52, 0.0  ;;  %1733 = vst.msk [vmem:[%s10157_s29 + $0xc8] sm:$0xff] %vm410_vm1, %v10575_v17  ;;  %6431 = vst.msk [vmem:[%s10157_s29 + $0x1b0] sm:$0xff] %vm410_vm1, %v10577_v20  ;;  %v10592_v55 = vpop.f32.mrb[25].mxu0  ;;  %8256 = vmatprep.mubr.msk.f32.mxu1 %vm410_vm1, %v12937_v24 }
 0x1da   : > { %8057 = vmatmul.mubr.msk.f32.gmra.mrb[34].mxu0 %vm410_vm1, %v9987_v62  ;;  %v1675_v18 = vsel %vm410_vm1, %v1625_v53, 0.0  ;;  %v1674_v58 = vadd.f32 %v1673_v9, %v1672_v60  ;;  %v2892_v21 = vmul.f32 %v10483_v52, %v10483_v52  ;;  %v2940_v5 = vadd.f32 %v2939_v56, %v2938_v40  ;;  %1732 = vst.msk [vmem:[%s10157_s29 + $0xc0] sm:$0xff] %vm410_vm1, %v10592_v55 }
 0x1db   : > { %8059 = vmatprep.mubr.msk.f32.mxu0 %vm410_vm1, %v10121_v49  ;;  %v1627_v62 = vmul.f32 %v10481_v26, %v10481_v26  ;;  %v2840_v15 = vadd.f32 %v2839_v14, %v2838_v34  ;;  %v1574_v24 = vadd.f32 %v1573_v13, %v1572_v44  ;;  %v1575_v53 = vsel %vm410_vm1, %v10500_v36, 0.0  ;;  %v10610_v0 = vpop.f32.mrb[24].mxu1 }
 0x1dc   : > { %v2841_v52 = vsel %vm410_vm1, %v10475_v63, 0.0  ;;  %v2941_v4 = vsel %vm410_vm1, %v2892_v21, 0.0  ;;  %v1626_v49 = vmul.f32 %v10500_v36, %v10500_v36  ;;  %v1676_v2 = vadd.f32 %v1675_v18, %v1674_v58  ;;  %6434 = vst.msk [vmem:[%s10157_s29 + $0x1c8] sm:$0xff] %vm410_vm1, %v10610_v0  ;;  %v10620_v16 = vpop.f32.mrb[26].mxu0  ;;  %v10622_v11 = vpop.f32.mrb[25].mxu1  ;;  %8257 = vmatmul.mubr.msk.f32.gmra.mrb[34].mxu1 %vm410_vm1, %v12938_v50 }
 0x1dd   : > { %v2943_v38 = vsel %vm410_vm1, %v2893_v22, 0.0  ;;  %v1577_v63 = vsel %vm410_vm1, %v10481_v26, 0.0  ;;  %v2942_v60 = vadd.f32 %v2941_v4, %v2940_v5  ;;  %v1576_v56 = vadd.f32 %v1575_v53, %v1574_v24  ;;  %1735 = vst.msk [vmem:[%s10157_s29 + $0xd8] sm:$0xff] %vm410_vm1, %v10620_v16  ;;  %6433 = vst.msk [vmem:[%s10157_s29 + $0x1c0] sm:$0xff] %vm410_vm1, %v10622_v11  ;;  %v10635_v36 = vpop.f32.mrb[27].mxu0  ;;  %8259 = vmatprep.mubr.msk.f32.mxu1 %vm410_vm1, %v12939_v43 }
 0x1de   : > { %8060 = vmatmul.mubr.msk.f32.gmra.mrb[36].mxu0 %vm410_vm1, %v10128_v3  ;;  %v1677_v50 = vsel %vm410_vm1, %v1626_v49, 0.0  ;;  %v2895_v26 = vmul.f32 %v10522_v59, %v10522_v59  ;;  %v2842_v13 = vadd.f32 %v2841_v52, %v2840_v15  ;;  %v2843_v40 = vsel %vm410_vm1, %v10534_v8, 0.0  ;;  %1734 = vst.msk [vmem:[%s10157_s29 + $0xd0] sm:$0xff] %vm410_vm1, %v10635_v36 }
 0x1df   : > { %8062 = vmatprep.mubr.msk.f32.mxu0 %vm410_vm1, %v10135_v61  ;;  %v1679_v3 = vsel %vm410_vm1, %v1627_v62, 0.0  ;;  %v1678_v44 = vadd.f32 %v1677_v50, %v1676_v2  ;;  %v2894_v43 = vmul.f32 %v10534_v8, %v10534_v8  ;;  %v2944_v9 = vadd.f32 %v2943_v38, %v2942_v60  ;;  %v10654_v22 = vpop.f32.mrb[26].mxu1 }
 0x1e0   : > { %v1629_v34 = vmul.f32 %v10532_v10, %v10532_v10  ;;  %v2844_v14 = vadd.f32 %v2843_v40, %v2842_v13  ;;  %v1578_v18 = vadd.f32 %v1577_v63, %v1576_v56  ;;  %v1579_v58 = vsel %vm410_vm1, %v10547_v30, 0.0  ;;  %6436 = vst.msk [vmem:[%s10157_s29 + $0x1d8] sm:$0xff] %vm410_vm1, %v10654_v22  ;;  %v10663_v61 = vpop.f32.mrb[28].mxu0  ;;  %v10665_v21 = vpop.f32.mrb[27].mxu1  ;;  %8260 = vmatmul.mubr.msk.f32.gmra.mrb[36].mxu1 %vm410_vm1, %v12940_v29 }
 0x1e1   : > { %v2845_v8 = vsel %vm410_vm1, %v10522_v59, 0.0  ;;  %v2945_v5 = vsel %vm410_vm1, %v2894_v43, 0.0  ;;  %v1628_v62 = vmul.f32 %v10547_v30, %v10547_v30  ;;  %v1680_v15 = vadd.f32 %v1679_v3, %v1678_v44  ;;  %1737 = vst.msk [vmem:[%s10157_s29 + $0xe8] sm:$0xff] %vm410_vm1, %v10663_v61  ;;  %6435 = vst.msk [vmem:[%s10157_s29 + $0x1d0] sm:$0xff] %vm410_vm1, %v10665_v21  ;;  %v10680_v24 = vpop.f32.mrb[29].mxu0  ;;  %8262 = vmatprep.mubr.msk.f32.mxu1 %vm410_vm1, %v12941_v42 }
 0x1e2   : > { %8063 = vmatmul.mubr.msk.f32.gmra.mrb[38].mxu0 %vm410_vm1, %v10143_v37  ;;  %v2947_v29 = vsel %vm410_vm1, %v2895_v26, 0.0  ;;  %v1581_v59 = vsel %vm410_vm1, %v10532_v10, 0.0  ;;  %v2946_v30 = vadd.f32 %v2945_v5, %v2944_v9  ;;  %v1580_v53 = vadd.f32 %v1579_v58, %v1578_v18  ;;  %1736 = vst.msk [vmem:[%s10157_s29 + $0xe0] sm:$0xff] %vm410_vm1, %v10680_v24 }
 0x1e3   : > { %8065 = vmatprep.mubr.msk.f32.mxu0 %vm410_vm1, %v10150_v7  ;;  %v1681_v52 = vsel %vm410_vm1, %v1628_v62, 0.0  ;;  %v2897_v37 = vmul.f32 %v10567_v31, %v10567_v31  ;;  %v2846_v42 = vadd.f32 %v2845_v8, %v2844_v14  ;;  %v2847_v4 = vsel %vm410_vm1, %v10577_v20, 0.0  ;;  %v10699_v10 = vpop.f32.mrb[28].mxu1 }
 0x1e4   : > { %v1683_v49 = vsel %vm410_vm1, %v1629_v34, 0.0  ;;  %v1682_v2 = vadd.f32 %v1681_v52, %v1680_v15  ;;  %v2896_v38 = vmul.f32 %v10577_v20, %v10577_v20  ;;  %v2948_v7 = vadd.f32 %v2947_v29, %v2946_v30  ;;  %6438 = vst.msk [vmem:[%s10157_s29 + $0x1e8] sm:$0xff] %vm410_vm1, %v10699_v10  ;;  %v10707_v63 = vpop.f32.mrb[30].mxu0  ;;  %v10709_v60 = vpop.f32.mrb[29].mxu1  ;;  %8263 = vmatmul.mubr.msk.f32.gmra.mrb[38].mxu1 %vm410_vm1, %v12942_v35 }
 0x1e5   : > { %v1631_v56 = vmul.f32 %v10575_v17, %v10575_v17  ;;  %v2848_v50 = vadd.f32 %v2847_v4, %v2846_v42  ;;  %v1582_v26 = vadd.f32 %v1581_v59, %v1580_v53  ;;  %v1583_v20 = vsel %vm410_vm1, %v10592_v55, 0.0  ;;  %1739 = vst.msk [vmem:[%s10157_s29 + $0xf8] sm:$0xff] %vm410_vm1, %v10707_v63  ;;  %6437 = vst.msk [vmem:[%s10157_s29 + $0x1e0] sm:$0xff] %vm410_vm1, %v10709_v60  ;;  %v10723_v13 = vpop.f32.mrb[31].mxu0  ;;  %v13007_v4 = vld [vmem:[#allocation4_spill] sm:$0xff] }
 0x1e6   : > { %8066 = vmatmul.mubr.msk.f32.gmra.mrb[40].mxu0 %vm410_vm1, %v10162_v6  ;;  %8265 = vmatprep.mubr.msk.f32.mxu1 %vm410_vm1, %v12943_v48  ;;  %v2849_v35 = vsel %vm410_vm1, %v10567_v31, 0.0  ;;  %v2949_v40 = vsel %vm410_vm1, %v2896_v38, 0.0  ;;  %v1630_v3 = vmul.f32 %v10592_v55, %v10592_v55  ;;  %v1684_v44 = vadd.f32 %v1683_v49, %v1682_v2  ;;  %1738 = vst.msk [vmem:[%s10157_s29 + $0xf0] sm:$0xff] %vm410_vm1, %v10723_v13  ;;  %v13008_v49 = vld [vmem:[#allocation16_spill] sm:$0xff] }
 0x1e7   : > { %8068 = vmatprep.mubr.msk.f32.mxu0 %vm410_vm1, %v10172_v23  ;;  %v2951_v6 = vsel %vm410_vm1, %v2897_v37, 0.0  ;;  %v1585_v48 = vsel %vm410_vm1, %v10575_v17, 0.0  ;;  %v2950_v43 = vadd.f32 %v2949_v40, %v2948_v7  ;;  %v1584_v31 = vadd.f32 %v1583_v20, %v1582_v26  ;;  %v10742_v9 = vpop.f32.mrb[30].mxu1  ;;  %v13009_v7 = vld [vmem:[#allocation5_spill] sm:$0xff] }
 0x1e8   : > { %v1685_v34 = vsel %vm410_vm1, %v1630_v3, 0.0  ;;  %v2899_v55 = vmul.f32 %v10610_v0, %v10610_v0  ;;  %v2850_v14 = vadd.f32 %v2849_v35, %v2848_v50  ;;  %v2851_v18 = vsel %vm410_vm1, %v10622_v11, 0.0  ;;  %6440 = vst.msk [vmem:[%s10157_s29 + $0x1f8] sm:$0xff] %vm410_vm1, %v10742_v9  ;;  %v10752_v23 = vpop.f32.mrb[31].mxu1  ;;  %8266 = vmatmul.mubr.msk.f32.gmra.mrb[40].mxu1 %vm410_vm1, %v12944_v41 }
 0x1e9   : > { %v1687_v17 = vsel %vm410_vm1, %v1631_v56, 0.0  ;;  %v1686_v58 = vadd.f32 %v1685_v34, %v1684_v44  ;;  %v2898_v8 = vmul.f32 %v10622_v11, %v10622_v11  ;;  %v2952_v5 = vadd.f32 %v2951_v6, %v2950_v43  ;;  %6439 = vst.msk [vmem:[%s10157_s29 + $0x1f0] sm:$0xff] %vm410_vm1, %v10752_v23  ;;  %8268 = vmatprep.mubr.msk.f32.mxu1 %vm410_vm1, %v12945_v54  ;;  %v13010_v44 = vld [vmem:[#allocation17_spill] sm:$0xff]  ;;  %v13011_v34 = vld [vmem:[#allocation6_spill] sm:$0xff] }
 0x1ea   : > { %8069 = vmatmul.mubr.msk.f32.gmra.mrb[42].mxu0 %vm410_vm1, %v10187_v12  ;;  %v2853_v62 = vsel %vm410_vm1, %v10610_v0, 0.0  ;;  %v2852_v41 = vadd.f32 %v2851_v18, %v2850_v14  ;;  %v1586_v15 = vadd.f32 %v1585_v48, %v1584_v31  ;;  %v1587_v29 = vsel %vm410_vm1, %v10635_v36, 0.0 }
 0x1eb   : > { %8071 = vmatprep.mubr.msk.f32.mxu0 %vm410_vm1, %v10199_v25  ;;  %v1633_v11 = vmul.f32 %v10620_v16, %v10620_v16  ;;  %v2953_v59 = vsel %vm410_vm1, %v2898_v8, 0.0  ;;  %v1632_v12 = vmul.f32 %v10635_v36, %v10635_v36  ;;  %v1688_v54 = vadd.f32 %v1687_v17, %v1686_v58  ;;  %v13013_v17 = vld [vmem:[#allocation7_spill] sm:$0xff] }
 0x1ec   : > { %v2955_v30 = vsel %vm410_vm1, %v2899_v55, 0.0  ;;  %v1589_v0 = vsel %vm410_vm1, %v10620_v16, 0.0  ;;  %v2954_v53 = vadd.f32 %v2953_v59, %v2952_v5  ;;  %v1588_v52 = vadd.f32 %v1587_v29, %v1586_v15  ;;  %8269 = vmatmul.mubr.msk.f32.gmra.mrb[42].mxu1 %vm410_vm1, %v12946_v47 }
 0x1ed   : > { %v1689_v25 = vsel %vm410_vm1, %v1632_v12, 0.0  ;;  %v2901_v37 = vmul.f32 %v10654_v22, %v10654_v22  ;;  %v2854_v42 = vadd.f32 %v2853_v62, %v2852_v41  ;;  %v2855_v36 = vsel %vm410_vm1, %v10665_v21, 0.0  ;;  %8271 = vmatprep.mubr.msk.f32.mxu1 %vm410_vm1, %v13008_v49  ;;  %v13016_v49 = vld [vmem:[#allocation21_spill] sm:$0xff] }
 0x1ee   : > { %8072 = vmatmul.mubr.msk.f32.gmra.mrb[44].mxu0 %vm410_vm1, %v13007_v4  ;;  %v1690_v16 = vadd.f32 %v1689_v25, %v1688_v54  ;;  %v1635_v2 = vmul.f32 %v10663_v61, %v10663_v61  ;;  %v2900_v47 = vmul.f32 %v10665_v21, %v10665_v21  ;;  %v2956_v38 = vadd.f32 %v2955_v30, %v2954_v53 }
 0x1ef   : > { %8074 = vmatprep.mubr.msk.f32.mxu0 %vm410_vm1, %v13009_v7  ;;  %v1691_v56 = vsel %vm410_vm1, %v1633_v11, 0.0  ;;  %v2856_v50 = vadd.f32 %v2855_v36, %v2854_v42  ;;  %v1590_v26 = vadd.f32 %v1589_v0, %v1588_v52  ;;  %v1591_v20 = vsel %vm410_vm1, %v10680_v24, 0.0  ;;  %v13014_v11 = vld [vmem:[#allocation19_spill] sm:$0xff] }
 0x1f0   : > { %v2857_v35 = vsel %vm410_vm1, %v10654_v22, 0.0  ;;  %v2957_v40 = vsel %vm410_vm1, %v2900_v47, 0.0  ;;  %v1634_v3 = vmul.f32 %v10680_v24, %v10680_v24  ;;  %v1692_v21 = vadd.f32 %v1691_v56, %v1690_v16  ;;  %8272 = vmatmul.mubr.msk.f32.gmra.mrb[44].mxu1 %vm410_vm1, %v13010_v44  ;;  %v13012_v22 = vld [vmem:[#allocation18_spill] sm:$0xff] }
 0x1f1   : > { %v2959_v6 = vsel %vm410_vm1, %v2901_v37, 0.0  ;;  %v1593_v48 = vsel %vm410_vm1, %v10663_v61, 0.0  ;;  %v2958_v43 = vadd.f32 %v2957_v40, %v2956_v38  ;;  %v1592_v31 = vadd.f32 %v1591_v20, %v1590_v26  ;;  %8274 = vmatprep.mubr.msk.f32.mxu1 %vm410_vm1, %v13012_v22  ;;  %v13018_v40 = vld [vmem:[#allocation23_spill] sm:$0xff] }
 0x1f2   : > { %8075 = vmatmul.mubr.msk.f32.gmra.mrb[46].mxu0 %vm410_vm1, %v13011_v34  ;;  %v1695_v55 = vsel %vm410_vm1, %v1635_v2, 0.0  ;;  %v1693_v24 = vsel %vm410_vm1, %v1634_v3, 0.0  ;;  %v2858_v14 = vadd.f32 %v2857_v35, %v2856_v50  ;;  %v2859_v18 = vsel %vm410_vm1, %v10709_v60, 0.0  ;;  %v13020_v34 = vld [vmem:[#allocation25_spill] sm:$0xff] }
 0x1f3   : > { %8077 = vmatprep.mubr.msk.f32.mxu0 %vm410_vm1, %v13013_v17  ;;  %v1694_v61 = vadd.f32 %v1693_v24, %v1692_v21  ;;  %v2903_v58 = vmul.f32 %v10699_v10, %v10699_v10  ;;  %v2902_v8 = vmul.f32 %v10709_v60, %v10709_v60  ;;  %v2960_v5 = vadd.f32 %v2959_v6, %v2958_v43 }
 0x1f4   : > { %v2861_v62 = vsel %vm410_vm1, %v10699_v10, 0.0  ;;  %v2860_v41 = vadd.f32 %v2859_v18, %v2858_v14  ;;  %v1594_v15 = vadd.f32 %v1593_v48, %v1592_v31  ;;  %v1595_v29 = vsel %vm410_vm1, %v10723_v13, 0.0  ;;  %8275 = vmatmul.mubr.msk.f32.gmra.mrb[46].mxu1 %vm410_vm1, %v13014_v11  ;;  %v13015_v10 = vld [vmem:[#allocation20_spill] sm:$0xff]  ;;  %v13026_v11 = vld [vmem:[#allocation31_spill] sm:$0xff] }
 0x1f5   : > { %v1637_v59 = vmul.f32 %v10707_v63, %v10707_v63  ;;  %v2961_v12 = vsel %vm410_vm1, %v2902_v8, 0.0  ;;  %v1636_v60 = vmul.f32 %v10723_v13, %v10723_v13  ;;  %v1696_v54 = vadd.f32 %v1695_v55, %v1694_v61  ;;  %8277 = vmatprep.mubr.msk.f32.mxu1 %vm410_vm1, %v13015_v10  ;;  %v13022_v18 = vld [vmem:[#allocation8_spill] sm:$0xff]  ;;  %v13023_v61 = vld [vmem:[#allocation29_spill] sm:$0xff]  ;;  %v13029_v10 = vld [vmem:[#allocation2_spill] sm:$0xff] }
 0x1f6   : > { %8078 = vmatmul.mubr.msk.f32.gmra.mrb[48].mxu0 %vm410_vm1, %v10270_v32  ;;  %v1597_v30 = vsel %vm410_vm1, %v10707_v63, 0.0  ;;  %v2962_v0 = vadd.f32 %v2961_v12, %v2960_v5  ;;  %v1596_v53 = vadd.f32 %v1595_v29, %v1594_v15  ;;  %v2862_v52 = vadd.f32 %v2861_v62, %v2860_v41  ;;  %v13025_v41 = vld [vmem:[#allocation9_spill] sm:$0xff] }
 0x1f7   : > { %8080 = vmatprep.mubr.msk.f32.mxu0 %vm410_vm1, %v10283_v28  ;;  %v2963_v25 = vsel %vm410_vm1, %v2903_v58, 0.0  ;;  %v1697_v13 = vsel %vm410_vm1, %v1636_v60, 0.0  ;;  %v2863_v37 = vsel %vm410_vm1, %v10752_v23, 0.0  ;;  %v2904_v32 = vmul.f32 %v10752_v23, %v10752_v23  ;;  %v13017_v23 = vld [vmem:[#allocation22_spill] sm:$0xff] }
 0x1f8   : > { %v1598_v42 = vadd.f32 %v1597_v30, %v1596_v53  ;;  %v1698_v36 = vadd.f32 %v1697_v13, %v1696_v54  ;;  %v2905_v63 = vmul.f32 %v10742_v9, %v10742_v9  ;;  %v2864_v4 = vadd.f32 %v2863_v37, %v2862_v52  ;;  %8278 = vmatmul.mubr.msk.f32.gmra.mrb[48].mxu1 %vm410_vm1, %v13016_v49  ;;  %v13028_v54 = vld [vmem:[#allocation34_spill] sm:$0xff] }
 0x1f9   : > { %v1699_v28 = vsel %vm410_vm1, %v1637_v59, 0.0  ;;  %v2865_v16 = vsel %vm410_vm1, %v10742_v9, 0.0  ;;  %v2964_v2 = vadd.f32 %v2963_v25, %v2962_v0  ;;  %v2965_v47 = vsel %vm410_vm1, %v2904_v32, 0.0  ;;  %8280 = vmatprep.mubr.msk.f32.mxu1 %vm410_vm1, %v13017_v23 }
 0x1fa   : > { %8081 = vmatmul.mubr.msk.f32.gmra.mrb[50].mxu0 %vm410_vm1, %v10299_v51  ;;  %v1599_v38 = vrot.slane %v1598_v42, 4  ;;  %v1700_v7 = vadd.f32 %v1699_v28, %v1698_v36  ;;  %v2866_v56 = vadd.f32 %v2865_v16, %v2864_v4  ;;  %v2967_v9 = vsel %vm410_vm1, %v2905_v63, 0.0  ;;  %v13019_v51 = vld [vmem:[#allocation24_spill] sm:$0xff] }
 0x1fb   : > { %8083 = vmatprep.mubr.msk.f32.mxu0 %vm410_vm1, %v10311_v27  ;;  %v2966_v50 = vadd.f32 %v2965_v47, %v2964_v2 }
 0x1fc   : > { %v1600_v26 = vadd.f32 %v1599_v38, %v1598_v42  ;;  %v1701_v20 = vrot.slane %v1700_v7, 4  ;;  %v2867_v35 = vrot.slane %v2866_v56, 4  ;;  %8281 = vmatmul.mubr.msk.f32.gmra.mrb[50].mxu1 %vm410_vm1, %v13018_v40 }
 0x1fd   : > { %v2968_v3 = vadd.f32 %v2967_v9, %v2966_v50  ;;  %8283 = vmatprep.mubr.msk.f32.mxu1 %vm410_vm1, %v13019_v51 }
 0x1fe   : > { %8084 = vmatmul.mubr.msk.f32.gmra.mrb[52].mxu0 %vm410_vm1, %v10330_v33  ;;  %v1601_v21 = vrot.slane %v1600_v26, 2  ;;  %v1702_v44 = vadd.f32 %v1701_v20, %v1700_v7  ;;  %v2868_v6 = vadd.f32 %v2867_v35, %v2866_v56  ;;  %v13021_v33 = vld [vmem:[#allocation26_spill] sm:$0xff] }
 0x1ff   : > { %8086 = vmatprep.mubr.msk.f32.mxu0 %vm410_vm1, %v10343_v45  ;;  %v2969_v27 = vrot.slane %v2968_v3, 4 }
 0x200   : > { %v1602_v48 = vadd.f32 %v1601_v21, %v1600_v26  ;;  %v1703_v43 = vrot.slane %v1702_v44, 2  ;;  %v2869_v31 = vrot.slane %v2868_v6, 2  ;;  %8284 = vmatmul.mubr.msk.f32.gmra.mrb[52].mxu1 %vm410_vm1, %v13020_v34 }
 0x201   : > { %v2970_v22 = vadd.f32 %v2969_v27, %v2968_v3  ;;  %8286 = vmatprep.mubr.msk.f32.mxu1 %vm410_vm1, %v13021_v33 }
 0x202   : > { %8087 = vmatmul.mubr.msk.f32.gmra.mrb[54].mxu0 %vm410_vm1, %v10364_v1  ;;  %v1603_v55 = vrot.slane %v1602_v48, 1  ;;  %v1704_v24 = vadd.f32 %v1703_v43, %v1702_v44  ;;  %v2870_v14 = vadd.f32 %v2869_v31, %v2868_v6  ;;  %v13024_v1 = vld [vmem:[#allocation30_spill] sm:$0xff] }
 0x203   : > { %8089 = vmatprep.mubr.msk.f32.mxu0 %vm410_vm1, %v13022_v18  ;;  %v2971_v45 = vrot.slane %v2970_v22, 2 }
 0x204   : > { %v2871_v17 = vrot.slane %v2870_v14, 1  ;;  %8287 = vmatmul.mubr.msk.f32.gmra.mrb[54].mxu1 %vm410_vm1, %v13023_v61  ;;  %v1705_v58 = vrot.slane %v1704_v24, 1  ;;  %v1604_v5 = vadd.f32 %v1603_v55, %v1602_v48 }
 0x205   : > { %v2972_v8 = vadd.f32 %v2971_v45, %v2970_v22  ;;  %8289 = vmatprep.mubr.msk.f32.mxu1 %vm410_vm1, %v13024_v1 }
 0x206   : > { %8090 = vmatmul.mubr.msk.f32.gmra.mrb[56].mxu0 %vm410_vm1, %v10400_v46  ;;  %v2872_v62 = vadd.f32 %v2871_v17, %v2870_v14  ;;  %v1706_v59 = vadd.f32 %v1705_v58, %v1704_v24  ;;  %v13027_v46 = vld [vmem:[#allocation32_spill] sm:$0xff] }
 0x207   : > { %8092 = vmatprep.mubr.msk.f32.mxu0 %vm410_vm1, %v13025_v41  ;;  %v2973_v15 = vrot.slane %v2972_v8, 1 }
 0x208   : > { %v10888_v29 = vadd.f32 %v2872_v62, %v1604_v5  ;;  %8290 = vmatmul.mubr.msk.f32.gmra.mrb[56].mxu1 %vm410_vm1, %v13026_v11 }
 0x209   : > { %v2974_v12 = vadd.f32 %v2973_v15, %v2972_v8  ;;  %8292 = vmatprep.mubr.msk.f32.mxu1 %vm410_vm1, %v13027_v46 }
 0x20a   : > { %8093 = vmatmul.mubr.msk.f32.gmra.mrb[58].mxu0 %vm410_vm1, %v10444_v19  ;;  %v13030_v19 = vld [vmem:[#allocation3_spill] sm:$0xff] }
 0x20b   : > { %8095 = vmatprep.mubr.msk.f32.mxu0 %vm410_vm1, %v10505_v39  ;;  %v10898_v60 = vadd.f32 %v2974_v12, %v1706_v59 }
 0x20c   : > { %8293 = vmatmul.mubr.msk.f32.gmra.mrb[58].mxu1 %vm410_vm1, %v13028_v54 }
 0x20d   : > { %8295 = vmatprep.mubr.msk.f32.mxu1 %vm410_vm1, %v13029_v10 }
 0x20e   : > { %8096 = vmatmul.mubr.msk.f32.gmra.mrb[60].mxu0 %vm410_vm1, %v10486_v57 }
 0x20f   : > { %8098 = vmatprep.mubr.msk.f32.mxu0 %vm410_vm1, %v10505_v39 }
 0x210   : > { %8296 = vmatmul.mubr.msk.f32.gmra.mrb[60].mxu1 %vm410_vm1, %v13030_v19 }
 0x211   : > { %8298 = vmatprep.mubr.msk.f32.mxu1 %vm410_vm1, %v13029_v10 }
 0x212   : > { %8099 = vmatmul.mubr.msk.f32.gmra.mrb[62].mxu0 %vm410_vm1, %v10486_v57 }
 0x214   : > { %8299 = vmatmul.mubr.msk.f32.gmra.mrb[62].mxu1 %vm410_vm1, %v13030_v19 }
 0x2a9   : > { %v8055_v30 = vpop.f32.mrb[32].mxu0 }
 0x2aa   : > { %v3994_v0 = vsel %vm410_vm1, %v8055_v30, 0.0  ;;  %v4064_v53 = vmul.f32 %v8055_v30, %v8055_v30  ;;  %6578 = vst.msk [vmem:[%s10157_s29 + $0x208] sm:$0xff] %vm410_vm1, %v8055_v30  ;;  %v3802_v39 = vpop.f32.mrb[33].mxu0 }
 0x2ab   : > { %v3993_v52 = vsel %vm410_vm1, %v3802_v39, 0.0  ;;  %v4063_v25 = vmul.f32 %v3802_v39, %v3802_v39  ;;  %6577 = vst.msk [vmem:[%s10157_s29 + $0x200] sm:$0xff] %vm410_vm1, %v3802_v39  ;;  %v8255_v37 = vpop.f32.mrb[32].mxu1 }
 0x2ac   : > { %v4096_v57 = vsel %vm410_vm1, %v4064_v53, 0.0  ;;  %v3995_v13 = vadd.f32 %v3994_v0, %v3993_v52  ;;  %v5183_v42 = vsel %vm410_vm1, %v8255_v37, 0.0  ;;  %v5253_v36 = vmul.f32 %v8255_v37, %v8255_v37  ;;  %6746 = vst.msk [vmem:[%s10157_s29 + $0x308] sm:$0xff] %vm410_vm1, %v8255_v37  ;;  %v4991_v4 = vpop.f32.mrb[33].mxu1 }
 0x2ad   : > { %v4095_v32 = vsel %vm410_vm1, %v4063_v25, 0.0  ;;  %v8058_v63 = vpop.f32.mrb[34].mxu0  ;;  %v5182_v16 = vsel %vm410_vm1, %v4991_v4, 0.0  ;;  %6745 = vst.msk [vmem:[%s10157_s29 + $0x300] sm:$0xff] %vm410_vm1, %v4991_v4  ;;  %v5252_v38 = vmul.f32 %v4991_v4, %v4991_v4 }
 0x2ae   : > { %v4097_v49 = vadd.f32 %v4096_v57, %v4095_v32  ;;  %v4066_v28 = vmul.f32 %v8058_v63, %v8058_v63  ;;  %6580 = vst.msk [vmem:[%s10157_s29 + $0x218] sm:$0xff] %vm410_vm1, %v8058_v63  ;;  %v3812_v2 = vpop.f32.mrb[35].mxu0  ;;  %v5285_v47 = vsel %vm410_vm1, %v5253_v36, 0.0  ;;  %v5184_v23 = vadd.f32 %v5183_v42, %v5182_v16 }
 0x2af   : > { %v3996_v7 = vsel %vm410_vm1, %v3812_v2, 0.0  ;;  %6579 = vst.msk [vmem:[%s10157_s29 + $0x210] sm:$0xff] %vm410_vm1, %v3812_v2  ;;  %v4065_v50 = vmul.f32 %v3812_v2, %v3812_v2  ;;  %v8258_v26 = vpop.f32.mrb[34].mxu1  ;;  %v5284_v20 = vsel %vm410_vm1, %v5252_v38, 0.0  ;;  %v3998_v40 = vsel %vm410_vm1, %v8058_v63, 0.0 }
 0x2b0   : > { %v3997_v56 = vadd.f32 %v3996_v7, %v3995_v13  ;;  %6748 = vst.msk [vmem:[%s10157_s29 + $0x318] sm:$0xff] %vm410_vm1, %v8258_v26  ;;  %v5001_v35 = vpop.f32.mrb[35].mxu1  ;;  %v5286_v3 = vadd.f32 %v5285_v47, %v5284_v20  ;;  %v5255_v21 = vmul.f32 %v8258_v26, %v8258_v26  ;;  %v4100_v6 = vsel %vm410_vm1, %v4066_v28, 0.0 }
 0x2b1   : > { %v8061_v9 = vpop.f32.mrb[36].mxu0  ;;  %v4098_v51 = vsel %vm410_vm1, %v4065_v50, 0.0  ;;  %6747 = vst.msk [vmem:[%s10157_s29 + $0x310] sm:$0xff] %vm410_vm1, %v5001_v35  ;;  %v5185_v48 = vsel %vm410_vm1, %v5001_v35, 0.0  ;;  %v5254_v43 = vmul.f32 %v5001_v35, %v5001_v35  ;;  %v5187_v24 = vsel %vm410_vm1, %v8258_v26, 0.0 }
 0x2b2   : > { %6582 = vst.msk [vmem:[%s10157_s29 + $0x228] sm:$0xff] %vm410_vm1, %v8061_v9  ;;  %v3822_v44 = vpop.f32.mrb[37].mxu0  ;;  %v4099_v27 = vadd.f32 %v4098_v51, %v4097_v49  ;;  %v4068_v31 = vmul.f32 %v8061_v9, %v8061_v9  ;;  %v5186_v34 = vadd.f32 %v5185_v48, %v5184_v23  ;;  %v3999_v22 = vadd.f32 %v3998_v40, %v3997_v56 }
 0x2b3   : > { %6581 = vst.msk [vmem:[%s10157_s29 + $0x220] sm:$0xff] %vm410_vm1, %v3822_v44  ;;  %v4000_v33 = vsel %vm410_vm1, %v3822_v44, 0.0  ;;  %v8261_v55 = vpop.f32.mrb[36].mxu1  ;;  %v5287_v14 = vsel %vm410_vm1, %v5254_v43, 0.0  ;;  %v4067_v18 = vmul.f32 %v3822_v44, %v3822_v44  ;;  %v5289_v58 = vsel %vm410_vm1, %v5255_v21, 0.0 }
 0x2b4   : > { %v4101_v45 = vadd.f32 %v4100_v6, %v4099_v27  ;;  %6750 = vst.msk [vmem:[%s10157_s29 + $0x328] sm:$0xff] %vm410_vm1, %v8261_v55  ;;  %v5011_v61 = vpop.f32.mrb[37].mxu1  ;;  %v4002_v8 = vsel %vm410_vm1, %v8061_v9, 0.0  ;;  %v5288_v1 = vadd.f32 %v5287_v14, %v5286_v3  ;;  %v4001_v5 = vadd.f32 %v4000_v33, %v3999_v22 }
 0x2b5   : > { %v8064_v17 = vpop.f32.mrb[38].mxu0  ;;  %6749 = vst.msk [vmem:[%s10157_s29 + $0x320] sm:$0xff] %vm410_vm1, %v5011_v61  ;;  %v4102_v41 = vsel %vm410_vm1, %v4067_v18, 0.0  ;;  %v5257_v15 = vmul.f32 %v8261_v55, %v8261_v55  ;;  %v5188_v11 = vadd.f32 %v5187_v24, %v5186_v34  ;;  %v5189_v59 = vsel %vm410_vm1, %v5011_v61, 0.0 }
 0x2b6   : > { %6584 = vst.msk [vmem:[%s10157_s29 + $0x238] sm:$0xff] %vm410_vm1, %v8064_v17  ;;  %v3832_v62 = vpop.f32.mrb[39].mxu0  ;;  %v4104_v12 = vsel %vm410_vm1, %v4068_v31, 0.0  ;;  %v4103_v46 = vadd.f32 %v4102_v41, %v4101_v45  ;;  %v5256_v54 = vmul.f32 %v5011_v61, %v5011_v61  ;;  %v5290_v10 = vadd.f32 %v5289_v58, %v5288_v1 }
 0x2b7   : > { %6583 = vst.msk [vmem:[%s10157_s29 + $0x230] sm:$0xff] %vm410_vm1, %v3832_v62  ;;  %v8264_v19 = vpop.f32.mrb[38].mxu1  ;;  %v4070_v30 = vmul.f32 %v8064_v17, %v8064_v17  ;;  %v5190_v0 = vadd.f32 %v5189_v59, %v5188_v11  ;;  %v4003_v53 = vadd.f32 %v4002_v8, %v4001_v5  ;;  %v4004_v39 = vsel %vm410_vm1, %v3832_v62, 0.0 }
 0x2b8   : > { %6752 = vst.msk [vmem:[%s10157_s29 + $0x338] sm:$0xff] %vm410_vm1, %v8264_v19  ;;  %v5021_v25 = vpop.f32.mrb[39].mxu1  ;;  %v5191_v57 = vsel %vm410_vm1, %v8261_v55, 0.0  ;;  %v5291_v13 = vsel %vm410_vm1, %v5256_v54, 0.0  ;;  %v4069_v37 = vmul.f32 %v3832_v62, %v3832_v62  ;;  %v4105_v32 = vadd.f32 %v4104_v12, %v4103_v46 }
 0x2b9   : > { %v8067_v52 = vpop.f32.mrb[40].mxu0  ;;  %6751 = vst.msk [vmem:[%s10157_s29 + $0x330] sm:$0xff] %vm410_vm1, %v5021_v25  ;;  %v5293_v36 = vsel %vm410_vm1, %v5257_v15, 0.0  ;;  %v4006_v63 = vsel %vm410_vm1, %v8064_v17, 0.0  ;;  %v5292_v4 = vadd.f32 %v5291_v13, %v5290_v10  ;;  %v4005_v49 = vadd.f32 %v4004_v39, %v4003_v53 }
 0x2ba   : > { %6586 = vst.msk [vmem:[%s10157_s29 + $0x248] sm:$0xff] %vm410_vm1, %v8067_v52  ;;  %v3842_v42 = vpop.f32.mrb[41].mxu0  ;;  %v4106_v28 = vsel %vm410_vm1, %v4069_v37, 0.0  ;;  %v5259_v16 = vmul.f32 %v8264_v19, %v8264_v19  ;;  %v5192_v2 = vadd.f32 %v5191_v57, %v5190_v0  ;;  %v5193_v47 = vsel %vm410_vm1, %v5021_v25, 0.0 }
 0x2bb   : > { %6585 = vst.msk [vmem:[%s10157_s29 + $0x240] sm:$0xff] %vm410_vm1, %v3842_v42  ;;  %v8267_v23 = vpop.f32.mrb[40].mxu1  ;;  %v4108_v38 = vsel %vm410_vm1, %v4070_v30, 0.0  ;;  %v4107_v7 = vadd.f32 %v4106_v28, %v4105_v32  ;;  %v5258_v56 = vmul.f32 %v5021_v25, %v5021_v25  ;;  %v5294_v50 = vadd.f32 %v5293_v36, %v5292_v4 }
 0x2bc   : > { %6754 = vst.msk [vmem:[%s10157_s29 + $0x348] sm:$0xff] %vm410_vm1, %v8267_v23  ;;  %v5031_v20 = vpop.f32.mrb[41].mxu1  ;;  %v4072_v9 = vmul.f32 %v8067_v52, %v8067_v52  ;;  %v5194_v35 = vadd.f32 %v5193_v47, %v5192_v2  ;;  %v4007_v40 = vadd.f32 %v4006_v63, %v4005_v49  ;;  %v4008_v3 = vsel %vm410_vm1, %v3842_v42, 0.0 }
 0x2bd   : > { %v8070_v26 = vpop.f32.mrb[42].mxu0  ;;  %6753 = vst.msk [vmem:[%s10157_s29 + $0x340] sm:$0xff] %vm410_vm1, %v5031_v20  ;;  %v5195_v21 = vsel %vm410_vm1, %v8264_v19, 0.0  ;;  %v5295_v44 = vsel %vm410_vm1, %v5258_v56, 0.0  ;;  %v4071_v6 = vmul.f32 %v3842_v42, %v3842_v42  ;;  %v4109_v27 = vadd.f32 %v4108_v38, %v4107_v7 }
 0x2be   : > { %6588 = vst.msk [vmem:[%s10157_s29 + $0x258] sm:$0xff] %vm410_vm1, %v8070_v26  ;;  %v3852_v51 = vpop.f32.mrb[43].mxu0  ;;  %v5297_v48 = vsel %vm410_vm1, %v5259_v16, 0.0  ;;  %v4010_v43 = vsel %vm410_vm1, %v8067_v52, 0.0  ;;  %v5296_v31 = vadd.f32 %v5295_v44, %v5294_v50  ;;  %v4009_v34 = vadd.f32 %v4008_v3, %v4007_v40 }
 0x2bf   : > { %6587 = vst.msk [vmem:[%s10157_s29 + $0x250] sm:$0xff] %vm410_vm1, %v3852_v51  ;;  %v8270_v22 = vpop.f32.mrb[42].mxu1  ;;  %v4110_v33 = vsel %vm410_vm1, %v4071_v6, 0.0  ;;  %v5261_v55 = vmul.f32 %v8267_v23, %v8267_v23  ;;  %v5196_v24 = vadd.f32 %v5195_v21, %v5194_v35  ;;  %v5197_v14 = vsel %vm410_vm1, %v5031_v20, 0.0 }
 0x2c0   : > { %6756 = vst.msk [vmem:[%s10157_s29 + $0x358] sm:$0xff] %vm410_vm1, %v8270_v22  ;;  %v5041_v45 = vpop.f32.mrb[43].mxu1  ;;  %v4112_v17 = vsel %vm410_vm1, %v4072_v9, 0.0  ;;  %v4111_v61 = vadd.f32 %v4110_v33, %v4109_v27  ;;  %v5260_v58 = vmul.f32 %v5031_v20, %v5031_v20  ;;  %v5298_v8 = vadd.f32 %v5297_v48, %v5296_v31 }
 0x2c1   : > { %v8073_v18 = vpop.f32.mrb[44].mxu0  ;;  %6755 = vst.msk [vmem:[%s10157_s29 + $0x350] sm:$0xff] %vm410_vm1, %v5041_v45  ;;  %v4074_v5 = vmul.f32 %v8070_v26, %v8070_v26  ;;  %v5198_v62 = vadd.f32 %v5197_v14, %v5196_v24  ;;  %v4011_v41 = vadd.f32 %v4010_v43, %v4009_v34  ;;  %v4012_v15 = vsel %vm410_vm1, %v3852_v51, 0.0 }
 0x2c2   : > { %6590 = vst.msk [vmem:[%s10157_s29 + $0x268] sm:$0xff] %vm410_vm1, %v8073_v18  ;;  %v3862_v1 = vpop.f32.mrb[45].mxu0  ;;  %v5199_v11 = vsel %vm410_vm1, %v8267_v23, 0.0  ;;  %v5299_v59 = vsel %vm410_vm1, %v5260_v58, 0.0  ;;  %v4073_v12 = vmul.f32 %v3852_v51, %v3852_v51  ;;  %v4113_v46 = vadd.f32 %v4112_v17, %v4111_v61 }
 0x2c3   : > { %6589 = vst.msk [vmem:[%s10157_s29 + $0x260] sm:$0xff] %vm410_vm1, %v3862_v1  ;;  %v8273_v54 = vpop.f32.mrb[44].mxu1  ;;  %v5301_v10 = vsel %vm410_vm1, %v5261_v55, 0.0  ;;  %v4014_v19 = vsel %vm410_vm1, %v8070_v26, 0.0  ;;  %v5300_v30 = vadd.f32 %v5299_v59, %v5298_v8  ;;  %v4013_v0 = vadd.f32 %v4012_v15, %v4011_v41 }
 0x2c4   : > { %6758 = vst.msk [vmem:[%s10157_s29 + $0x368] sm:$0xff] %vm410_vm1, %v8273_v54  ;;  %v5051_v39 = vpop.f32.mrb[45].mxu1  ;;  %v4114_v52 = vsel %vm410_vm1, %v4073_v12, 0.0  ;;  %v5263_v25 = vmul.f32 %v8270_v22, %v8270_v22  ;;  %v5200_v57 = vadd.f32 %v5199_v11, %v5198_v62  ;;  %v5201_v13 = vsel %vm410_vm1, %v5041_v45, 0.0 }
 0x2c5   : > { %v8076_v53 = vpop.f32.mrb[46].mxu0  ;;  %6757 = vst.msk [vmem:[%s10157_s29 + $0x360] sm:$0xff] %vm410_vm1, %v5051_v39  ;;  %v4116_v32 = vsel %vm410_vm1, %v4074_v5, 0.0  ;;  %v4115_v42 = vadd.f32 %v4114_v52, %v4113_v46  ;;  %v5262_v36 = vmul.f32 %v5041_v45, %v5041_v45  ;;  %v5302_v63 = vadd.f32 %v5301_v10, %v5300_v30 }
 0x2c6   : > { %6592 = vst.msk [vmem:[%s10157_s29 + $0x278] sm:$0xff] %vm410_vm1, %v8076_v53  ;;  %v3872_v37 = vpop.f32.mrb[47].mxu0  ;;  %v4076_v4 = vmul.f32 %v8073_v18, %v8073_v18  ;;  %v5202_v49 = vadd.f32 %v5201_v13, %v5200_v57  ;;  %v4015_v28 = vadd.f32 %v4014_v19, %v4013_v0  ;;  %v4016_v16 = vsel %vm410_vm1, %v3862_v1, 0.0 }
 0x2c7   : > { %6591 = vst.msk [vmem:[%s10157_s29 + $0x270] sm:$0xff] %vm410_vm1, %v3872_v37  ;;  %v11022_v2 = vpop.f32.mrb[46].mxu1  ;;  %v5203_v47 = vsel %vm410_vm1, %v8270_v22, 0.0  ;;  %v5303_v23 = vsel %vm410_vm1, %v5262_v36, 0.0  ;;  %v4075_v38 = vmul.f32 %v3862_v1, %v3862_v1  ;;  %v4117_v7 = vadd.f32 %v4116_v32, %v4115_v42 }
 0x2c8   : > { %6760 = vst.msk [vmem:[%s10157_s29 + $0x378] sm:$0xff] %vm410_vm1, %v11022_v2  ;;  %v5061_v50 = vpop.f32.mrb[47].mxu1  ;;  %v5305_v26 = vsel %vm410_vm1, %v5263_v25, 0.0  ;;  %v4018_v20 = vsel %vm410_vm1, %v8073_v18, 0.0  ;;  %v5304_v9 = vadd.f32 %v5303_v23, %v5302_v63  ;;  %v4017_v35 = vadd.f32 %v4016_v16, %v4015_v28 }
 0x2c9   : > { %v11029_v56 = vpop.f32.mrb[48].mxu0  ;;  %6759 = vst.msk [vmem:[%s10157_s29 + $0x370] sm:$0xff] %vm410_vm1, %v5061_v50  ;;  %v4118_v3 = vsel %vm410_vm1, %v4075_v38, 0.0  ;;  %v5265_v51 = vmul.f32 %v8273_v54, %v8273_v54  ;;  %v5204_v21 = vadd.f32 %v5203_v47, %v5202_v49  ;;  %v5205_v44 = vsel %vm410_vm1, %v5051_v39, 0.0 }
 0x2ca   : > { %6594 = vst.msk [vmem:[%s10157_s29 + $0x288] sm:$0xff] %vm410_vm1, %v11029_v56  ;;  %v3882_v40 = vpop.f32.mrb[49].mxu0  ;;  %v4120_v6 = vsel %vm410_vm1, %v4076_v4, 0.0  ;;  %v4119_v27 = vadd.f32 %v4118_v3, %v4117_v7  ;;  %v5264_v48 = vmul.f32 %v5051_v39, %v5051_v39  ;;  %v5306_v43 = vadd.f32 %v5305_v26, %v5304_v9 }
 0x2cb   : > { %6593 = vst.msk [vmem:[%s10157_s29 + $0x280] sm:$0xff] %vm410_vm1, %v3882_v40  ;;  %v11043_v31 = vpop.f32.mrb[48].mxu1  ;;  %v4078_v34 = vmul.f32 %v8076_v53, %v8076_v53  ;;  %v5206_v22 = vadd.f32 %v5205_v44, %v5204_v21  ;;  %v4019_v33 = vadd.f32 %v4018_v20, %v4017_v35  ;;  %v4020_v55 = vsel %vm410_vm1, %v3872_v37, 0.0 }
 0x2cc   : > { %6762 = vst.msk [vmem:[%s10157_s29 + $0x388] sm:$0xff] %vm410_vm1, %v11043_v31  ;;  %v5071_v14 = vpop.f32.mrb[49].mxu1  ;;  %v5207_v18 = vsel %vm410_vm1, %v8273_v54, 0.0  ;;  %v5307_v45 = vsel %vm410_vm1, %v5264_v48, 0.0  ;;  %v4077_v17 = vmul.f32 %v3872_v37, %v3872_v37  ;;  %v4121_v61 = vadd.f32 %v4120_v6, %v4119_v27 }
 0x2cd   : > { %v11049_v24 = vpop.f32.mrb[50].mxu0  ;;  %6761 = vst.msk [vmem:[%s10157_s29 + $0x380] sm:$0xff] %vm410_vm1, %v5071_v14  ;;  %v5309_v8 = vsel %vm410_vm1, %v5265_v51, 0.0  ;;  %v4022_v1 = vsel %vm410_vm1, %v8076_v53, 0.0  ;;  %v5308_v5 = vadd.f32 %v5307_v45, %v5306_v43  ;;  %v4021_v62 = vadd.f32 %v4020_v55, %v4019_v33 }
 0x2ce   : > { %6596 = vst.msk [vmem:[%s10157_s29 + $0x298] sm:$0xff] %vm410_vm1, %v11049_v24  ;;  %v3892_v58 = vpop.f32.mrb[51].mxu0  ;;  %v4122_v41 = vsel %vm410_vm1, %v4077_v17, 0.0  ;;  %v5267_v15 = vmul.f32 %v11022_v2, %v11022_v2  ;;  %v5208_v11 = vadd.f32 %v5207_v18, %v5206_v22  ;;  %v5209_v59 = vsel %vm410_vm1, %v5061_v50, 0.0 }
 0x2cf   : > { %6595 = vst.msk [vmem:[%s10157_s29 + $0x290] sm:$0xff] %vm410_vm1, %v3892_v58  ;;  %v11066_v12 = vpop.f32.mrb[50].mxu1  ;;  %v4124_v46 = vsel %vm410_vm1, %v4078_v34, 0.0  ;;  %v4123_v54 = vadd.f32 %v4122_v41, %v4121_v61  ;;  %v5266_v10 = vmul.f32 %v5061_v50, %v5061_v50  ;;  %v5310_v19 = vadd.f32 %v5309_v8, %v5308_v5 }
 0x2d0   : > { %6764 = vst.msk [vmem:[%s10157_s29 + $0x398] sm:$0xff] %vm410_vm1, %v11066_v12  ;;  %v5081_v0 = vpop.f32.mrb[51].mxu1  ;;  %v4080_v53 = vmul.f32 %v11029_v56, %v11029_v56  ;;  %v5210_v39 = vadd.f32 %v5209_v59, %v5208_v11  ;;  %v4023_v52 = vadd.f32 %v4022_v1, %v4021_v62  ;;  %v4024_v25 = vsel %vm410_vm1, %v3882_v40, 0.0 }
 0x2d1   : > { %v11072_v30 = vpop.f32.mrb[52].mxu0  ;;  %6763 = vst.msk [vmem:[%s10157_s29 + $0x390] sm:$0xff] %vm410_vm1, %v5081_v0  ;;  %v5211_v13 = vsel %vm410_vm1, %v11022_v2, 0.0  ;;  %v5311_v37 = vsel %vm410_vm1, %v5266_v10, 0.0  ;;  %v4079_v32 = vmul.f32 %v3882_v40, %v3882_v40  ;;  %v4125_v42 = vadd.f32 %v4124_v46, %v4123_v54 }
 0x2d2   : > { %6598 = vst.msk [vmem:[%s10157_s29 + $0x2a8] sm:$0xff] %vm410_vm1, %v11072_v30  ;;  %v3902_v57 = vpop.f32.mrb[53].mxu0  ;;  %v5313_v36 = vsel %vm410_vm1, %v5267_v15, 0.0  ;;  %v4026_v63 = vsel %vm410_vm1, %v11029_v56, 0.0  ;;  %v5312_v4 = vadd.f32 %v5311_v37, %v5310_v19  ;;  %v4025_v49 = vadd.f32 %v4024_v25, %v4023_v52 }
 0x2d3   : > { %6597 = vst.msk [vmem:[%s10157_s29 + $0x2a0] sm:$0xff] %vm410_vm1, %v3902_v57  ;;  %v11090_v28 = vpop.f32.mrb[52].mxu1  ;;  %v4126_v16 = vsel %vm410_vm1, %v4079_v32, 0.0  ;;  %v5269_v2 = vmul.f32 %v11043_v31, %v11043_v31  ;;  %v5212_v47 = vadd.f32 %v5211_v13, %v5210_v39  ;;  %v5213_v23 = vsel %vm410_vm1, %v5071_v14, 0.0 }
 0x2d4   : > { %6766 = vst.msk [vmem:[%s10157_s29 + $0x3a8] sm:$0xff] %vm410_vm1, %v11090_v28  ;;  %v11101_v7 = vpop.f32.mrb[53].mxu1  ;;  %v4128_v56 = vsel %vm410_vm1, %v4080_v53, 0.0  ;;  %v4127_v50 = vadd.f32 %v4126_v16, %v4125_v42  ;;  %v5268_v26 = vmul.f32 %v5071_v14, %v5071_v14  ;;  %v5314_v20 = vadd.f32 %v5313_v36, %v5312_v4 }
 0x2d5   : > { %v11099_v38 = vpop.f32.mrb[54].mxu0  ;;  %6765 = vst.msk [vmem:[%s10157_s29 + $0x3a0] sm:$0xff] %vm410_vm1, %v11101_v7  ;;  %v4082_v35 = vmul.f32 %v11049_v24, %v11049_v24  ;;  %v5214_v40 = vadd.f32 %v5213_v23, %v5212_v47  ;;  %v4027_v3 = vadd.f32 %v4026_v63, %v4025_v49  ;;  %v4028_v51 = vsel %vm410_vm1, %v3892_v58, 0.0 }
 0x2d6   : > { %6600 = vst.msk [vmem:[%s10157_s29 + $0x2b8] sm:$0xff] %vm410_vm1, %v11099_v38  ;;  %v11110_v9 = vpop.f32.mrb[55].mxu0  ;;  %v5215_v21 = vsel %vm410_vm1, %v11043_v31, 0.0  ;;  %v5315_v44 = vsel %vm410_vm1, %v5268_v26, 0.0  ;;  %v4081_v6 = vmul.f32 %v3892_v58, %v3892_v58  ;;  %v4129_v27 = vadd.f32 %v4128_v56, %v4127_v50 }
 0x2d7   : > { %6599 = vst.msk [vmem:[%s10157_s29 + $0x2b0] sm:$0xff] %vm410_vm1, %v11110_v9  ;;  %v11121_v48 = vpop.f32.mrb[54].mxu1  ;;  %v5317_v43 = vsel %vm410_vm1, %v5269_v2, 0.0  ;;  %v4030_v34 = vsel %vm410_vm1, %v11049_v24, 0.0  ;;  %v5316_v22 = vadd.f32 %v5315_v44, %v5314_v20  ;;  %v4029_v33 = vadd.f32 %v4028_v51, %v4027_v3 }
 0x2d8   : > { %6768 = vst.msk [vmem:[%s10157_s29 + $0x3b8] sm:$0xff] %vm410_vm1, %v11121_v48  ;;  %v11131_v55 = vpop.f32.mrb[55].mxu1  ;;  %v4130_v14 = vsel %vm410_vm1, %v4081_v6, 0.0  ;;  %v5271_v18 = vmul.f32 %v11066_v12, %v11066_v12  ;;  %v5216_v45 = vadd.f32 %v5215_v21, %v5214_v40  ;;  %v5217_v17 = vsel %vm410_vm1, %v5081_v0, 0.0 }
 0x2d9   : > { %v11129_v31 = vpop.f32.mrb[56].mxu0  ;;  %6767 = vst.msk [vmem:[%s10157_s29 + $0x3b0] sm:$0xff] %vm410_vm1, %v11131_v55  ;;  %v4132_v61 = vsel %vm410_vm1, %v4082_v35, 0.0  ;;  %v4131_v58 = vadd.f32 %v4130_v14, %v4129_v27  ;;  %v5270_v8 = vmul.f32 %v5081_v0, %v5081_v0  ;;  %v5318_v1 = vadd.f32 %v5317_v43, %v5316_v22 }
 0x2da   : > { %6602 = vst.msk [vmem:[%s10157_s29 + $0x2c8] sm:$0xff] %vm410_vm1, %v11129_v31  ;;  %v11143_v24 = vpop.f32.mrb[57].mxu0  ;;  %v4084_v5 = vmul.f32 %v11072_v30, %v11072_v30  ;;  %v5218_v62 = vadd.f32 %v5217_v17, %v5216_v45  ;;  %v4031_v41 = vadd.f32 %v4030_v34, %v4029_v33  ;;  %v4032_v15 = vsel %vm410_vm1, %v3902_v57, 0.0 }
 0x2db   : > { %6601 = vst.msk [vmem:[%s10157_s29 + $0x2c0] sm:$0xff] %vm410_vm1, %v11143_v24  ;;  %v11152_v11 = vpop.f32.mrb[56].mxu1  ;;  %v5219_v59 = vsel %vm410_vm1, %v11066_v12, 0.0  ;;  %v5319_v46 = vsel %vm410_vm1, %v5270_v8, 0.0  ;;  %v4083_v54 = vmul.f32 %v3902_v57, %v3902_v57  ;;  %v4133_v10 = vadd.f32 %v4132_v61, %v4131_v58 }
 0x2dc   : > { %6770 = vst.msk [vmem:[%s10157_s29 + $0x3c8] sm:$0xff] %vm410_vm1, %v11152_v11  ;;  %v11162_v0 = vpop.f32.mrb[57].mxu1  ;;  %v5321_v53 = vsel %vm410_vm1, %v5271_v18, 0.0  ;;  %v4034_v39 = vsel %vm410_vm1, %v11072_v30, 0.0  ;;  %v5320_v52 = vadd.f32 %v5319_v46, %v5318_v1  ;;  %v4033_v25 = vadd.f32 %v4032_v15, %v4031_v41 }
 0x2dd   : > { %v11160_v19 = vpop.f32.mrb[58].mxu0  ;;  %6769 = vst.msk [vmem:[%s10157_s29 + $0x3c0] sm:$0xff] %vm410_vm1, %v11162_v0  ;;  %v4134_v57 = vsel %vm410_vm1, %v4083_v54, 0.0  ;;  %v5273_v13 = vmul.f32 %v11090_v28, %v11090_v28  ;;  %v5220_v37 = vadd.f32 %v5219_v59, %v5218_v62  ;;  %v5221_v30 = vsel %vm410_vm1, %v11101_v7, 0.0 }
 0x2de   : > { %6604 = vst.msk [vmem:[%s10157_s29 + $0x2d8] sm:$0xff] %vm410_vm1, %v11160_v19  ;;  %v11173_v12 = vpop.f32.mrb[59].mxu0  ;;  %v4136_v32 = vsel %vm410_vm1, %v4084_v5, 0.0  ;;  %v4135_v42 = vadd.f32 %v4134_v57, %v4133_v10  ;;  %v5272_v36 = vmul.f32 %v11101_v7, %v11101_v7  ;;  %v5322_v63 = vadd.f32 %v5321_v53, %v5320_v52 }
 0x2df   : > { %6603 = vst.msk [vmem:[%s10157_s29 + $0x2d0] sm:$0xff] %vm410_vm1, %v11173_v12  ;;  %v11186_v4 = vpop.f32.mrb[58].mxu1  ;;  %v4086_v49 = vmul.f32 %v11099_v38, %v11099_v38  ;;  %v5222_v16 = vadd.f32 %v5221_v30, %v5220_v37  ;;  %v4035_v2 = vadd.f32 %v4034_v39, %v4033_v25  ;;  %v4036_v47 = vsel %vm410_vm1, %v11110_v9, 0.0 }
 0x2e0   : > { %6772 = vst.msk [vmem:[%s10157_s29 + $0x3d8] sm:$0xff] %vm410_vm1, %v11186_v4  ;;  %v11197_v56 = vpop.f32.mrb[59].mxu1  ;;  %v5223_v7 = vsel %vm410_vm1, %v11090_v28, 0.0  ;;  %v5323_v50 = vsel %vm410_vm1, %v5272_v36, 0.0  ;;  %v4085_v26 = vmul.f32 %v11110_v9, %v11110_v9  ;;  %v4137_v20 = vadd.f32 %v4136_v32, %v4135_v42 }
 0x2e1   : > { %v11195_v23 = vpop.f32.mrb[60].mxu0  ;;  %6771 = vst.msk [vmem:[%s10157_s29 + $0x3d0] sm:$0xff] %vm410_vm1, %v11197_v56  ;;  %v5325_v40 = vsel %vm410_vm1, %v5273_v13, 0.0  ;;  %v4038_v28 = vsel %vm410_vm1, %v11099_v38, 0.0  ;;  %v5324_v3 = vadd.f32 %v5323_v50, %v5322_v63  ;;  %v4037_v51 = vadd.f32 %v4036_v47, %v4035_v2 }
 0x2e2   : > { %6606 = vst.msk [vmem:[%s10157_s29 + $0x2e8] sm:$0xff] %vm410_vm1, %v11195_v23  ;;  %v11210_v35 = vpop.f32.mrb[61].mxu0  ;;  %v4138_v9 = vsel %vm410_vm1, %v4085_v26, 0.0  ;;  %v5275_v21 = vmul.f32 %v11121_v48, %v11121_v48  ;;  %v5224_v44 = vadd.f32 %v5223_v7, %v5222_v16  ;;  %v5225_v6 = vsel %vm410_vm1, %v11131_v55, 0.0 }
 0x2e3   : > { %6605 = vst.msk [vmem:[%s10157_s29 + $0x2e0] sm:$0xff] %vm410_vm1, %v11210_v35  ;;  %v11223_v27 = vpop.f32.mrb[60].mxu1  ;;  %v4140_v38 = vsel %vm410_vm1, %v4086_v49, 0.0  ;;  %v4139_v43 = vadd.f32 %v4138_v9, %v4137_v20  ;;  %v5274_v34 = vmul.f32 %v11131_v55, %v11131_v55  ;;  %v5326_v22 = vadd.f32 %v5325_v40, %v5324_v3 }
 0x2e4   : > { %6774 = vst.msk [vmem:[%s10157_s29 + $0x3e8] sm:$0xff] %vm410_vm1, %v11223_v27  ;;  %v11233_v14 = vpop.f32.mrb[61].mxu1  ;;  %v4088_v18 = vmul.f32 %v11129_v31, %v11129_v31  ;;  %v5226_v45 = vadd.f32 %v5225_v6, %v5224_v44  ;;  %v4039_v17 = vadd.f32 %v4038_v28, %v4037_v51  ;;  %v4040_v61 = vsel %vm410_vm1, %v11143_v24, 0.0 }
 0x2e5   : > { %v11231_v33 = vpop.f32.mrb[62].mxu0  ;;  %6773 = vst.msk [vmem:[%s10157_s29 + $0x3e0] sm:$0xff] %vm410_vm1, %v11233_v14  ;;  %v5227_v58 = vsel %vm410_vm1, %v11121_v48, 0.0  ;;  %v5327_v8 = vsel %vm410_vm1, %v5274_v34, 0.0  ;;  %v4087_v1 = vmul.f32 %v11143_v24, %v11143_v24  ;;  %v4141_v5 = vadd.f32 %v4140_v38, %v4139_v43 }
 0x2e6   : > { %6608 = vst.msk [vmem:[%s10157_s29 + $0x2f8] sm:$0xff] %vm410_vm1, %v11231_v33  ;;  %v11245_v55 = vpop.f32.mrb[63].mxu0  ;;  %v5329_v62 = vsel %vm410_vm1, %v5275_v21, 0.0  ;;  %v4042_v41 = vsel %vm410_vm1, %v11129_v31, 0.0  ;;  %v5328_v15 = vadd.f32 %v5327_v8, %v5326_v22  ;;  %v4041_v59 = vadd.f32 %v4040_v61, %v4039_v17 }
 0x2e7   : > { %6607 = vst.msk [vmem:[%s10157_s29 + $0x2f0] sm:$0xff] %vm410_vm1, %v11245_v55  ;;  %v11258_v46 = vpop.f32.mrb[62].mxu1  ;;  %v4142_v48 = vsel %vm410_vm1, %v4087_v1, 0.0  ;;  %v5277_v54 = vmul.f32 %v11152_v11, %v11152_v11  ;;  %v5228_v24 = vadd.f32 %v5227_v58, %v5226_v45  ;;  %v5229_v10 = vsel %vm410_vm1, %v11162_v0, 0.0 }
 0x2e8   : > { %6776 = vst.msk [vmem:[%s10157_s29 + $0x3f8] sm:$0xff] %vm410_vm1, %v11258_v46  ;;  %v5141_v53 = vpop.f32.mrb[63].mxu1  ;;  %v4144_v39 = vsel %vm410_vm1, %v4088_v18, 0.0  ;;  %v4143_v31 = vadd.f32 %v4142_v48, %v4141_v5  ;;  %v5276_v52 = vmul.f32 %v11162_v0, %v11162_v0  ;;  %v5330_v25 = vadd.f32 %v5329_v62, %v5328_v15 }
 0x2e9   : > { %6775 = vst.msk [vmem:[%s10157_s29 + $0x3f0] sm:$0xff] %vm410_vm1, %v5141_v53  ;;  %v5231_v57 = vsel %vm410_vm1, %v11152_v11, 0.0  ;;  %v5230_v13 = vadd.f32 %v5229_v10, %v5228_v24  ;;  %v4043_v37 = vadd.f32 %v4042_v41, %v4041_v59  ;;  %v4044_v30 = vsel %vm410_vm1, %v11173_v12, 0.0 }
 0x2ea   : > { %v4090_v32 = vmul.f32 %v11160_v19, %v11160_v19  ;;  %v5331_v42 = vsel %vm410_vm1, %v5276_v52, 0.0  ;;  %v4089_v36 = vmul.f32 %v11173_v12, %v11173_v12  ;;  %v4145_v0 = vadd.f32 %v4144_v39, %v4143_v31 }
 0x2eb   : > { %v5333_v63 = vsel %vm410_vm1, %v5277_v54, 0.0  ;;  %v4046_v49 = vsel %vm410_vm1, %v11160_v19, 0.0  ;;  %v5332_v11 = vadd.f32 %v5331_v42, %v5330_v25  ;;  %v4045_v16 = vadd.f32 %v4044_v30, %v4043_v37 }
 0x2ec   : > { %v4146_v2 = vsel %vm410_vm1, %v4089_v36, 0.0  ;;  %v5279_v47 = vmul.f32 %v11186_v4, %v11186_v4  ;;  %v5232_v7 = vadd.f32 %v5231_v57, %v5230_v13  ;;  %v5233_v50 = vsel %vm410_vm1, %v11197_v56, 0.0 }
 0x2ed   : > { %v4147_v26 = vadd.f32 %v4146_v2, %v4145_v0  ;;  %v4092_v12 = vmul.f32 %v11195_v23, %v11195_v23  ;;  %v5278_v20 = vmul.f32 %v11197_v56, %v11197_v56  ;;  %v5334_v40 = vadd.f32 %v5333_v63, %v5332_v11 }
 0x2ee   : > { %v4148_v19 = vsel %vm410_vm1, %v4090_v32, 0.0  ;;  %v5234_v28 = vadd.f32 %v5233_v50, %v5232_v7  ;;  %v4047_v3 = vadd.f32 %v4046_v49, %v4045_v16  ;;  %v4048_v51 = vsel %vm410_vm1, %v11210_v35, 0.0 }
 0x2ef   : > { %v5235_v9 = vsel %vm410_vm1, %v11186_v4, 0.0  ;;  %v5335_v21 = vsel %vm410_vm1, %v5278_v20, 0.0  ;;  %v4091_v44 = vmul.f32 %v11210_v35, %v11210_v35  ;;  %v4149_v6 = vadd.f32 %v4148_v19, %v4147_v26 }
 0x2f0   : > { %v5337_v38 = vsel %vm410_vm1, %v5279_v47, 0.0  ;;  %v4050_v56 = vsel %vm410_vm1, %v11195_v23, 0.0  ;;  %v5336_v43 = vadd.f32 %v5335_v21, %v5334_v40  ;;  %v4049_v34 = vadd.f32 %v4048_v51, %v4047_v3 }
 0x2f1   : > { %v4152_v22 = vsel %vm410_vm1, %v4092_v12, 0.0  ;;  %v4150_v18 = vsel %vm410_vm1, %v4091_v44, 0.0  ;;  %v5236_v45 = vadd.f32 %v5235_v9, %v5234_v28  ;;  %v5237_v4 = vsel %vm410_vm1, %v11233_v14, 0.0 }
 0x2f2   : > { %v4151_v17 = vadd.f32 %v4150_v18, %v4149_v6  ;;  %v5281_v35 = vmul.f32 %v11223_v27, %v11223_v27  ;;  %v5280_v61 = vmul.f32 %v11233_v14, %v11233_v14  ;;  %v5338_v58 = vadd.f32 %v5337_v38, %v5336_v43  ;;  %v11337_v18 = vld [vmem:[%s10157_s29 + $0x8] sm:$0xff] }
 0x2f3   : > { %v5239_v23 = vsel %vm410_vm1, %v11223_v27, 0.0  ;;  %v5238_v8 = vadd.f32 %v5237_v4, %v5236_v45  ;;  %v4051_v1 = vadd.f32 %v4050_v56, %v4049_v34  ;;  %v4052_v5 = vsel %vm410_vm1, %v11245_v55, 0.0  ;;  %v11340_v4 = vld [vmem:[%s10157_s29] sm:$0xff] }
 0x2f4   : > { %v4094_v62 = vmul.f32 %v11231_v33, %v11231_v33  ;;  %v5339_v41 = vsel %vm410_vm1, %v5280_v61, 0.0  ;;  %v4093_v15 = vmul.f32 %v11245_v55, %v11245_v55  ;;  %v4153_v59 = vadd.f32 %v4152_v22, %v4151_v17  ;;  %v11343_v17 = vld [vmem:[%s10157_s29 + $0x18] sm:$0xff]  ;;  %v11351_v61 = vld [vmem:[%s10157_s29 + $0x28] sm:$0xff] }
 0x2f5   : > { %v4054_v14 = vsel %vm410_vm1, %v11231_v33, 0.0  ;;  %v5340_v48 = vadd.f32 %v5339_v41, %v5338_v58  ;;  %v4053_v54 = vadd.f32 %v4052_v5, %v4051_v1  ;;  %v5240_v27 = vadd.f32 %v5239_v23, %v5238_v8  ;;  %v11354_v58 = vld [vmem:[%s10157_s29 + $0x20] sm:$0xff]  ;;  %v11360_v8 = vld [vmem:[%s10157_s29 + $0x30] sm:$0xff]  ;;  %v11363_v1 = vld [vmem:[%s10157_s29 + $0x48] sm:$0xff] }
 0x2f6   : > { %v5341_v24 = vsel %vm410_vm1, %v5281_v35, 0.0  ;;  %v4154_v10 = vsel %vm410_vm1, %v4093_v15, 0.0  ;;  %v5241_v39 = vsel %vm410_vm1, %v5141_v53, 0.0  ;;  %v5282_v31 = vmul.f32 %v5141_v53, %v5141_v53  ;;  %v11366_v5 = vld [vmem:[%s10157_s29 + $0x40] sm:$0xff]  ;;  %v11607_v41 = vld [vmem:[%s10157_s29 + $0x1d8] sm:$0xff] }
 0x2f7   : > { %v4055_v52 = vadd.f32 %v4054_v14, %v4053_v54  ;;  %v4155_v25 = vadd.f32 %v4154_v10, %v4153_v59  ;;  %v5283_v57 = vmul.f32 %v11258_v46, %v11258_v46  ;;  %v5242_v55 = vadd.f32 %v5241_v39, %v5240_v27  ;;  %v11377_v14 = vld [vmem:[%s10157_s29 + $0x58] sm:$0xff]  ;;  %v11383_v54 = vld [vmem:[%s10157_s29 + $0x68] sm:$0xff]  ;;  %v11584_v39 = vld [vmem:[%s10157_s29 + $0x1a0] sm:$0xff]  ;;  %13044 = vst [vmem:[#allocation39_spill] sm:$0xff] %v11607_v41 }
 0x2f8   : > { %v4156_v13 = vsel %vm410_vm1, %v4094_v62, 0.0  ;;  %v5243_v33 = vsel %vm410_vm1, %v11258_v46, 0.0  ;;  %v5342_v37 = vadd.f32 %v5341_v24, %v5340_v48  ;;  %v5343_v30 = vsel %vm410_vm1, %v5282_v31, 0.0  ;;  %v11380_v48 = vld [vmem:[%s10157_s29 + $0x50] sm:$0xff]  ;;  %v11392_v31 = vld [vmem:[%s10157_s29 + $0x60] sm:$0xff]  ;;  %13039 = vst [vmem:[#allocation33_spill] sm:$0xff] %v11584_v39 }
 0x2f9   : > { %v4056_v32 = vrot.slane %v4055_v52, 4  ;;  %v4157_v42 = vadd.f32 %v4156_v13, %v4155_v25  ;;  %v5244_v36 = vadd.f32 %v5243_v33, %v5242_v55  ;;  %v5345_v49 = vsel %vm410_vm1, %v5283_v57, 0.0  ;;  %v11398_v25 = vld [vmem:[%s10157_s29 + $0x70] sm:$0xff]  ;;  %v11556_v33 = vld [vmem:[%s10157_s29 + $0x180] sm:$0xff]  ;;  %v11567_v13 = vld [vmem:[%s10157_s29 + $0x198] sm:$0xff] }
 0x2fa   : > { %v5344_v0 = vadd.f32 %v5343_v30, %v5342_v37  ;;  %v11409_v37 = vld [vmem:[%s10157_s29 + $0x88] sm:$0xff]  ;;  %v11412_v30 = vld [vmem:[%s10157_s29 + $0x80] sm:$0xff]  ;;  %13036 = vst [vmem:[#allocation15_spill] sm:$0xff] %v11556_v33  ;;  %13037 = vst [vmem:[#allocation27_spill] sm:$0xff] %v11567_v13 }
 0x2fb   : > { %v4057_v63 = vadd.f32 %v4056_v32, %v4055_v52  ;;  %v4158_v53 = vrot.slane %v4157_v42, 4  ;;  %v5245_v11 = vrot.slane %v5244_v36, 4  ;;  %v11395_v52 = vld [vmem:[%s10157_s29 + $0x78] sm:$0xff]  ;;  %v11570_v55 = vld [vmem:[%s10157_s29 + $0x190] sm:$0xff]  ;;  %v11573_v57 = vld [vmem:[%s10157_s29 + $0x1a8] sm:$0xff] }
 0x2fc   : > { %v5346_v16 = vadd.f32 %v5345_v49, %v5344_v0  ;;  %v11415_v32 = vld [vmem:[%s10157_s29 + $0x98] sm:$0xff]  ;;  %v11427_v49 = vld [vmem:[%s10157_s29 + $0xa8] sm:$0xff]  ;;  %v11550_v0 = vld [vmem:[%s10157_s29 + $0x170] sm:$0xff]  ;;  %13038 = vst [vmem:[#allocation28_spill] sm:$0xff] %v11573_v57 }
 0x2fd   : > { %v4058_v2 = vrot.slane %v4057_v63, 2  ;;  %v4159_v47 = vadd.f32 %v4158_v53, %v4157_v42  ;;  %v5246_v7 = vadd.f32 %v5245_v11, %v5244_v36  ;;  %v11424_v53 = vld [vmem:[%s10157_s29 + $0x90] sm:$0xff]  ;;  %v11430_v11 = vld [vmem:[%s10157_s29 + $0xa0] sm:$0xff]  ;;  %v11553_v36 = vld [vmem:[%s10157_s29 + $0x188] sm:$0xff] }
 0x2fe   : > { %v5347_v50 = vrot.slane %v5346_v16, 4  ;;  %13035 = vst [vmem:[#allocation14_spill] sm:$0xff] %v11553_v36  ;;  %v11587_v10 = vld [vmem:[%s10157_s29 + $0x1b8] sm:$0xff]  ;;  %v11590_v24 = vld [vmem:[%s10157_s29 + $0x1b0] sm:$0xff]  ;;  %v11601_v59 = vld [vmem:[%s10157_s29 + $0x1c8] sm:$0xff] }
 0x2ff   : > { %v4059_v26 = vadd.f32 %v4058_v2, %v4057_v63  ;;  %v4160_v12 = vrot.slane %v4159_v47, 2  ;;  %v5247_v46 = vrot.slane %v5246_v7, 2  ;;  %v11532_v2 = vld [vmem:[%s10157_s29 + $0x150] sm:$0xff]  ;;  %v11538_v63 = vld [vmem:[%s10157_s29 + $0x160] sm:$0xff]  ;;  %13040 = vst [vmem:[#allocation35_spill] sm:$0xff] %v11587_v10  ;;  %13041 = vst [vmem:[#allocation36_spill] sm:$0xff] %v11590_v24 }
 0x300   : > { %v5348_v20 = vadd.f32 %v5347_v50, %v5346_v16  ;;  %v11441_v50 = vld [vmem:[%s10157_s29 + $0xb8] sm:$0xff]  ;;  %v11535_v16 = vld [vmem:[%s10157_s29 + $0x168] sm:$0xff]  ;;  %13033 = vst [vmem:[#allocation12_spill] sm:$0xff] %v11538_v63  ;;  %13042 = vst [vmem:[#allocation37_spill] sm:$0xff] %v11601_v59 }
 0x301   : > { %v4060_v40 = vrot.slane %v4059_v26, 1  ;;  %v4161_v19 = vadd.f32 %v4160_v12, %v4159_v47  ;;  %v5248_v28 = vadd.f32 %v5247_v46, %v5246_v7  ;;  %v11447_v12 = vld [vmem:[%s10157_s29 + $0xc8] sm:$0xff]  ;;  %v11529_v47 = vld [vmem:[%s10157_s29 + $0x158] sm:$0xff]  ;;  %13032 = vst [vmem:[#allocation11_spill] sm:$0xff] %v11535_v16  ;;  %v11604_v15 = vld [vmem:[%s10157_s29 + $0x1c0] sm:$0xff] }
 0x302   : > { %v5349_v3 = vrot.slane %v5348_v20, 2  ;;  %13031 = vst [vmem:[#allocation10_spill] sm:$0xff] %v11529_v47  ;;  %13043 = vst [vmem:[#allocation38_spill] sm:$0xff] %v11604_v15  ;;  %v11618_v16 = vld [vmem:[%s10157_s29 + $0x1d0] sm:$0xff]  ;;  %v11621_v63 = vld [vmem:[%s10157_s29 + $0x1e8] sm:$0xff] }
 0x303   : > { %v4061_v51 = vadd.f32 %v4060_v40, %v4059_v26  ;;  %v4162_v9 = vrot.slane %v4161_v19, 1  ;;  %v5249_v21 = vrot.slane %v5248_v28, 1  ;;  %v11444_v26 = vld [vmem:[%s10157_s29 + $0xb0] sm:$0xff]  ;;  %v11512_v40 = vld [vmem:[%s10157_s29 + $0x148] sm:$0xff]  ;;  %13045 = vst [vmem:[#allocation40_spill] sm:$0xff] %v11621_v63  ;;  %v11624_v47 = vld [vmem:[%s10157_s29 + $0x1e0] sm:$0xff] }
 0x304   : > { %v5350_v44 = vadd.f32 %v5349_v3, %v5348_v20  ;;  %v11459_v3 = vld [vmem:[%s10157_s29 + $0x100] sm:$0xff]  ;;  %13046 = vst [vmem:[#allocation41_spill] sm:$0xff] %v11624_v47  ;;  %v11635_v36 = vld [vmem:[%s10157_s29 + $0x1f8] sm:$0xff]  ;;  %v11638_v33 = vld [vmem:[%s10157_s29 + $0x1f0] sm:$0xff] }
 0x305   : > { %v4062_v6 = vadd.f32 %v4061_v51, %v10888_v29  ;;  %v4163_v38 = vadd.f32 %v4162_v9, %v4161_v19  ;;  %v5250_v56 = vadd.f32 %v5249_v21, %v5248_v28  ;;  %v11346_v29 = vld [vmem:[%s10157_s29 + $0x10] sm:$0xff]  ;;  %v11456_v28 = vld [vmem:[%s10157_s29 + $0x108] sm:$0xff]  ;;  %v11462_v51 = vld [vmem:[%s10157_s29 + $0xc0] sm:$0xff] }
 0x306   : > { %v5351_v43 = vrot.slane %v5350_v44, 1  ;;  %v11465_v9 = vld [vmem:[%s10157_s29 + $0xd8] sm:$0xff]  ;;  %v11468_v21 = vld [vmem:[%s10157_s29 + $0xd0] sm:$0xff]  ;;  %v11515_v20 = vld [vmem:[%s10157_s29 + $0x140] sm:$0xff] }
 0x307   : > { %v4164_v34 = vadd.f32 %v4163_v38, %v10898_v60  ;;  %v5251_v22 = vadd.f32 %v5250_v56, %v4062_v6  ;;  %v11357_v60 = vld [vmem:[%s10157_s29 + $0x38] sm:$0xff]  ;;  %v11509_v19 = vld [vmem:[%s10157_s29 + $0x130] sm:$0xff]  ;;  %v11652_v57 = vld [vmem:[%s10157_s29 + $0x200] sm:$0xff] }
 0x308   : > { %v5352_v45 = vadd.f32 %v5351_v43, %v5350_v44  ;;  %v11479_v43 = vld [vmem:[%s10157_s29 + $0x118] sm:$0xff]  ;;  %13048 = vst [vmem:[#allocation43_spill] sm:$0xff] %v11652_v57  ;;  %v11658_v13 = vld [vmem:[%s10157_s29 + $0x210] sm:$0xff]  ;;  %v11669_v59 = vld [vmem:[%s10157_s29 + $0x228] sm:$0xff] }
 0x309   : > { %v11348_v35 = vmul.f32 0.0009765625, %v5251_v22  ;;  %v11485_v22 = vld [vmem:[%s10157_s29 + $0x128] sm:$0xff]  ;;  %v11506_v44 = vld [vmem:[%s10157_s29 + $0x138] sm:$0xff]  ;;  %13050 = vst [vmem:[#allocation45_spill] sm:$0xff] %v11669_v59  ;;  %v11672_v15 = vld [vmem:[%s10157_s29 + $0x220] sm:$0xff] }
 0x30a   : > { %v5353_v23 = vadd.f32 %v5352_v45, %v4164_v34  ;;  %v11482_v34 = vld [vmem:[%s10157_s29 + $0x110] sm:$0xff]  ;;  %v11488_v45 = vld [vmem:[%s10157_s29 + $0x120] sm:$0xff]  ;;  %v11547_v38 = vld [vmem:[%s10157_s29 + $0x178] sm:$0xff]  ;;  %13051 = vst [vmem:[#allocation46_spill] sm:$0xff] %v11672_v15 }
 0x30b   : > { %v5390_v62 = vmul.f32 %v11348_v35, %v11348_v35  ;;  %13034 = vst [vmem:[#allocation13_spill] sm:$0xff] %v11547_v38  ;;  %v11641_v38 = vld [vmem:[%s10157_s29 + $0x208] sm:$0xff]  ;;  %v11655_v39 = vld [vmem:[%s10157_s29 + $0x218] sm:$0xff]  ;;  %v11686_v47 = vld [vmem:[%s10157_s29 + $0x230] sm:$0xff]  ;;  %v13057_v56 = vsub.f32 %v11337_v18, %v11348_v35  ;;  %v13058_v7 = vsub.f32 %v11346_v29, %v11348_v35  ;;  %v13059_v41 = vsub.f32 %v11343_v17, %v11348_v35 }
 0x30c   : > { %v5389_v27 = vmul.f32 0.0009765625, %v5353_v23  ;;  %v11491_v23 = vld [vmem:[%s10157_s29 + $0xe8] sm:$0xff]  ;;  %13047 = vst [vmem:[#allocation42_spill] sm:$0xff] %v11641_v38  ;;  %13049 = vst [vmem:[#allocation44_spill] sm:$0xff] %v11655_v39  ;;  %v11675_v10 = vld [vmem:[%s10157_s29 + $0x238] sm:$0xff]  ;;  %v13061_v18 = vsub.f32 %v11351_v61, %v11348_v35  ;;  %v13062_v29 = vsub.f32 %v11360_v8, %v11348_v35  ;;  %v13063_v17 = vsub.f32 %v11357_v60, %v11348_v35 }
 0x30d   : > { %13052 = vst [vmem:[#allocation47_spill] sm:$0xff] %v11675_v10  ;;  %13053 = vst [vmem:[#allocation48_spill] sm:$0xff] %v11686_v47  ;;  %v11689_v6 = vld [vmem:[%s10157_s29 + $0x248] sm:$0xff]  ;;  %v11692_v63 = vld [vmem:[%s10157_s29 + $0x240] sm:$0xff]  ;;  %v13065_v61 = vsub.f32 %v11363_v1, %v11348_v35  ;;  %v13066_v8 = vsub.f32 %v11380_v48, %v11348_v35  ;;  %v13067_v60 = vsub.f32 %v11377_v14, %v11348_v35 }
 0x30e   : > { %v5391_v42 = vsub.f32 %v5389_v27, %v5390_v62  ;;  %v11494_v62 = vld [vmem:[%s10157_s29 + $0xe0] sm:$0xff]  ;;  %v11497_v27 = vld [vmem:[%s10157_s29 + $0xf0] sm:$0xff]  ;;  %13054 = vst [vmem:[#allocation49_spill] sm:$0xff] %v11689_v6  ;;  %13055 = vst [vmem:[#allocation50_spill] sm:$0xff] %v11692_v63  ;;  %v13069_v1 = vsub.f32 %v11383_v54, %v11348_v35  ;;  %v13070_v48 = vsub.f32 %v11398_v25, %v11348_v35 }
 0x30f   : > { %v13071_v14 = vsub.f32 %v11395_v52, %v11348_v35  ;;  %v13073_v54 = vsub.f32 %v11409_v37, %v11348_v35  ;;  %v13074_v25 = vsub.f32 %v11424_v53, %v11348_v35  ;;  %v13075_v52 = vsub.f32 %v11415_v32, %v11348_v35 }
 0x310   : > { %v5392_v46 = vmax.f32 %v5391_v42, 0.0  ;;  %v13077_v37 = vsub.f32 %v11427_v49, %v11348_v35  ;;  %v13078_v53 = vsub.f32 %v11444_v26, %v11348_v35  ;;  %v13079_v32 = vsub.f32 %v11441_v50, %v11348_v35 }
 0x312   : > { %v5393_v42 = vadd.f32 1e-05, %v5392_v46  ;;  %v11518_v46 = vld [vmem:[%s10157_s29 + $0xf8] sm:$0xff] }
 0x314   : > { %8709 = vrsqrt.f32 %v5393_v42  ;;  %v13056_v42 = vsub.f32 %v11340_v4, %v11348_v35  ;;  %v13060_v4 = vsub.f32 %v11354_v58, %v11348_v35  ;;  %v13064_v58 = vsub.f32 %v11366_v5, %v11348_v35 }
 0x315   : > { %v13068_v5 = vsub.f32 %v11392_v31, %v11348_v35  ;;  %v13072_v31 = vsub.f32 %v11412_v30, %v11348_v35  ;;  %v13076_v30 = vsub.f32 %v11430_v11, %v11348_v35 }
 0x31e   : > { %v11702_v57 = vpop.eup %8709 }
 0x31f   : > { %v5459_v15 = vmul.f32 %v11702_v57, %v13056_v42  ;;  %v5460_v59 = vmul.f32 %v11702_v57, %v13057_v56  ;;  %v5461_v38 = vmul.f32 %v11702_v57, %v13058_v7  ;;  %v5462_v24 = vmul.f32 %v11702_v57, %v13059_v41 }
 0x320   : > { %v5463_v42 = vmul.f32 %v11702_v57, %v13060_v4  ;;  %v5464_v56 = vmul.f32 %v11702_v57, %v13061_v18  ;;  %v5465_v7 = vmul.f32 %v11702_v57, %v13062_v29  ;;  %v5466_v41 = vmul.f32 %v11702_v57, %v13063_v17 }
 0x321   : > { %v5467_v4 = vmul.f32 %v11702_v57, %v13064_v58  ;;  %v5468_v18 = vmul.f32 %v11702_v57, %v13065_v61  ;;  %v5469_v29 = vmul.f32 %v11702_v57, %v13066_v8  ;;  %v5470_v17 = vmul.f32 %v11702_v57, %v13067_v60 }
 0x322   : > { %v5471_v58 = vmul.f32 %v11702_v57, %v13068_v5  ;;  %v5472_v61 = vmul.f32 %v11702_v57, %v13069_v1  ;;  %v5473_v8 = vmul.f32 %v11702_v57, %v13070_v48  ;;  %v5474_v60 = vmul.f32 %v11702_v57, %v13071_v14 }
 0x323   : > { %v5475_v5 = vmul.f32 %v11702_v57, %v13072_v31  ;;  %v5476_v1 = vmul.f32 %v11702_v57, %v13073_v54  ;;  %v5477_v48 = vmul.f32 %v11702_v57, %v13074_v25  ;;  %v5478_v14 = vmul.f32 %v11702_v57, %v13075_v52 }
 0x324   : > { %v11796_v31 = vmul.f32 %v11702_v57, %v13076_v30  ;;  %v11802_v54 = vmul.f32 %v11702_v57, %v13077_v37  ;;  %v11808_v25 = vmul.f32 %v11702_v57, %v13078_v53  ;;  %v11814_v11 = vmul.f32 %v11702_v57, %v13079_v32 }
 0x325   : > { %v13080_v52 = vsub.f32 %v11462_v51, %v11348_v35  ;;  %v13081_v30 = vsub.f32 %v11447_v12, %v11348_v35  ;;  %v13082_v37 = vsub.f32 %v11468_v21, %v11348_v35  ;;  %v13083_v53 = vsub.f32 %v11465_v9, %v11348_v35 }
 0x326   : > { %v13084_v32 = vsub.f32 %v11494_v62, %v11348_v35  ;;  %v13087_v62 = vsub.f32 %v11518_v46, %v11348_v35  ;;  %v5495_v6 = vmax.f32 %v5463_v42, 0.0  ;;  %v5496_v63 = vmax.f32 %v5464_v56, 0.0 }
 0x327   : > { %v11820_v49 = vmul.f32 %v11702_v57, %v13080_v52  ;;  %v11826_v26 = vmul.f32 %v11702_v57, %v13081_v30  ;;  %v11832_v50 = vmul.f32 %v11702_v57, %v13082_v37  ;;  %v11838_v51 = vmul.f32 %v11702_v57, %v13083_v53 }
 0x328   : > { %v11844_v12 = vmul.f32 %v11702_v57, %v13084_v32  ;;  %v13085_v52 = vsub.f32 %v11491_v23, %v11348_v35  ;;  %v13086_v30 = vsub.f32 %v11497_v27, %v11348_v35  ;;  %v11862_v37 = vmul.f32 %v11702_v57, %v13087_v62  ;;  %5527 = vst.msk [vmem:[%s10157_s29 + $0x20] sm:$0xff] %vm410_vm1, %v5495_v6 }
 0x329   : > { %v5491_v23 = vmax.f32 %v5459_v15, 0.0  ;;  %v5492_v53 = vmax.f32 %v5460_v59, 0.0  ;;  %v5493_v32 = vmax.f32 %v5461_v38, 0.0  ;;  %v5497_v27 = vmax.f32 %v5465_v7, 0.0  ;;  %5528 = vst.msk [vmem:[%s10157_s29 + $0x28] sm:$0xff] %vm410_vm1, %v5496_v63 }
 0x32a   : > { %v11850_v21 = vmul.f32 %v11702_v57, %v13085_v52  ;;  %v11856_v9 = vmul.f32 %v11702_v57, %v13086_v30  ;;  %v5494_v52 = vmax.f32 %v5462_v24, 0.0  ;;  %v5498_v30 = vmax.f32 %v5466_v41, 0.0 }
 0x32b   : > { %v5499_v10 = vmax.f32 %v5467_v4, 0.0  ;;  %v5500_v47 = vmax.f32 %v5468_v18, 0.0  ;;  %v5501_v46 = vmax.f32 %v5469_v29, 0.0  ;;  %v5502_v39 = vmax.f32 %v5470_v17, 0.0  ;;  %5523 = vst.msk [vmem:[%s10157_s29] sm:$0xff] %vm410_vm1, %v5491_v23  ;;  %5524 = vst.msk [vmem:[%s10157_s29 + $0x8] sm:$0xff] %vm410_vm1, %v5492_v53 }
 0x32c   : > { %5525 = vst.msk [vmem:[%s10157_s29 + $0x10] sm:$0xff] %vm410_vm1, %v5493_v32  ;;  %5526 = vst.msk [vmem:[%s10157_s29 + $0x18] sm:$0xff] %vm410_vm1, %v5494_v52  ;;  %v5503_v15 = vmax.f32 %v5471_v58, 0.0  ;;  %v5504_v59 = vmax.f32 %v5472_v61, 0.0  ;;  %v5505_v24 = vmax.f32 %v5473_v8, 0.0  ;;  %v5506_v38 = vmax.f32 %v5474_v60, 0.0 }
 0x32d   : > { %5529 = vst.msk [vmem:[%s10157_s29 + $0x30] sm:$0xff] %vm410_vm1, %v5497_v27  ;;  %5530 = vst.msk [vmem:[%s10157_s29 + $0x38] sm:$0xff] %vm410_vm1, %v5498_v30  ;;  %v5507_v42 = vmax.f32 %v5475_v5, 0.0  ;;  %v5508_v56 = vmax.f32 %v5476_v1, 0.0  ;;  %v5509_v7 = vmax.f32 %v5477_v48, 0.0  ;;  %v5510_v41 = vmax.f32 %v5478_v14, 0.0 }
 0x32e   : > { %5531 = vst.msk [vmem:[%s10157_s29 + $0x40] sm:$0xff] %vm410_vm1, %v5499_v10  ;;  %5532 = vst.msk [vmem:[%s10157_s29 + $0x48] sm:$0xff] %vm410_vm1, %v5500_v47  ;;  %v5511_v63 = vmax.f32 %v11796_v31, 0.0  ;;  %v5512_v6 = vmax.f32 %v11802_v54, 0.0  ;;  %v5513_v4 = vmax.f32 %v11808_v25, 0.0  ;;  %v5514_v18 = vmax.f32 %v11814_v11, 0.0 }
 0x32f   : > { %5533 = vst.msk [vmem:[%s10157_s29 + $0x50] sm:$0xff] %vm410_vm1, %v5501_v46  ;;  %5534 = vst.msk [vmem:[%s10157_s29 + $0x58] sm:$0xff] %vm410_vm1, %v5502_v39  ;;  %v5515_v10 = vmax.f32 %v11820_v49, 0.0  ;;  %v5516_v39 = vmax.f32 %v11826_v26, 0.0  ;;  %v5517_v47 = vmax.f32 %v11832_v50, 0.0  ;;  %v5518_v29 = vmax.f32 %v11838_v51, 0.0 }
 0x330   : > { %5535 = vst.msk [vmem:[%s10157_s29 + $0x60] sm:$0xff] %vm410_vm1, %v5503_v15  ;;  %5536 = vst.msk [vmem:[%s10157_s29 + $0x68] sm:$0xff] %vm410_vm1, %v5504_v59  ;;  %v5519_v17 = vmax.f32 %v11844_v12, 0.0  ;;  %v5520_v58 = vmax.f32 %v11850_v21, 0.0  ;;  %v5521_v61 = vmax.f32 %v11856_v9, 0.0  ;;  %v5522_v8 = vmax.f32 %v11862_v37, 0.0 }
 0x331   : > { %5537 = vst.msk [vmem:[%s10157_s29 + $0x70] sm:$0xff] %vm410_vm1, %v5505_v24  ;;  %5538 = vst.msk [vmem:[%s10157_s29 + $0x78] sm:$0xff] %vm410_vm1, %v5506_v38  ;;  %v13088_v60 = vsub.f32 %v11459_v3, %v11348_v35  ;;  %v13089_v1 = vsub.f32 %v11456_v28, %v11348_v35  ;;  %v13090_v14 = vsub.f32 %v11482_v34, %v11348_v35  ;;  %v13099_v9 = vld [vmem:[#allocation10_spill] sm:$0xff]  ;;  %v13101_v37 = vld [vmem:[#allocation12_spill] sm:$0xff] }
 0x332   : > { %5539 = vst.msk [vmem:[%s10157_s29 + $0x80] sm:$0xff] %vm410_vm1, %v5507_v42  ;;  %5540 = vst.msk [vmem:[%s10157_s29 + $0x88] sm:$0xff] %vm410_vm1, %v5508_v56  ;;  %v13091_v54 = vsub.f32 %v11479_v43, %v11348_v35  ;;  %v13092_v28 = vsub.f32 %v11488_v45, %v11348_v35  ;;  %v13093_v34 = vsub.f32 %v11485_v22, %v11348_v35  ;;  %v13103_v53 = vld [vmem:[#allocation11_spill] sm:$0xff]  ;;  %v13106_v27 = vld [vmem:[#allocation13_spill] sm:$0xff] }
 0x333   : > { %5541 = vst.msk [vmem:[%s10157_s29 + $0x90] sm:$0xff] %vm410_vm1, %v5509_v7  ;;  %5542 = vst.msk [vmem:[%s10157_s29 + $0x98] sm:$0xff] %vm410_vm1, %v5510_v41  ;;  %v5619_v5 = vmul.f32 %v11702_v57, %v13088_v60  ;;  %v5620_v48 = vmul.f32 %v11702_v57, %v13089_v1  ;;  %v5621_v31 = vmul.f32 %v11702_v57, %v13090_v14  ;;  %v13108_v15 = vld [vmem:[#allocation15_spill] sm:$0xff]  ;;  %v13110_v38 = vld [vmem:[#allocation14_spill] sm:$0xff] }
 0x334   : > { %5543 = vst.msk [vmem:[%s10157_s29 + $0xa0] sm:$0xff] %vm410_vm1, %v5511_v63  ;;  %5544 = vst.msk [vmem:[%s10157_s29 + $0xa8] sm:$0xff] %vm410_vm1, %v5512_v6  ;;  %v5622_v25 = vmul.f32 %v11702_v57, %v13091_v54  ;;  %v5623_v3 = vmul.f32 %v11702_v57, %v13092_v28  ;;  %v5624_v43 = vmul.f32 %v11702_v57, %v13093_v34  ;;  %v13113_v41 = vld [vmem:[#allocation27_spill] sm:$0xff]  ;;  %v13123_v1 = vld [vmem:[#allocation38_spill] sm:$0xff] }
 0x335   : > { %5545 = vst.msk [vmem:[%s10157_s29 + $0xb0] sm:$0xff] %vm410_vm1, %v5513_v4  ;;  %5546 = vst.msk [vmem:[%s10157_s29 + $0xb8] sm:$0xff] %vm410_vm1, %v5514_v18  ;;  %v13094_v11 = vsub.f32 %v11509_v19, %v11348_v35  ;;  %v13095_v26 = vsub.f32 %v11506_v44, %v11348_v35  ;;  %v13096_v45 = vsub.f32 %v11515_v20, %v11348_v35  ;;  %v13115_v4 = vld [vmem:[#allocation33_spill] sm:$0xff] }
 0x336   : > { %5547 = vst.msk [vmem:[%s10157_s29 + $0xc0] sm:$0xff] %vm410_vm1, %v5515_v10  ;;  %5548 = vst.msk [vmem:[%s10157_s29 + $0xc8] sm:$0xff] %vm410_vm1, %v5516_v39  ;;  %v13097_v22 = vsub.f32 %v11512_v40, %v11348_v35  ;;  %v13098_v19 = vsub.f32 %v11532_v2, %v11348_v35  ;;  %v13100_v44 = vsub.f32 %v13099_v9, %v11348_v35  ;;  %v13117_v39 = vld [vmem:[#allocation28_spill] sm:$0xff]  ;;  %v13125_v28 = vld [vmem:[#allocation37_spill] sm:$0xff] }
 0x337   : > { %5549 = vst.msk [vmem:[%s10157_s29 + $0xd0] sm:$0xff] %vm410_vm1, %v5517_v47  ;;  %5550 = vst.msk [vmem:[%s10157_s29 + $0xd8] sm:$0xff] %vm410_vm1, %v5518_v29  ;;  %v5625_v49 = vmul.f32 %v11702_v57, %v13094_v11  ;;  %v5626_v50 = vmul.f32 %v11702_v57, %v13095_v26  ;;  %v5627_v51 = vmul.f32 %v11702_v57, %v13096_v45  ;;  %v13119_v29 = vld [vmem:[#allocation36_spill] sm:$0xff] }
 0x338   : > { %5551 = vst.msk [vmem:[%s10157_s29 + $0xe0] sm:$0xff] %vm410_vm1, %v5519_v17  ;;  %5552 = vst.msk [vmem:[%s10157_s29 + $0xe8] sm:$0xff] %vm410_vm1, %v5520_v58  ;;  %v5628_v12 = vmul.f32 %v11702_v57, %v13097_v22  ;;  %v5629_v21 = vmul.f32 %v11702_v57, %v13098_v19  ;;  %v5630_v62 = vmul.f32 %v11702_v57, %v13100_v44  ;;  %v13128_v22 = vld [vmem:[#allocation39_spill] sm:$0xff]  ;;  %v13130_v44 = vld [vmem:[#allocation41_spill] sm:$0xff] }
 0x339   : > { %5553 = vst.msk [vmem:[%s10157_s29 + $0xf0] sm:$0xff] %vm410_vm1, %v5521_v61  ;;  %5554 = vst.msk [vmem:[%s10157_s29 + $0xf8] sm:$0xff] %vm410_vm1, %v5522_v8  ;;  %v13102_v20 = vsub.f32 %v13101_v37, %v11348_v35  ;;  %v13104_v40 = vsub.f32 %v13103_v53, %v11348_v35  ;;  %v13105_v2 = vsub.f32 %v11550_v0, %v11348_v35  ;;  %v13121_v61 = vld [vmem:[#allocation35_spill] sm:$0xff]  ;;  %v13132_v53 = vld [vmem:[#allocation40_spill] sm:$0xff] }
 0x33a   : > { %v13107_v30 = vsub.f32 %v13106_v27, %v11348_v35  ;;  %v13109_v59 = vsub.f32 %v13108_v15, %v11348_v35  ;;  %v13111_v42 = vsub.f32 %v13110_v38, %v11348_v35  ;;  %v13112_v0 = vsub.f32 %v11570_v55, %v11348_v35 }
 0x33b   : > { %v5631_v23 = vmul.f32 %v11702_v57, %v13102_v20  ;;  %v5632_v32 = vmul.f32 %v11702_v57, %v13104_v40  ;;  %v5633_v52 = vmul.f32 %v11702_v57, %v13105_v2  ;;  %v13114_v63 = vsub.f32 %v13113_v41, %v11348_v35 }
 0x33c   : > { %v5634_v46 = vmul.f32 %v11702_v57, %v13107_v30  ;;  %v12008_v24 = vmul.f32 %v11702_v57, %v13109_v59  ;;  %v12014_v56 = vmul.f32 %v11702_v57, %v13111_v42  ;;  %v12020_v7 = vmul.f32 %v11702_v57, %v13112_v0 }
 0x33d   : > { %v12026_v6 = vmul.f32 %v11702_v57, %v13114_v63  ;;  %v13116_v18 = vsub.f32 %v13115_v4, %v11348_v35  ;;  %v13118_v47 = vsub.f32 %v13117_v39, %v11348_v35  ;;  %v13120_v17 = vsub.f32 %v13119_v29, %v11348_v35  ;;  %v12171_v29 = vld [vmem:[%s10157_s29 + $0x288] sm:$0xff] }
 0x33e   : > { %v13122_v8 = vsub.f32 %v13121_v61, %v11348_v35  ;;  %v13124_v14 = vsub.f32 %v13123_v1, %v11348_v35  ;;  %v13126_v34 = vsub.f32 %v13125_v28, %v11348_v35  ;;  %v13127_v26 = vsub.f32 %v11618_v16, %v11348_v35  ;;  %v12189_v1 = vld [vmem:[%s10157_s29 + $0x298] sm:$0xff] }
 0x33f   : > { %v12032_v10 = vmul.f32 %v11702_v57, %v13116_v18  ;;  %v12038_v55 = vmul.f32 %v11702_v57, %v13118_v47  ;;  %v12044_v58 = vmul.f32 %v11702_v57, %v13120_v17  ;;  %v13129_v19 = vsub.f32 %v13128_v22, %v11348_v35  ;;  %v12174_v17 = vld [vmem:[%s10157_s29 + $0x280] sm:$0xff]  ;;  %v6864_v22 = vld [vmem:[%s10157_s29 + $0x2b8] sm:$0xff] }
 0x340   : > { %v12050_v60 = vmul.f32 %v11702_v57, %v13122_v8  ;;  %v12056_v54 = vmul.f32 %v11702_v57, %v13124_v14  ;;  %v12062_v11 = vmul.f32 %v11702_v57, %v13126_v34  ;;  %v12068_v45 = vmul.f32 %v11702_v57, %v13127_v26  ;;  %v6859_v14 = vld [vmem:[%s10157_s29 + $0x290] sm:$0xff] }
 0x341   : > { %v12074_v9 = vmul.f32 %v11702_v57, %v13129_v19  ;;  %v13131_v37 = vsub.f32 %v13130_v44, %v11348_v35  ;;  %v13133_v40 = vsub.f32 %v13132_v53, %v11348_v35  ;;  %v13134_v2 = vsub.f32 %v11638_v33, %v11348_v35  ;;  %v6863_v19 = vld [vmem:[%s10157_s29 + $0x2b0] sm:$0xff]  ;;  %v6866_v53 = vld [vmem:[%s10157_s29 + $0x2c8] sm:$0xff] }
 0x342   : > { %v13135_v30 = vsub.f32 %v11635_v36, %v11348_v35  ;;  %v5651_v59 = vmax.f32 %v5619_v5, 0.0  ;;  %v5652_v38 = vmax.f32 %v5620_v48, 0.0  ;;  %v5653_v42 = vmax.f32 %v5621_v31, 0.0 }
 0x343   : > { %v12080_v20 = vmul.f32 %v11702_v57, %v13131_v37  ;;  %v12086_v16 = vmul.f32 %v11702_v57, %v13133_v40  ;;  %v12092_v27 = vmul.f32 %v11702_v57, %v13134_v2  ;;  %v5654_v0 = vmax.f32 %v5622_v25, 0.0  ;;  %v6865_v40 = vld [vmem:[%s10157_s29 + $0x2c0] sm:$0xff] }
 0x344   : > { %v12098_v15 = vmul.f32 %v11702_v57, %v13135_v30  ;;  %v5655_v41 = vmax.f32 %v5623_v3, 0.0  ;;  %v5656_v63 = vmax.f32 %v5624_v43, 0.0  ;;  %v5657_v33 = vmax.f32 %v5625_v49, 0.0  ;;  %6809 = vst.msk [vmem:[%s10157_s29 + $0x100] sm:$0xff] %vm410_vm1, %v5651_v59  ;;  %6810 = vst.msk [vmem:[%s10157_s29 + $0x108] sm:$0xff] %vm410_vm1, %v5652_v38  ;;  %v6867_v59 = vld [vmem:[%s10157_s29 + $0x2d0] sm:$0xff] }
 0x345   : > { %v5658_v4 = vmax.f32 %v5626_v50, 0.0  ;;  %v5659_v18 = vmax.f32 %v5627_v51, 0.0  ;;  %v5660_v39 = vmax.f32 %v5628_v12, 0.0  ;;  %v5661_v36 = vmax.f32 %v5629_v21, 0.0  ;;  %6811 = vst.msk [vmem:[%s10157_s29 + $0x110] sm:$0xff] %vm410_vm1, %v5653_v42  ;;  %6812 = vst.msk [vmem:[%s10157_s29 + $0x118] sm:$0xff] %vm410_vm1, %v5654_v0 }
 0x346   : > { %v5662_v47 = vmax.f32 %v5630_v62, 0.0  ;;  %v5663_v5 = vmax.f32 %v5631_v23, 0.0  ;;  %v5664_v48 = vmax.f32 %v5632_v32, 0.0  ;;  %v5665_v31 = vmax.f32 %v5633_v52, 0.0  ;;  %6813 = vst.msk [vmem:[%s10157_s29 + $0x120] sm:$0xff] %vm410_vm1, %v5655_v41  ;;  %6814 = vst.msk [vmem:[%s10157_s29 + $0x128] sm:$0xff] %vm410_vm1, %v5656_v63 }
 0x347   : > { %v5666_v25 = vmax.f32 %v5634_v46, 0.0  ;;  %6815 = vst.msk [vmem:[%s10157_s29 + $0x130] sm:$0xff] %vm410_vm1, %v5657_v33  ;;  %6816 = vst.msk [vmem:[%s10157_s29 + $0x138] sm:$0xff] %vm410_vm1, %v5658_v4  ;;  %v5667_v3 = vmax.f32 %v12008_v24, 0.0  ;;  %v5668_v43 = vmax.f32 %v12014_v56, 0.0  ;;  %v5669_v49 = vmax.f32 %v12020_v7, 0.0 }
 0x348   : > { %v5670_v50 = vmax.f32 %v12026_v6, 0.0  ;;  %6817 = vst.msk [vmem:[%s10157_s29 + $0x140] sm:$0xff] %vm410_vm1, %v5659_v18  ;;  %6818 = vst.msk [vmem:[%s10157_s29 + $0x148] sm:$0xff] %vm410_vm1, %v5660_v39  ;;  %v12129_v51 = vld [vmem:[%s10157_s29 + $0x258] sm:$0xff]  ;;  %v12132_v12 = vld [vmem:[%s10157_s29 + $0x250] sm:$0xff]  ;;  %v5671_v23 = vmax.f32 %v12032_v10, 0.0  ;;  %v5763_v37 = vsub.f32 %v12174_v17, %v11348_v35  ;;  %v5765_v2 = vsub.f32 %v6859_v14, %v11348_v35 }
 0x349   : > { %6819 = vst.msk [vmem:[%s10157_s29 + $0x150] sm:$0xff] %vm410_vm1, %v5661_v36  ;;  %6820 = vst.msk [vmem:[%s10157_s29 + $0x158] sm:$0xff] %vm410_vm1, %v5662_v47  ;;  %v12135_v21 = vld [vmem:[%s10157_s29 + $0x268] sm:$0xff]  ;;  %v12138_v62 = vld [vmem:[%s10157_s29 + $0x260] sm:$0xff]  ;;  %v5672_v32 = vmax.f32 %v12038_v55, 0.0  ;;  %v5673_v52 = vmax.f32 %v12044_v58, 0.0  ;;  %v5757_v28 = vsub.f32 %v12132_v12, %v11348_v35  ;;  %v5758_v34 = vsub.f32 %v12129_v51, %v11348_v35 }
 0x34a   : > { %v5674_v46 = vmax.f32 %v12050_v60, 0.0  ;;  %6821 = vst.msk [vmem:[%s10157_s29 + $0x160] sm:$0xff] %vm410_vm1, %v5663_v5  ;;  %6822 = vst.msk [vmem:[%s10157_s29 + $0x168] sm:$0xff] %vm410_vm1, %v5664_v48  ;;  %v12153_v24 = vld [vmem:[%s10157_s29 + $0x278] sm:$0xff]  ;;  %v12156_v56 = vld [vmem:[%s10157_s29 + $0x270] sm:$0xff]  ;;  %v5675_v7 = vmax.f32 %v12056_v54, 0.0  ;;  %v5760_v26 = vsub.f32 %v12135_v21, %v11348_v35  ;;  %v5769_v0 = vsub.f32 %v6863_v19, %v11348_v35 }
 0x34b   : > { %6823 = vst.msk [vmem:[%s10157_s29 + $0x170] sm:$0xff] %vm410_vm1, %v5665_v31  ;;  %6824 = vst.msk [vmem:[%s10157_s29 + $0x178] sm:$0xff] %vm410_vm1, %v5666_v25  ;;  %v5676_v6 = vmax.f32 %v12062_v11, 0.0  ;;  %v5677_v10 = vmax.f32 %v12068_v45, 0.0  ;;  %v5678_v55 = vmax.f32 %v12074_v9, 0.0  ;;  %v5679_v58 = vmax.f32 %v12080_v20, 0.0 }
 0x34c   : > { %6825 = vst.msk [vmem:[%s10157_s29 + $0x180] sm:$0xff] %vm410_vm1, %v5667_v3  ;;  %6826 = vst.msk [vmem:[%s10157_s29 + $0x188] sm:$0xff] %vm410_vm1, %v5668_v43  ;;  %v5680_v61 = vmax.f32 %v12086_v16, 0.0  ;;  %v5681_v8 = vmax.f32 %v12092_v27, 0.0  ;;  %v5682_v60 = vmax.f32 %v12098_v15, 0.0  ;;  %v12193_v54 = vld [vmem:[%s10157_s29 + $0x2a8] sm:$0xff]  ;;  %v5759_v11 = vsub.f32 %v12138_v62, %v11348_v35 }
 0x34d   : > { %6827 = vst.msk [vmem:[%s10157_s29 + $0x190] sm:$0xff] %vm410_vm1, %v5669_v49  ;;  %6828 = vst.msk [vmem:[%s10157_s29 + $0x198] sm:$0xff] %vm410_vm1, %v5670_v50  ;;  %v6861_v45 = vld [vmem:[%s10157_s29 + $0x2a0] sm:$0xff]  ;;  %v5761_v9 = vsub.f32 %v12156_v56, %v11348_v35  ;;  %v5762_v44 = vsub.f32 %v12153_v24, %v11348_v35  ;;  %v5764_v20 = vsub.f32 %v12171_v29, %v11348_v35  ;;  %v6868_v16 = vld [vmem:[%s10157_s29 + $0x2d8] sm:$0xff] }
 0x34e   : > { %6829 = vst.msk [vmem:[%s10157_s29 + $0x1a0] sm:$0xff] %vm410_vm1, %v5671_v23  ;;  %6830 = vst.msk [vmem:[%s10157_s29 + $0x1a8] sm:$0xff] %vm410_vm1, %v5672_v32  ;;  %v5766_v27 = vsub.f32 %v12189_v1, %v11348_v35  ;;  %v5767_v30 = vsub.f32 %v6861_v45, %v11348_v35  ;;  %v5768_v15 = vsub.f32 %v12193_v54, %v11348_v35  ;;  %v6870_v38 = vld [vmem:[%s10157_s29 + $0x2e8] sm:$0xff]  ;;  %v6869_v42 = vld [vmem:[%s10157_s29 + $0x2e0] sm:$0xff] }
 0x34f   : > { %6831 = vst.msk [vmem:[%s10157_s29 + $0x1b0] sm:$0xff] %vm410_vm1, %v5673_v52  ;;  %6832 = vst.msk [vmem:[%s10157_s29 + $0x1b8] sm:$0xff] %vm410_vm1, %v5674_v46  ;;  %v5770_v41 = vsub.f32 %v6864_v22, %v11348_v35  ;;  %v5771_v63 = vsub.f32 %v6865_v40, %v11348_v35  ;;  %v5772_v33 = vsub.f32 %v6866_v53, %v11348_v35  ;;  %v6872_v4 = vld [vmem:[%s10157_s29 + $0x2f8] sm:$0xff]  ;;  %v6871_v18 = vld [vmem:[%s10157_s29 + $0x2f0] sm:$0xff] }
 0x350   : > { %6833 = vst.msk [vmem:[%s10157_s29 + $0x1c0] sm:$0xff] %vm410_vm1, %v5675_v7  ;;  %6834 = vst.msk [vmem:[%s10157_s29 + $0x1c8] sm:$0xff] %vm410_vm1, %v5676_v6  ;;  %v5773_v39 = vsub.f32 %v6867_v59, %v11348_v35  ;;  %v5774_v36 = vsub.f32 %v6868_v16, %v11348_v35  ;;  %v5775_v47 = vsub.f32 %v6869_v42, %v11348_v35  ;;  %v13136_v25 = vld [vmem:[#allocation43_spill] sm:$0xff]  ;;  %v13138_v49 = vld [vmem:[#allocation42_spill] sm:$0xff] }
 0x351   : > { %6835 = vst.msk [vmem:[%s10157_s29 + $0x1d0] sm:$0xff] %vm410_vm1, %v5677_v10  ;;  %6836 = vst.msk [vmem:[%s10157_s29 + $0x1d8] sm:$0xff] %vm410_vm1, %v5678_v55  ;;  %v5776_v5 = vsub.f32 %v6870_v38, %v11348_v35  ;;  %v5777_v48 = vsub.f32 %v6871_v18, %v11348_v35  ;;  %v5778_v31 = vsub.f32 %v6872_v4, %v11348_v35  ;;  %v13141_v62 = vld [vmem:[#allocation44_spill] sm:$0xff]  ;;  %v13143_v52 = vld [vmem:[#allocation46_spill] sm:$0xff] }
 0x352   : > { %6837 = vst.msk [vmem:[%s10157_s29 + $0x1e0] sm:$0xff] %vm410_vm1, %v5679_v58  ;;  %6838 = vst.msk [vmem:[%s10157_s29 + $0x1e8] sm:$0xff] %vm410_vm1, %v5680_v61  ;;  %v13137_v3 = vsub.f32 %v13136_v25, %v11348_v35  ;;  %v13139_v50 = vsub.f32 %v13138_v49, %v11348_v35  ;;  %v13140_v12 = vsub.f32 %v11658_v13, %v11348_v35  ;;  %v13145_v56 = vld [vmem:[#allocation45_spill] sm:$0xff]  ;;  %v13147_v10 = vld [vmem:[#allocation48_spill] sm:$0xff] }
 0x353   : > { %6839 = vst.msk [vmem:[%s10157_s29 + $0x1f0] sm:$0xff] %vm410_vm1, %v5681_v8  ;;  %6840 = vst.msk [vmem:[%s10157_s29 + $0x1f8] sm:$0xff] %vm410_vm1, %v5682_v60  ;;  %v13142_v23 = vsub.f32 %v13141_v62, %v11348_v35  ;;  %v13144_v46 = vsub.f32 %v13143_v52, %v11348_v35  ;;  %v13146_v7 = vsub.f32 %v13145_v56, %v11348_v35  ;;  %v13149_v29 = vld [vmem:[#allocation47_spill] sm:$0xff]  ;;  %v13151_v61 = vld [vmem:[#allocation50_spill] sm:$0xff] }
 0x354   : > { %v5779_v43 = vmul.f32 %v11702_v57, %v13137_v3  ;;  %v5780_v51 = vmul.f32 %v11702_v57, %v13139_v50  ;;  %v5781_v21 = vmul.f32 %v11702_v57, %v13140_v12  ;;  %v13148_v13 = vsub.f32 %v13147_v10, %v11348_v35  ;;  %v13153_v1 = vld [vmem:[#allocation49_spill] sm:$0xff]  ;;  %v12380_v62 = vld [vmem:[%s10157_s29 + $0x300] sm:$0xff]  ;;  %v12398_v56 = vld [vmem:[%s10157_s29 + $0x310] sm:$0xff] }
 0x355   : > { %v5782_v32 = vmul.f32 %v11702_v57, %v13142_v23  ;;  %v5783_v24 = vmul.f32 %v11702_v57, %v13144_v46  ;;  %v5784_v6 = vmul.f32 %v11702_v57, %v13146_v7  ;;  %v13150_v17 = vsub.f32 %v13149_v29, %v11348_v35  ;;  %v12401_v7 = vld [vmem:[%s10157_s29 + $0x328] sm:$0xff] }
 0x356   : > { %v5785_v55 = vmul.f32 %v11702_v57, %v13148_v13  ;;  %v13152_v8 = vsub.f32 %v13151_v61, %v11348_v35  ;;  %v13154_v14 = vsub.f32 %v13153_v1, %v11348_v35  ;;  %v5789_v45 = vmul.f32 %v11702_v57, %v5757_v28  ;;  %v12425_v61 = vld [vmem:[%s10157_s29 + $0x348] sm:$0xff] }
 0x357   : > { %v5786_v58 = vmul.f32 %v11702_v57, %v13150_v17  ;;  %v5790_v22 = vmul.f32 %v11702_v57, %v5758_v34  ;;  %v5791_v19 = vmul.f32 %v11702_v57, %v5759_v11  ;;  %v5792_v53 = vmul.f32 %v11702_v57, %v5760_v26  ;;  %v12419_v17 = vld [vmem:[%s10157_s29 + $0x338] sm:$0xff] }
 0x358   : > { %v5787_v60 = vmul.f32 %v11702_v57, %v13152_v8  ;;  %v5788_v54 = vmul.f32 %v11702_v57, %v13154_v14  ;;  %v12299_v40 = vmul.f32 %v11702_v57, %v5761_v9  ;;  %v12302_v16 = vmul.f32 %v11702_v57, %v5762_v44 }
 0x359   : > { %v12305_v59 = vmul.f32 %v11702_v57, %v5763_v37  ;;  %v12308_v38 = vmul.f32 %v11702_v57, %v5764_v20  ;;  %v12311_v28 = vmul.f32 %v11702_v57, %v5765_v2  ;;  %v12314_v34 = vmul.f32 %v11702_v57, %v5766_v27 }
 0x35a   : > { %v12317_v11 = vmul.f32 %v11702_v57, %v5767_v30  ;;  %v12320_v26 = vmul.f32 %v11702_v57, %v5768_v15  ;;  %v12323_v9 = vmul.f32 %v11702_v57, %v5769_v0  ;;  %v12326_v44 = vmul.f32 %v11702_v57, %v5770_v41 }
 0x35b   : > { %v12329_v37 = vmul.f32 %v11702_v57, %v5771_v63  ;;  %v12332_v20 = vmul.f32 %v11702_v57, %v5772_v33  ;;  %v12335_v2 = vmul.f32 %v11702_v57, %v5773_v39  ;;  %v12338_v27 = vmul.f32 %v11702_v57, %v5774_v36 }
 0x35c   : > { %v12341_v30 = vmul.f32 %v11702_v57, %v5775_v47  ;;  %v12344_v15 = vmul.f32 %v11702_v57, %v5776_v5  ;;  %v12347_v42 = vmul.f32 %v11702_v57, %v5777_v48  ;;  %v12350_v0 = vmul.f32 %v11702_v57, %v5778_v31 }
 0x35d   : > { %v5811_v41 = vmax.f32 %v5779_v43, 0.0  ;;  %v5812_v63 = vmax.f32 %v5780_v51, 0.0  ;;  %v5813_v33 = vmax.f32 %v5781_v21, 0.0  ;;  %v5814_v4 = vmax.f32 %v5782_v32, 0.0  ;;  %v12377_v21 = vld [vmem:[%s10157_s29 + $0x308] sm:$0xff] }
 0x35e   : > { %v5815_v18 = vmax.f32 %v5783_v24, 0.0  ;;  %v5816_v39 = vmax.f32 %v5784_v6, 0.0  ;;  %v5817_v36 = vmax.f32 %v5785_v55, 0.0  ;;  %v5818_v47 = vmax.f32 %v5786_v58, 0.0  ;;  %v12395_v24 = vld [vmem:[%s10157_s29 + $0x318] sm:$0xff]  ;;  %v12404_v6 = vld [vmem:[%s10157_s29 + $0x320] sm:$0xff] }
 0x35f   : > { %v5819_v5 = vmax.f32 %v5787_v60, 0.0  ;;  %v5820_v25 = vmax.f32 %v5788_v54, 0.0  ;;  %6873 = vst.msk [vmem:[%s10157_s29 + $0x200] sm:$0xff] %vm410_vm1, %v5811_v41  ;;  %6874 = vst.msk [vmem:[%s10157_s29 + $0x208] sm:$0xff] %vm410_vm1, %v5812_v63  ;;  %v5821_v48 = vmax.f32 %v5789_v45, 0.0  ;;  %v5822_v31 = vmax.f32 %v5790_v22, 0.0 }
 0x360   : > { %v5823_v3 = vmax.f32 %v5791_v19, 0.0  ;;  %v5824_v43 = vmax.f32 %v5792_v53, 0.0  ;;  %6875 = vst.msk [vmem:[%s10157_s29 + $0x210] sm:$0xff] %vm410_vm1, %v5813_v33  ;;  %6876 = vst.msk [vmem:[%s10157_s29 + $0x218] sm:$0xff] %vm410_vm1, %v5814_v4  ;;  %v5825_v49 = vmax.f32 %v12299_v40, 0.0  ;;  %v5826_v50 = vmax.f32 %v12302_v16, 0.0 }
 0x361   : > { %6877 = vst.msk [vmem:[%s10157_s29 + $0x220] sm:$0xff] %vm410_vm1, %v5815_v18  ;;  %6878 = vst.msk [vmem:[%s10157_s29 + $0x228] sm:$0xff] %vm410_vm1, %v5816_v39  ;;  %v5827_v51 = vmax.f32 %v12305_v59, 0.0  ;;  %v5828_v12 = vmax.f32 %v12308_v38, 0.0  ;;  %v5829_v23 = vmax.f32 %v12311_v28, 0.0  ;;  %v5830_v32 = vmax.f32 %v12314_v34, 0.0 }
 0x362   : > { %6879 = vst.msk [vmem:[%s10157_s29 + $0x230] sm:$0xff] %vm410_vm1, %v5817_v36  ;;  %6880 = vst.msk [vmem:[%s10157_s29 + $0x238] sm:$0xff] %vm410_vm1, %v5818_v47  ;;  %v5831_v52 = vmax.f32 %v12317_v11, 0.0  ;;  %v5832_v46 = vmax.f32 %v12320_v26, 0.0  ;;  %v5833_v10 = vmax.f32 %v12323_v9, 0.0  ;;  %v5834_v13 = vmax.f32 %v12326_v44, 0.0 }
 0x363   : > { %6881 = vst.msk [vmem:[%s10157_s29 + $0x240] sm:$0xff] %vm410_vm1, %v5819_v5  ;;  %6882 = vst.msk [vmem:[%s10157_s29 + $0x248] sm:$0xff] %vm410_vm1, %v5820_v25  ;;  %v5835_v55 = vmax.f32 %v12329_v37, 0.0  ;;  %v5836_v29 = vmax.f32 %v12332_v20, 0.0  ;;  %v12422_v58 = vld [vmem:[%s10157_s29 + $0x330] sm:$0xff]  ;;  %v5837_v8 = vmax.f32 %v12335_v2, 0.0  ;;  %v5907_v40 = vsub.f32 %v12380_v62, %v11348_v35 }
 0x364   : > { %6883 = vst.msk [vmem:[%s10157_s29 + $0x250] sm:$0xff] %vm410_vm1, %v5821_v48  ;;  %6884 = vst.msk [vmem:[%s10157_s29 + $0x258] sm:$0xff] %vm410_vm1, %v5822_v31  ;;  %v5838_v60 = vmax.f32 %v12338_v27, 0.0  ;;  %v5839_v1 = vmax.f32 %v12341_v30, 0.0  ;;  %v5840_v14 = vmax.f32 %v12344_v15, 0.0  ;;  %v12440_v54 = vld [vmem:[%s10157_s29 + $0x340] sm:$0xff]  ;;  %v5908_v16 = vsub.f32 %v12377_v21, %v11348_v35 }
 0x365   : > { %6885 = vst.msk [vmem:[%s10157_s29 + $0x260] sm:$0xff] %vm410_vm1, %v5823_v3  ;;  %6886 = vst.msk [vmem:[%s10157_s29 + $0x268] sm:$0xff] %vm410_vm1, %v5824_v43  ;;  %v12443_v45 = vld [vmem:[%s10157_s29 + $0x358] sm:$0xff]  ;;  %v12446_v22 = vld [vmem:[%s10157_s29 + $0x350] sm:$0xff]  ;;  %v5841_v19 = vmax.f32 %v12347_v42, 0.0  ;;  %v5842_v53 = vmax.f32 %v12350_v0, 0.0  ;;  %v5909_v34 = vsub.f32 %v12398_v56, %v11348_v35  ;;  %v5910_v11 = vsub.f32 %v12395_v24, %v11348_v35 }
 0x366   : > { %6887 = vst.msk [vmem:[%s10157_s29 + $0x270] sm:$0xff] %vm410_vm1, %v5825_v49  ;;  %6888 = vst.msk [vmem:[%s10157_s29 + $0x278] sm:$0xff] %vm410_vm1, %v5826_v50  ;;  %v12463_v59 = vld [vmem:[%s10157_s29 + $0x368] sm:$0xff]  ;;  %v12466_v38 = vld [vmem:[%s10157_s29 + $0x360] sm:$0xff]  ;;  %v5911_v26 = vsub.f32 %v12404_v6, %v11348_v35  ;;  %v5912_v9 = vsub.f32 %v12401_v7, %v11348_v35  ;;  %v5913_v2 = vsub.f32 %v12422_v58, %v11348_v35 }
 0x367   : > { %6889 = vst.msk [vmem:[%s10157_s29 + $0x280] sm:$0xff] %vm410_vm1, %v5827_v51  ;;  %6890 = vst.msk [vmem:[%s10157_s29 + $0x288] sm:$0xff] %vm410_vm1, %v5828_v12  ;;  %v12469_v28 = vld [vmem:[%s10157_s29 + $0x378] sm:$0xff]  ;;  %v6919_v44 = vld [vmem:[%s10157_s29 + $0x370] sm:$0xff]  ;;  %v5914_v27 = vsub.f32 %v12419_v17, %v11348_v35  ;;  %v5915_v30 = vsub.f32 %v12440_v54, %v11348_v35  ;;  %v5916_v15 = vsub.f32 %v12425_v61, %v11348_v35 }
 0x368   : > { %6891 = vst.msk [vmem:[%s10157_s29 + $0x290] sm:$0xff] %vm410_vm1, %v5829_v23  ;;  %6892 = vst.msk [vmem:[%s10157_s29 + $0x298] sm:$0xff] %vm410_vm1, %v5830_v32  ;;  %v6922_v37 = vld [vmem:[%s10157_s29 + $0x388] sm:$0xff]  ;;  %v6921_v20 = vld [vmem:[%s10157_s29 + $0x380] sm:$0xff]  ;;  %v5917_v63 = vsub.f32 %v12446_v22, %v11348_v35  ;;  %v5918_v33 = vsub.f32 %v12443_v45, %v11348_v35  ;;  %v5919_v4 = vsub.f32 %v12466_v38, %v11348_v35 }
 0x369   : > { %6893 = vst.msk [vmem:[%s10157_s29 + $0x2a0] sm:$0xff] %vm410_vm1, %v5831_v52  ;;  %6894 = vst.msk [vmem:[%s10157_s29 + $0x2a8] sm:$0xff] %vm410_vm1, %v5832_v46  ;;  %v6924_v42 = vld [vmem:[%s10157_s29 + $0x398] sm:$0xff]  ;;  %v6923_v0 = vld [vmem:[%s10157_s29 + $0x390] sm:$0xff]  ;;  %v5920_v18 = vsub.f32 %v12463_v59, %v11348_v35  ;;  %v5921_v5 = vsub.f32 %v6919_v44, %v11348_v35  ;;  %v5922_v25 = vsub.f32 %v12469_v28, %v11348_v35 }
 0x36a   : > { %6895 = vst.msk [vmem:[%s10157_s29 + $0x2b0] sm:$0xff] %vm410_vm1, %v5833_v10  ;;  %6896 = vst.msk [vmem:[%s10157_s29 + $0x2b8] sm:$0xff] %vm410_vm1, %v5834_v13  ;;  %v6926_v41 = vld [vmem:[%s10157_s29 + $0x3a8] sm:$0xff]  ;;  %v6925_v39 = vld [vmem:[%s10157_s29 + $0x3a0] sm:$0xff]  ;;  %v5923_v48 = vsub.f32 %v6921_v20, %v11348_v35  ;;  %v5924_v31 = vsub.f32 %v6922_v37, %v11348_v35  ;;  %v5925_v50 = vsub.f32 %v6923_v0, %v11348_v35 }
 0x36b   : > { %6897 = vst.msk [vmem:[%s10157_s29 + $0x2c0] sm:$0xff] %vm410_vm1, %v5835_v55  ;;  %6898 = vst.msk [vmem:[%s10157_s29 + $0x2c8] sm:$0xff] %vm410_vm1, %v5836_v29  ;;  %v6928_v36 = vld [vmem:[%s10157_s29 + $0x3b8] sm:$0xff]  ;;  %v6927_v47 = vld [vmem:[%s10157_s29 + $0x3b0] sm:$0xff]  ;;  %v5926_v51 = vsub.f32 %v6924_v42, %v11348_v35  ;;  %v5927_v12 = vsub.f32 %v6925_v39, %v11348_v35  ;;  %v5928_v21 = vsub.f32 %v6926_v41, %v11348_v35 }
 0x36c   : > { %6899 = vst.msk [vmem:[%s10157_s29 + $0x2d0] sm:$0xff] %vm410_vm1, %v5837_v8  ;;  %6900 = vst.msk [vmem:[%s10157_s29 + $0x2d8] sm:$0xff] %vm410_vm1, %v5838_v60  ;;  %v6930_v3 = vld [vmem:[%s10157_s29 + $0x3c8] sm:$0xff]  ;;  %v6929_v43 = vld [vmem:[%s10157_s29 + $0x3c0] sm:$0xff]  ;;  %v5929_v52 = vsub.f32 %v6927_v47, %v11348_v35  ;;  %v5930_v46 = vsub.f32 %v6928_v36, %v11348_v35  ;;  %v5939_v61 = vmul.f32 %v11702_v57, %v5907_v40 }
 0x36d   : > { %6901 = vst.msk [vmem:[%s10157_s29 + $0x2e0] sm:$0xff] %vm410_vm1, %v5839_v1  ;;  %6902 = vst.msk [vmem:[%s10157_s29 + $0x2e8] sm:$0xff] %vm410_vm1, %v5840_v14  ;;  %v6932_v49 = vld [vmem:[%s10157_s29 + $0x3d8] sm:$0xff]  ;;  %v6931_v62 = vld [vmem:[%s10157_s29 + $0x3d0] sm:$0xff]  ;;  %v5931_v24 = vsub.f32 %v6929_v43, %v11348_v35  ;;  %v5932_v56 = vsub.f32 %v6930_v3, %v11348_v35  ;;  %v5940_v8 = vmul.f32 %v11702_v57, %v5908_v16 }
 0x36e   : > { %6903 = vst.msk [vmem:[%s10157_s29 + $0x2f0] sm:$0xff] %vm410_vm1, %v5841_v19  ;;  %6904 = vst.msk [vmem:[%s10157_s29 + $0x2f8] sm:$0xff] %vm410_vm1, %v5842_v53  ;;  %v6934_v23 = vld [vmem:[%s10157_s29 + $0x3e8] sm:$0xff]  ;;  %v6933_v32 = vld [vmem:[%s10157_s29 + $0x3e0] sm:$0xff]  ;;  %v5933_v10 = vsub.f32 %v6931_v62, %v11348_v35  ;;  %v5934_v13 = vsub.f32 %v6932_v49, %v11348_v35  ;;  %v5941_v60 = vmul.f32 %v11702_v57, %v5909_v34 }
 0x36f   : > { %v6936_v7 = vld [vmem:[%s10157_s29 + $0x3f8] sm:$0xff]  ;;  %v6935_v6 = vld [vmem:[%s10157_s29 + $0x3f0] sm:$0xff]  ;;  %v5935_v55 = vsub.f32 %v6933_v32, %v11348_v35  ;;  %v5936_v29 = vsub.f32 %v6934_v23, %v11348_v35  ;;  %v5942_v1 = vmul.f32 %v11702_v57, %v5910_v11  ;;  %v5943_v14 = vmul.f32 %v11702_v57, %v5911_v26 }
 0x370   : > { %v5937_v17 = vsub.f32 %v6935_v6, %v11348_v35  ;;  %v5938_v58 = vsub.f32 %v6936_v7, %v11348_v35  ;;  %v5944_v54 = vmul.f32 %v11702_v57, %v5912_v9  ;;  %v5945_v45 = vmul.f32 %v11702_v57, %v5913_v2 }
 0x371   : > { %v5946_v22 = vmul.f32 %v11702_v57, %v5914_v27  ;;  %v5947_v19 = vmul.f32 %v11702_v57, %v5915_v30  ;;  %v5948_v35 = vmul.f32 %v11702_v57, %v5916_v15  ;;  %v5949_v53 = vmul.f32 %v11702_v57, %v5917_v63 }
 0x372   : > { %v5950_v40 = vmul.f32 %v11702_v57, %v5918_v33  ;;  %v5951_v16 = vmul.f32 %v11702_v57, %v5919_v4  ;;  %v5952_v59 = vmul.f32 %v11702_v57, %v5920_v18  ;;  %v5953_v38 = vmul.f32 %v11702_v57, %v5921_v5 }
 0x373   : > { %v5954_v28 = vmul.f32 %v11702_v57, %v5922_v25  ;;  %v5955_v34 = vmul.f32 %v11702_v57, %v5923_v48  ;;  %v5956_v11 = vmul.f32 %v11702_v57, %v5924_v31  ;;  %v12562_v26 = vmul.f32 %v11702_v57, %v5925_v50 }
 0x374   : > { %v12565_v9 = vmul.f32 %v11702_v57, %v5926_v51  ;;  %v12568_v44 = vmul.f32 %v11702_v57, %v5927_v12  ;;  %v12571_v37 = vmul.f32 %v11702_v57, %v5928_v21  ;;  %v12574_v20 = vmul.f32 %v11702_v57, %v5929_v52 }
 0x375   : > { %v12577_v2 = vmul.f32 %v11702_v57, %v5930_v46  ;;  %v12580_v27 = vmul.f32 %v11702_v57, %v5931_v24  ;;  %v12583_v30 = vmul.f32 %v11702_v57, %v5932_v56  ;;  %v12586_v15 = vmul.f32 %v11702_v57, %v5933_v10 }
 0x376   : > { %v12589_v42 = vmul.f32 %v11702_v57, %v5934_v13  ;;  %v12592_v0 = vmul.f32 %v11702_v57, %v5935_v55  ;;  %v12595_v41 = vmul.f32 %v11702_v57, %v5936_v29  ;;  %v12598_v63 = vmul.f32 %v11702_v57, %v5937_v17 }
 0x377   : > { %v12601_v33 = vmul.f32 %v11702_v57, %v5938_v58  ;;  %v5971_v4 = vmax.f32 %v5939_v61, 0.0  ;;  %v5972_v18 = vmax.f32 %v5940_v8, 0.0  ;;  %v5973_v39 = vmax.f32 %v5941_v60, 0.0 }
 0x378   : > { %v5974_v36 = vmax.f32 %v5942_v1, 0.0  ;;  %v5975_v47 = vmax.f32 %v5943_v14, 0.0  ;;  %v5976_v5 = vmax.f32 %v5944_v54, 0.0  ;;  %v5977_v25 = vmax.f32 %v5945_v45, 0.0 }
 0x379   : > { %v5978_v48 = vmax.f32 %v5946_v22, 0.0  ;;  %v5979_v31 = vmax.f32 %v5947_v19, 0.0  ;;  %v5980_v3 = vmax.f32 %v5948_v35, 0.0  ;;  %6937 = vst.msk [vmem:[%s10157_s29 + $0x300] sm:$0xff] %vm410_vm1, %v5971_v4  ;;  %6938 = vst.msk [vmem:[%s10157_s29 + $0x308] sm:$0xff] %vm410_vm1, %v5972_v18  ;;  %v5981_v57 = vmax.f32 %v5949_v53, 0.0 }
 0x37a   : > { %v5982_v43 = vmax.f32 %v5950_v40, 0.0  ;;  %v5983_v49 = vmax.f32 %v5951_v16, 0.0  ;;  %v5984_v50 = vmax.f32 %v5952_v59, 0.0  ;;  %6939 = vst.msk [vmem:[%s10157_s29 + $0x310] sm:$0xff] %vm410_vm1, %v5973_v39  ;;  %6940 = vst.msk [vmem:[%s10157_s29 + $0x318] sm:$0xff] %vm410_vm1, %v5974_v36  ;;  %v5985_v51 = vmax.f32 %v5953_v38, 0.0 }
 0x37b   : > { %6941 = vst.msk [vmem:[%s10157_s29 + $0x320] sm:$0xff] %vm410_vm1, %v5975_v47  ;;  %6942 = vst.msk [vmem:[%s10157_s29 + $0x328] sm:$0xff] %vm410_vm1, %v5976_v5  ;;  %v5986_v12 = vmax.f32 %v5954_v28, 0.0  ;;  %v5987_v21 = vmax.f32 %v5955_v34, 0.0  ;;  %v5988_v62 = vmax.f32 %v5956_v11, 0.0  ;;  %v5989_v23 = vmax.f32 %v12562_v26, 0.0 }
 0x37c   : > { %6943 = vst.msk [vmem:[%s10157_s29 + $0x330] sm:$0xff] %vm410_vm1, %v5977_v25  ;;  %6944 = vst.msk [vmem:[%s10157_s29 + $0x338] sm:$0xff] %vm410_vm1, %v5978_v48  ;;  %v5990_v32 = vmax.f32 %v12565_v9, 0.0  ;;  %v5991_v52 = vmax.f32 %v12568_v44, 0.0  ;;  %v5992_v46 = vmax.f32 %v12571_v37, 0.0  ;;  %v5993_v24 = vmax.f32 %v12574_v20, 0.0 }
 0x37d   : > { %6945 = vst.msk [vmem:[%s10157_s29 + $0x340] sm:$0xff] %vm410_vm1, %v5979_v31  ;;  %6946 = vst.msk [vmem:[%s10157_s29 + $0x348] sm:$0xff] %vm410_vm1, %v5980_v3  ;;  %v5994_v56 = vmax.f32 %v12577_v2, 0.0  ;;  %v5995_v7 = vmax.f32 %v12580_v27, 0.0  ;;  %v5996_v6 = vmax.f32 %v12583_v30, 0.0  ;;  %v5997_v10 = vmax.f32 %v12586_v15, 0.0 }
 0x37e   : > { %6947 = vst.msk [vmem:[%s10157_s29 + $0x350] sm:$0xff] %vm410_vm1, %v5981_v57  ;;  %6948 = vst.msk [vmem:[%s10157_s29 + $0x358] sm:$0xff] %vm410_vm1, %v5982_v43  ;;  %v5998_v13 = vmax.f32 %v12589_v42, 0.0  ;;  %v5999_v55 = vmax.f32 %v12592_v0, 0.0  ;;  %v6000_v29 = vmax.f32 %v12595_v41, 0.0  ;;  %v6001_v17 = vmax.f32 %v12598_v63, 0.0 }
 0x37f   : > { %6949 = vst.msk [vmem:[%s10157_s29 + $0x360] sm:$0xff] %vm410_vm1, %v5983_v49  ;;  %6950 = vst.msk [vmem:[%s10157_s29 + $0x368] sm:$0xff] %vm410_vm1, %v5984_v50  ;;  %v6002_v58 = vmax.f32 %v12601_v33, 0.0 }
 0x380   : > { %6951 = vst.msk [vmem:[%s10157_s29 + $0x370] sm:$0xff] %vm410_vm1, %v5985_v51  ;;  %6952 = vst.msk [vmem:[%s10157_s29 + $0x378] sm:$0xff] %vm410_vm1, %v5986_v12 }
 0x381   : > { %6953 = vst.msk [vmem:[%s10157_s29 + $0x380] sm:$0xff] %vm410_vm1, %v5987_v21  ;;  %6954 = vst.msk [vmem:[%s10157_s29 + $0x388] sm:$0xff] %vm410_vm1, %v5988_v62 }
 0x382   : > { %6955 = vst.msk [vmem:[%s10157_s29 + $0x390] sm:$0xff] %vm410_vm1, %v5989_v23  ;;  %6956 = vst.msk [vmem:[%s10157_s29 + $0x398] sm:$0xff] %vm410_vm1, %v5990_v32 }
 0x383   : > { %6957 = vst.msk [vmem:[%s10157_s29 + $0x3a0] sm:$0xff] %vm410_vm1, %v5991_v52  ;;  %6958 = vst.msk [vmem:[%s10157_s29 + $0x3a8] sm:$0xff] %vm410_vm1, %v5992_v46 }
 0x384   : > { %6959 = vst.msk [vmem:[%s10157_s29 + $0x3b0] sm:$0xff] %vm410_vm1, %v5993_v24  ;;  %6960 = vst.msk [vmem:[%s10157_s29 + $0x3b8] sm:$0xff] %vm410_vm1, %v5994_v56 }
 0x385   : > { %6961 = vst.msk [vmem:[%s10157_s29 + $0x3c0] sm:$0xff] %vm410_vm1, %v5995_v7  ;;  %6962 = vst.msk [vmem:[%s10157_s29 + $0x3c8] sm:$0xff] %vm410_vm1, %v5996_v6 }
 0x386   : > { %6963 = vst.msk [vmem:[%s10157_s29 + $0x3d0] sm:$0xff] %vm410_vm1, %v5997_v10  ;;  %6964 = vst.msk [vmem:[%s10157_s29 + $0x3d8] sm:$0xff] %vm410_vm1, %v5998_v13 }
 0x387   : > { %6965 = vst.msk [vmem:[%s10157_s29 + $0x3e0] sm:$0xff] %vm410_vm1, %v5999_v55  ;;  %6966 = vst.msk [vmem:[%s10157_s29 + $0x3e8] sm:$0xff] %vm410_vm1, %v6000_v29 }
 0x388   : > { %6967 = vst.msk [vmem:[%s10157_s29 + $0x3f0] sm:$0xff] %vm410_vm1, %v6001_v17  ;;  %6968 = vst.msk [vmem:[%s10157_s29 + $0x3f8] sm:$0xff] %vm410_vm1, %v6002_v58 }
 0x389 PF: > { %s12_s11 = sadd.s32 1, %s8765_s11   ;;  %s13155_s9 = smov %s8761_s10 }
 0x38a   : > { %p9_p5 = scmp.ge.s32.totalorder %s12_s11, 4   ;;  %s13156_s10 = smov %s13158_s12 }
 0x38c   :  { %11 = sbr.rel (!%p9_p5) target bundleno = 2 (0x2), region = 79 }

</bundles_post_ra>
